<compile_context>
chip_gen: v6e
topology: v6e:2x2x1
jax: 0.10.0
libtpu: 0.0.40
codegen_flags: <defaults>
</compile_context>

<pallas_src>
import functools

import jax
import jax.numpy as jnp
from jax.experimental import pallas as pl
from jax.experimental.pallas import tpu as pltpu


def _hebbian_kernel(
    # inputs
    xr_ref, hebb_ref,
    wbig_ref, b0_ref, alphaflat_ref, s_ref, t_ref,
    w1f_ref, b1f_ref, whead_ref, bhead_ref,
    modfan_w_ref, modfan_b_ref,
    # outputs
    slab_ref, hebbout_ref,
    *, sf: bool, rec_size: int, n_actions: int,
):
    R = rec_size
    RR = R * R
    nA = n_actions

    xr = xr_ref[...]          # [tB, isize + R]  = [x | rec]
    hebb = hebb_ref[...]      # [tB, R*R]        row-major flatten of [R, R]

    # ---- fused leading matmul: one MXU pass produces
    #   rec_exp = rec @ E     (rec[b, k//R] broadcast, lane-dense)
    #   pre0    = x @ w0      (layer-0 pre-activation)
    #   rec_lin = rec @ wrec  (linear part of the plastic recurrent term)
    fused = jnp.dot(xr, wbig_ref[...], preferred_element_type=jnp.float32)
    rec_exp = fused[:, :RR]                         # [tB, RR]
    pre0 = fused[:, RR:RR + R] + b0_ref[...]        # [tB, R]
    rec_lin = fused[:, RR + 128:RR + 128 + R]       # [tB, R]
    h0 = jnp.tanh(pre0)                             # rec_layer_values

    # ---- plastic recurrent term: sum_r rec[b,r] * alpha[r,s] * hebb[b,r,s]
    # lane-dense elementwise product, contraction on the (near-idle) MXU.
    plastic = jnp.dot(rec_exp * alphaflat_ref[...] * hebb, s_ref[...],
                      preferred_element_type=jnp.float32)        # [tB, R]
    rec_term = rec_lin + plastic

    # ---- layer 1 fused with the h2mod head (both consume h0) ----
    pre1 = (jnp.dot(h0, w1f_ref[...], preferred_element_type=jnp.float32)
            + b1f_ref[...])                                      # [tB, R+1]
    h1 = jnp.tanh(pre1[:, :R] + rec_term)                        # [tB, R]
    eta = jnp.tanh(pre1[:, R:R + 1])                             # [tB, 1]

    # ---- output layer fused with the h2v value head (both consume h1) ----
    head = (jnp.dot(h1, whead_ref[...], preferred_element_type=jnp.float32)
            + bhead_ref[...])                                    # [tB, nA+1]
    logits = head[:, :nA]
    v = head[:, nA:nA + 1]

    if sf:
        m = jnp.max(logits, axis=1, keepdims=True)
        e = jnp.exp(logits - m)
        act = e / jnp.sum(e, axis=1, keepdims=True)   # exact divide (tiny op)
    else:
        act = logits

    # ---- merged output slab: [h0(R) | act(nA) | v(1) | garbage pad] ----
    slab_ref[:, :R] = h0
    slab_ref[:, R:R + nA] = act
    slab_ref[:, R + nA:R + nA + 1] = v

    # ---- Hebbian trace update (fused algebra, lane-dense, in place) ----
    g = h0 * (eta * modfan_w_ref[...] + modfan_b_ref[...])       # [tB, R]
    g_exp = jnp.dot(g, t_ref[...],
                    preferred_element_type=jnp.float32)          # [tB, RR]
    hebbout_ref[...] = jnp.clip(hebb + rec_exp * g_exp, -2.0, 2.0)


def _pick_block_b(batch: int, cap: int) -> int:
    """Largest divisor of `batch` that is a multiple of 8 and <= cap."""
    if batch <= 8 or batch % 8 != 0:
        return batch                    # single full-batch block (no padding)
    best = 8
    for cand in range(8, min(batch, cap) + 1, 8):
        if batch % cand == 0:
            best = cand
    return best


@functools.partial(jax.jit, static_argnames=("sf", "block_b"),
                   donate_argnums=(3,))          # donate hebb -> true in-place
def hebbian_forward(params, x, rec_vals, hebb, *, sf=True, block_b=None):
    B, isize = x.shape
    R = rec_vals.shape[1]
    RR = R * R
    nA = params["w2"].shape[1]
    f32 = jnp.float32

    if block_b is None:
        # Conservative cap that fits every generation with the 48 MiB limit
        # below; grow toward 1-2K on v6e/v7x for large batches.
        block_b = _pick_block_b(B, 512)
    if B % block_b != 0:
        raise ValueError("block_b must divide the batch size")
    if block_b % 8 != 0 and block_b != B:
        raise ValueError("block_b must be a multiple of 8 (or the full batch)")

    # ---- wrapper-side weight prep (tiny, traced once under jit) ----
    eye = jnp.eye(R, dtype=f32)
    E = jnp.repeat(eye, R, axis=1)      # [R, RR]: E[r,k] = 1 iff k//R == r
    T = jnp.tile(eye, (1, R))           # [R, RR]: T[s,k] = 1 iff k% R == s
    S = T.T                             # [RR, R]

    # Fused leading weight: [x | rec] @ wbig -> lane-aligned column groups
    #   [0:RR) rec_exp, [RR:RR+R) pre0 (padded to 128), [RR+128:RR+128+R) rec_lin.
    wbig = jnp.zeros((isize + R, RR + 256), f32)
    wbig = wbig.at[isize:, :RR].set(E)
    wbig = wbig.at[:isize, RR:RR + R].set(params["w0"])
    wbig = wbig.at[isize:, RR + 128:RR + 128 + R].set(params["wrec"])

    w1f = jnp.concatenate([params["w1"], params["h2mod_w"].T], axis=1)   # [R, R+1]
    b1f = jnp.concatenate([params["b1"], params["h2mod_b"]], axis=1)     # [1, R+1]
    whead = jnp.concatenate([params["w2"], params["h2v_w"].T], axis=1)   # [R, nA+1]
    bhead = jnp.concatenate([params["b2"], params["h2v_b"]], axis=1)     # [1, nA+1]
    alpha_flat = params["alpha"].reshape(1, RR)

    xr = jnp.concatenate([x, rec_vals], axis=1)     # [B, isize+R]
    hebb_flat = hebb.reshape(B, RR)                 # lane-dense trace

    slab_width = ((R + nA + 1 + 63) // 64) * 64     # 64 for the default config

    def row_spec(width):
        return pl.BlockSpec((block_b, width), lambda i: (i, 0))

    def full_spec(arr):
        nd = arr.ndim
        return pl.BlockSpec(arr.shape, lambda i, _nd=nd: (0,) * _nd)

    in_specs = [
        row_spec(isize + R),                         # xr
        row_spec(RR),                                # hebb (aliased to output 1)
        full_spec(wbig), full_spec(params["b0"]),
        full_spec(alpha_flat), full_spec(S), full_spec(T),
        full_spec(w1f), full_spec(b1f), full_spec(whead), full_spec(bhead),
        full_spec(params["modfan_w"]), full_spec(params["modfan_b"]),
    ]
    out_specs = (row_spec(slab_width), row_spec(RR))
    out_shape = (jax.ShapeDtypeStruct((B, slab_width), f32),
                 jax.ShapeDtypeStruct((B, RR), f32))

    slab, hebb_out = pl.pallas_call(
        functools.partial(_hebbian_kernel, sf=sf, rec_size=R, n_actions=nA),
        grid=(B // block_b,),
        in_specs=in_specs,
        out_specs=out_specs,
        out_shape=out_shape,
        input_output_aliases={1: 1},                 # trace updated in place
        compiler_params=pltpu.CompilerParams(
            dimension_semantics=("parallel",),
            vmem_limit_bytes=48 * 1024 * 1024),
    )(xr, hebb_flat, wbig, params["b0"], alpha_flat, S, T,
      w1f, b1f, whead, bhead, params["modfan_w"], params["modfan_b"])

    rec_out = slab[:, :R]
    act = slab[:, R:R + nA]
    v_out = slab[:, R + nA:R + nA + 1]
    hebb_out = hebb_out.reshape(B, R, R)
    return act, rec_out, hebb_out, v_out


def ref_forward(params, x, rec_vals, hebb, *, sf=True):
    """Pure-JAX reference mirroring the PyTorch forward."""
    h0 = jnp.tanh(x @ params["w0"] + params["b0"])
    rec_term = jnp.einsum(
        "br,brs->bs", rec_vals,
        params["wrec"][None] + params["alpha"][None] * hebb)
    h1 = jnp.tanh(h0 @ params["w1"] + params["b1"] + rec_term)
    v = jnp.sum(h1 * params["h2v_w"], axis=1, keepdims=True) + params["h2v_b"]
    logits = h1 @ params["w2"] + params["b2"]
    act = jax.nn.softmax(logits, axis=1) if sf else logits
    eta = jnp.tanh(jnp.sum(h0 * params["h2mod_w"], axis=1, keepdims=True)
                   + params["h2mod_b"])
    myeta = eta[:, :, None] * params["modfan_w"][None] + params["modfan_b"][None]
    dh = rec_vals[:, :, None] * h0[:, None, :]
    hebb_new = jnp.clip(hebb + myeta * dh, -2.0, 2.0)
    return act, h0, hebb_new, v


def init_params(key, isize, hsizes, nactions, rec_size):
    def linear(k, fan_in, fan_out):
        kw, kb = jax.random.split(k)
        bound = 1.0 / jnp.sqrt(jnp.float32(fan_in))
        w = jax.random.uniform(kw, (fan_in, fan_out), jnp.float32, -bound, bound)
        b = jax.random.uniform(kb, (1, fan_out), jnp.float32, -bound, bound)
        return w, b

    ks = jax.random.split(key, 8)
    w0, b0 = linear(ks[0], isize, hsizes[0])
    w1, b1 = linear(ks[1], hsizes[0], hsizes[1])
    w2, b2 = linear(ks[2], hsizes[1], nactions)
    wrec = 0.001 * jax.random.uniform(ks[3], (rec_size, rec_size), jnp.float32)
    alpha = 0.001 * jax.random.uniform(ks[4], (rec_size, rec_size), jnp.float32)
    h2v_w, h2v_b = linear(ks[5], rec_size, 1)
    h2v_w = h2v_w.T                      # [1, R]
    h2mod_w, h2mod_b = linear(ks[6], rec_size, 1)
    h2mod_w = h2mod_w.T                  # [1, R]
    modfan_w, modfan_b = linear(ks[7], 1, rec_size)   # Linear(1, R): [1, R]
    return dict(
        w0=w0, b0=b0, w1=w1, b1=b1, w2=w2, b2=b2,
        wrec=wrec, alpha=alpha,
        h2v_w=h2v_w, h2v_b=h2v_b,
        h2mod_w=h2mod_w, h2mod_b=h2mod_b,
        modfan_w=modfan_w, modfan_b=modfan_b,
    )


if __name__ == "__main__":
    # Module-consistent shapes: isize=16, hsizes=(32,32), NBACTIONS=4,
    # rec_layer_out=0 -> rec_size=32, sf=True.  block_b=8 exercises a
    # multi-step batch grid.
    BS, ISIZE, NBACTIONS = 16, 16, 4
    HSIZES = (32, 32)
    REC_SIZE = HSIZES[0]
    SF = True

    key = jax.random.PRNGKey(0)
    kp, kx, kr, kh = jax.random.split(key, 4)
    params = init_params(kp, ISIZE, HSIZES, NBACTIONS, REC_SIZE)

    # Snap test data / params to the bf16 grid so the comparison is insensitive
    # to whichever MXU matmul-precision mode XLA / Mosaic pick by default
    # (bf16-exact operands multiply exactly into the f32 accumulator).
    def _q(t):
        return t.astype(jnp.bfloat16).astype(jnp.float32)
    params = jax.tree_util.tree_map(_q, params)
    x = _q(jax.random.normal(kx, (BS, ISIZE), jnp.float32))
    rec_vals = _q(0.1 * jax.random.normal(kr, (BS, REC_SIZE), jnp.float32))
    hebb = _q(0.01 * jax.random.normal(kh, (BS, REC_SIZE, REC_SIZE), jnp.float32))

    # Pure-JAX reference of the PyTorch forward (computed before hebb is donated).
    ra, rrec, rh, rv = ref_forward(params, x, rec_vals, hebb, sf=SF)
    jax.block_until_ready((ra, rrec, rh, rv))

    act, rec_out, hebb_out, v_out = hebbian_forward(
        params, x, rec_vals, hebb, sf=SF, block_b=8)
    jax.block_until_ready((act, rec_out, hebb_out, v_out))

    # Tolerances cover residual differences from intermediate-activation
    # rounding if the reference and the kernel use different matmul passes.
    assert jnp.allclose(act, ra, atol=5e-3, rtol=1e-3), "act_dis mismatch"
    assert jnp.allclose(rec_out, rrec, atol=5e-3, rtol=1e-3), "rec_layer_values mismatch"
    assert jnp.allclose(hebb_out, rh, atol=5e-3, rtol=1e-3), "hebb_return mismatch"
    assert jnp.allclose(v_out, rv, atol=5e-3, rtol=1e-3), "v_out mismatch"

    print("KERNEL_OK")
</pallas_src>

<mosaic_0001>
module attributes {stable_mosaic.version = 11 : i64} {
  func.func @_hebbian_kernel(%arg0: i32, %arg1: memref<8x48xf32, #tpu.memory_space<vmem>>, %arg2: memref<8x1024xf32, #tpu.memory_space<vmem>>, %arg3: memref<48x1280xf32, #tpu.memory_space<vmem>>, %arg4: memref<1x32xf32, #tpu.memory_space<vmem>>, %arg5: memref<1x1024xf32, #tpu.memory_space<vmem>>, %arg6: memref<1024x32xf32, #tpu.memory_space<vmem>>, %arg7: memref<32x1024xf32, #tpu.memory_space<vmem>>, %arg8: memref<32x33xf32, #tpu.memory_space<vmem>>, %arg9: memref<1x33xf32, #tpu.memory_space<vmem>>, %arg10: memref<32x5xf32, #tpu.memory_space<vmem>>, %arg11: memref<1x5xf32, #tpu.memory_space<vmem>>, %arg12: memref<1x32xf32, #tpu.memory_space<vmem>>, %arg13: memref<1x32xf32, #tpu.memory_space<vmem>>, %arg14: memref<8x64xf32, #tpu.memory_space<vmem>>, %arg15: memref<8x1024xf32, #tpu.memory_space<vmem>>) attributes {dimension_semantics = [#tpu.dimension_semantics<parallel>], iteration_bounds = array<i64: 2>, scalar_prefetch = 0 : i64, scratch_operands = 0 : i64, tpu.core_type = #tpu.core_type<tc>, window_params = [{transform_indices = @transform_0, window_bounds = array<i64: 8, 48>}, {transform_indices = @transform_1, window_bounds = array<i64: 8, 1024>}, {pipeline_mode = #tpu.pipeline_mode<synchronous>, transform_indices = @transform_2, window_bounds = array<i64: 48, 1280>}, {pipeline_mode = #tpu.pipeline_mode<synchronous>, transform_indices = @transform_3, window_bounds = array<i64: 1, 32>}, {pipeline_mode = #tpu.pipeline_mode<synchronous>, transform_indices = @transform_4, window_bounds = array<i64: 1, 1024>}, {pipeline_mode = #tpu.pipeline_mode<synchronous>, transform_indices = @transform_5, window_bounds = array<i64: 1024, 32>}, {pipeline_mode = #tpu.pipeline_mode<synchronous>, transform_indices = @transform_6, window_bounds = array<i64: 32, 1024>}, {pipeline_mode = #tpu.pipeline_mode<synchronous>, transform_indices = @transform_7, window_bounds = array<i64: 32, 33>}, {pipeline_mode = #tpu.pipeline_mode<synchronous>, transform_indices = @transform_8, window_bounds = array<i64: 1, 33>}, {pipeline_mode = #tpu.pipeline_mode<synchronous>, transform_indices = @transform_9, window_bounds = array<i64: 32, 5>}, {pipeline_mode = #tpu.pipeline_mode<synchronous>, transform_indices = @transform_10, window_bounds = array<i64: 1, 5>}, {pipeline_mode = #tpu.pipeline_mode<synchronous>, transform_indices = @transform_11, window_bounds = array<i64: 1, 32>}, {pipeline_mode = #tpu.pipeline_mode<synchronous>, transform_indices = @transform_12, window_bounds = array<i64: 1, 32>}, {transform_indices = @transform_13, window_bounds = array<i64: 8, 64>}, {transform_indices = @transform_14, window_bounds = array<i64: 8, 1024>}]} {
    %c0 = arith.constant 0 : index
    %c0_0 = arith.constant 0 : index
    %0 = vector.load %arg1[%c0, %c0_0] : memref<8x48xf32, #tpu.memory_space<vmem>>, vector<8x48xf32>
    %c0_1 = arith.constant 0 : index
    %c0_2 = arith.constant 0 : index
    %1 = vector.load %arg2[%c0_1, %c0_2] : memref<8x1024xf32, #tpu.memory_space<vmem>>, vector<8x1024xf32>
    %c0_3 = arith.constant 0 : index
    %c0_4 = arith.constant 0 : index
    %2 = vector.load %arg3[%c0_3, %c0_4] : memref<48x1280xf32, #tpu.memory_space<vmem>>, vector<48x1280xf32>
    %cst = arith.constant dense<0.000000e+00> : vector<8x1280xf32>
    %3 = tpu.matmul %0, %2, %cst {dimension_numbers = #tpu.dot_dimension_numbers<[1], [0], [0], [1], [0, 0, 1, 1], [], []>} : vector<8x48xf32>, vector<48x1280xf32>, vector<8x1280xf32> -> vector<8x1280xf32>
    %4 = vector.extract_strided_slice %3 {offsets = [0, 0], sizes = [8, 1024], strides = [1, 1]} : vector<8x1280xf32> to vector<8x1024xf32>
    %5 = vector.extract_strided_slice %3 {offsets = [0, 1024], sizes = [8, 32], strides = [1, 1]} : vector<8x1280xf32> to vector<8x32xf32>
    %c0_5 = arith.constant 0 : index
    %c0_6 = arith.constant 0 : index
    %6 = vector.load %arg4[%c0_5, %c0_6] : memref<1x32xf32, #tpu.memory_space<vmem>>, vector<1x32xf32>
    %7 = vector.broadcast %6 : vector<1x32xf32> to vector<8x32xf32>
    %8 = arith.addf %5, %7 : vector<8x32xf32>
    %9 = vector.extract_strided_slice %3 {offsets = [0, 1152], sizes = [8, 32], strides = [1, 1]} : vector<8x1280xf32> to vector<8x32xf32>
    %10 = math.tanh %8 : vector<8x32xf32>
    %c0_7 = arith.constant 0 : index
    %c0_8 = arith.constant 0 : index
    %11 = vector.load %arg5[%c0_7, %c0_8] : memref<1x1024xf32, #tpu.memory_space<vmem>>, vector<1x1024xf32>
    %12 = vector.broadcast %11 : vector<1x1024xf32> to vector<8x1024xf32>
    %13 = arith.mulf %4, %12 : vector<8x1024xf32>
    %14 = arith.mulf %13, %1 : vector<8x1024xf32>
    %c0_9 = arith.constant 0 : index
    %c0_10 = arith.constant 0 : index
    %15 = vector.load %arg6[%c0_9, %c0_10] : memref<1024x32xf32, #tpu.memory_space<vmem>>, vector<1024x32xf32>
    %cst_11 = arith.constant dense<0.000000e+00> : vector<8x32xf32>
    %16 = tpu.matmul %14, %15, %cst_11 {dimension_numbers = #tpu.dot_dimension_numbers<[1], [0], [0], [1], [0, 0, 1, 1], [], []>} : vector<8x1024xf32>, vector<1024x32xf32>, vector<8x32xf32> -> vector<8x32xf32>
    %17 = arith.addf %9, %16 : vector<8x32xf32>
    %c0_12 = arith.constant 0 : index
    %c0_13 = arith.constant 0 : index
    %18 = vector.load %arg8[%c0_12, %c0_13] : memref<32x33xf32, #tpu.memory_space<vmem>>, vector<32x33xf32>
    %cst_14 = arith.constant dense<0.000000e+00> : vector<8x33xf32>
    %19 = tpu.matmul %10, %18, %cst_14 {dimension_numbers = #tpu.dot_dimension_numbers<[1], [0], [0], [1], [0, 0, 1, 1], [], []>} : vector<8x32xf32>, vector<32x33xf32>, vector<8x33xf32> -> vector<8x33xf32>
    %c0_15 = arith.constant 0 : index
    %c0_16 = arith.constant 0 : index
    %20 = vector.load %arg9[%c0_15, %c0_16] : memref<1x33xf32, #tpu.memory_space<vmem>>, vector<1x33xf32>
    %21 = vector.broadcast %20 : vector<1x33xf32> to vector<8x33xf32>
    %22 = arith.addf %19, %21 : vector<8x33xf32>
    %23 = vector.extract_strided_slice %22 {offsets = [0, 0], sizes = [8, 32], strides = [1, 1]} : vector<8x33xf32> to vector<8x32xf32>
    %24 = arith.addf %23, %17 : vector<8x32xf32>
    %25 = math.tanh %24 : vector<8x32xf32>
    %26 = vector.extract_strided_slice %22 {offsets = [0, 32], sizes = [8, 1], strides = [1, 1]} : vector<8x33xf32> to vector<8x1xf32>
    %27 = math.tanh %26 : vector<8x1xf32>
    %c0_17 = arith.constant 0 : index
    %c0_18 = arith.constant 0 : index
    %28 = vector.load %arg10[%c0_17, %c0_18] : memref<32x5xf32, #tpu.memory_space<vmem>>, vector<32x5xf32>
    %cst_19 = arith.constant dense<0.000000e+00> : vector<8x5xf32>
    %29 = tpu.matmul %25, %28, %cst_19 {dimension_numbers = #tpu.dot_dimension_numbers<[1], [0], [0], [1], [0, 0, 1, 1], [], []>} : vector<8x32xf32>, vector<32x5xf32>, vector<8x5xf32> -> vector<8x5xf32>
    %c0_20 = arith.constant 0 : index
    %c0_21 = arith.constant 0 : index
    %30 = vector.load %arg11[%c0_20, %c0_21] : memref<1x5xf32, #tpu.memory_space<vmem>>, vector<1x5xf32>
    %31 = vector.broadcast %30 : vector<1x5xf32> to vector<8x5xf32>
    %32 = arith.addf %29, %31 : vector<8x5xf32>
    %33 = vector.extract_strided_slice %32 {offsets = [0, 0], sizes = [8, 4], strides = [1, 1]} : vector<8x5xf32> to vector<8x4xf32>
    %34 = vector.extract_strided_slice %32 {offsets = [0, 4], sizes = [8, 1], strides = [1, 1]} : vector<8x5xf32> to vector<8x1xf32>
    %cst_22 = arith.constant dense<0xFF800000> : vector<8xf32>
    %35 = vector.multi_reduction <maximumf>, %33, %cst_22 [1] : vector<8x4xf32> to vector<8xf32>
    %36 = vector.shape_cast %35 : vector<8xf32> to vector<8x1xf32>
    %37 = vector.broadcast %36 : vector<8x1xf32> to vector<8x4xf32>
    %38 = arith.subf %33, %37 : vector<8x4xf32>
    %39 = math.exp %38 : vector<8x4xf32>
    %cst_23 = arith.constant dense<0.000000e+00> : vector<8xf32>
    %40 = vector.multi_reduction <add>, %39, %cst_23 [1] : vector<8x4xf32> to vector<8xf32>
    %41 = vector.shape_cast %40 : vector<8xf32> to vector<8x1xf32>
    %42 = vector.broadcast %41 : vector<8x1xf32> to vector<8x4xf32>
    %43 = arith.divf %39, %42 : vector<8x4xf32>
    %c0_24 = arith.constant 0 : index
    %c0_25 = arith.constant 0 : index
    %44 = vector.load %arg14[%c0_24, %c0_25] : memref<8x64xf32, #tpu.memory_space<vmem>>, vector<8x32xf32>
    tpu.vector_store %arg14[%c0_24, %c0_25], %10 {strides = array<i32>} : memref<8x64xf32, #tpu.memory_space<vmem>>, vector<8x32xf32>,
    %c0_26 = arith.constant 0 : index
    %c32 = arith.constant 32 : index
    %45 = vector.load %arg14[%c0_26, %c32] : memref<8x64xf32, #tpu.memory_space<vmem>>, vector<8x4xf32>
    tpu.vector_store %arg14[%c0_26, %c32], %43 {strides = array<i32>} : memref<8x64xf32, #tpu.memory_space<vmem>>, vector<8x4xf32>,
    %c0_27 = arith.constant 0 : index
    %c36 = arith.constant 36 : index
    %46 = vector.load %arg14[%c0_27, %c36] : memref<8x64xf32, #tpu.memory_space<vmem>>, vector<8x1xf32>
    tpu.vector_store %arg14[%c0_27, %c36], %34 {strides = array<i32>} : memref<8x64xf32, #tpu.memory_space<vmem>>, vector<8x1xf32>,
    %c0_28 = arith.constant 0 : index
    %c0_29 = arith.constant 0 : index
    %47 = vector.load %arg12[%c0_28, %c0_29] : memref<1x32xf32, #tpu.memory_space<vmem>>, vector<1x32xf32>
    %48 = vector.broadcast %27 : vector<8x1xf32> to vector<8x32xf32>
    %49 = vector.broadcast %47 : vector<1x32xf32> to vector<8x32xf32>
    %50 = arith.mulf %48, %49 : vector<8x32xf32>
    %c0_30 = arith.constant 0 : index
    %c0_31 = arith.constant 0 : index
    %51 = vector.load %arg13[%c0_30, %c0_31] : memref<1x32xf32, #tpu.memory_space<vmem>>, vector<1x32xf32>
    %52 = vector.broadcast %51 : vector<1x32xf32> to vector<8x32xf32>
    %53 = arith.addf %50, %52 : vector<8x32xf32>
    %54 = arith.mulf %10, %53 : vector<8x32xf32>
    %c0_32 = arith.constant 0 : index
    %c0_33 = arith.constant 0 : index
    %55 = vector.load %arg7[%c0_32, %c0_33] : memref<32x1024xf32, #tpu.memory_space<vmem>>, vector<32x1024xf32>
    %cst_34 = arith.constant dense<0.000000e+00> : vector<8x1024xf32>
    %56 = tpu.matmul %54, %55, %cst_34 {dimension_numbers = #tpu.dot_dimension_numbers<[1], [0], [0], [1], [0, 0, 1, 1], [], []>} : vector<8x32xf32>, vector<32x1024xf32>, vector<8x1024xf32> -> vector<8x1024xf32>
    %57 = arith.mulf %4, %56 : vector<8x1024xf32>
    %58 = arith.addf %1, %57 : vector<8x1024xf32>
    %cst_35 = arith.constant -2.000000e+00 : f32
    %cst_36 = arith.constant 2.000000e+00 : f32
    %59 = vector.broadcast %cst_35 : f32 to vector<8x1024xf32>
    %60 = arith.maximumf %59, %58 : vector<8x1024xf32>
    %61 = vector.broadcast %cst_36 : f32 to vector<8x1024xf32>
    %62 = arith.minimumf %61, %60 : vector<8x1024xf32>
    %c0_37 = arith.constant 0 : index
    %c0_38 = arith.constant 0 : index
    %63 = vector.load %arg15[%c0_37, %c0_38] : memref<8x1024xf32, #tpu.memory_space<vmem>>, vector<8x1024xf32>
    tpu.vector_store %arg15[%c0_37, %c0_38], %62 {strides = array<i32>} : memref<8x1024xf32, #tpu.memory_space<vmem>>, vector<8x1024xf32>,
    return
  }
  func.func @transform_0(%arg0: i32) -> (i32, i32) {
    %c0_i32 = arith.constant 0 : i32
    %c0_i32_0 = arith.constant 0 : i32
    return %arg0, %c0_i32 : i32, i32
  }
  func.func @transform_1(%arg0: i32) -> (i32, i32) {
    %c0_i32 = arith.constant 0 : i32
    %c0_i32_0 = arith.constant 0 : i32
    return %arg0, %c0_i32 : i32, i32
  }
  func.func @transform_2(%arg0: i32) -> (i32, i32) {
    %c0_i32 = arith.constant 0 : i32
    %c0_i32_0 = arith.constant 0 : i32
    %c0_i32_1 = arith.constant 0 : i32
    return %c0_i32, %c0_i32_0 : i32, i32
  }
  func.func @transform_3(%arg0: i32) -> (i32, i32) {
    %c0_i32 = arith.constant 0 : i32
    %c0_i32_0 = arith.constant 0 : i32
    %c0_i32_1 = arith.constant 0 : i32
    return %c0_i32, %c0_i32_0 : i32, i32
  }
  func.func @transform_4(%arg0: i32) -> (i32, i32) {
    %c0_i32 = arith.constant 0 : i32
    %c0_i32_0 = arith.constant 0 : i32
    %c0_i32_1 = arith.constant 0 : i32
    return %c0_i32, %c0_i32_0 : i32, i32
  }
  func.func @transform_5(%arg0: i32) -> (i32, i32) {
    %c0_i32 = arith.constant 0 : i32
    %c0_i32_0 = arith.constant 0 : i32
    %c0_i32_1 = arith.constant 0 : i32
    return %c0_i32, %c0_i32_0 : i32, i32
  }
  func.func @transform_6(%arg0: i32) -> (i32, i32) {
    %c0_i32 = arith.constant 0 : i32
    %c0_i32_0 = arith.constant 0 : i32
    %c0_i32_1 = arith.constant 0 : i32
    return %c0_i32, %c0_i32_0 : i32, i32
  }
  func.func @transform_7(%arg0: i32) -> (i32, i32) {
    %c0_i32 = arith.constant 0 : i32
    %c0_i32_0 = arith.constant 0 : i32
    %c0_i32_1 = arith.constant 0 : i32
    return %c0_i32, %c0_i32_0 : i32, i32
  }
  func.func @transform_8(%arg0: i32) -> (i32, i32) {
    %c0_i32 = arith.constant 0 : i32
    %c0_i32_0 = arith.constant 0 : i32
    %c0_i32_1 = arith.constant 0 : i32
    return %c0_i32, %c0_i32_0 : i32, i32
  }
  func.func @transform_9(%arg0: i32) -> (i32, i32) {
    %c0_i32 = arith.constant 0 : i32
    %c0_i32_0 = arith.constant 0 : i32
    %c0_i32_1 = arith.constant 0 : i32
    return %c0_i32, %c0_i32_0 : i32, i32
  }
  func.func @transform_10(%arg0: i32) -> (i32, i32) {
    %c0_i32 = arith.constant 0 : i32
    %c0_i32_0 = arith.constant 0 : i32
    %c0_i32_1 = arith.constant 0 : i32
    return %c0_i32, %c0_i32_0 : i32, i32
  }
  func.func @transform_11(%arg0: i32) -> (i32, i32) {
    %c0_i32 = arith.constant 0 : i32
    %c0_i32_0 = arith.constant 0 : i32
    %c0_i32_1 = arith.constant 0 : i32
    return %c0_i32, %c0_i32_0 : i32, i32
  }
  func.func @transform_12(%arg0: i32) -> (i32, i32) {
    %c0_i32 = arith.constant 0 : i32
    %c0_i32_0 = arith.constant 0 : i32
    %c0_i32_1 = arith.constant 0 : i32
    return %c0_i32, %c0_i32_0 : i32, i32
  }
  func.func @transform_13(%arg0: i32) -> (i32, i32) {
    %c0_i32 = arith.constant 0 : i32
    %c0_i32_0 = arith.constant 0 : i32
    return %arg0, %c0_i32 : i32, i32
  }
  func.func @transform_14(%arg0: i32) -> (i32, i32) {
    %c0_i32 = arith.constant 0 : i32
    %c0_i32_0 = arith.constant 0 : i32
    return %arg0, %c0_i32 : i32, i32
  }
}

</mosaic_0001>

<bundles_post_ra>
// kernel: tile.9
= control target key start
LH: loop header
LB: loop body
LE: loop exit
PB: predicated region body
PF: predicated region fallthrough
CT: control target
= control target key end

     0   :  { %vm227_vm0 = vcmask 1041409   ;;  %vm231_vm1 = vcmask 1042434   ;;  %vm235_vm2 = vcmask 1043459   ;;  %vm239_vm3 = vcmask 1044484   ;;  %s4537_s27 = smov 96   ;;  %s4538_s4 = smov 64   ;;  %s8502_s0 = inlined_call_operand.vmem [shape: f32[32,32,32], index: 0, kind: input, shape index: {}]   ;;  %s8503_s1 = inlined_call_operand.vmem [shape: f32[32,1024], index: 1, kind: output, shape index: {}]  }
   0x1   :  { %vm243_vm4 = vcmask 1045509   ;;  %vm247_vm5 = vcmask 1046534   ;;  %vm251_vm6 = vcmask 1047559   ;;  %v3690_v0 = vld [vmem:[%s8502_s0 + $0x103] sm:$0x1]   ;;  %s4539_s14 = smov 32  }
   0x2   :  { %v3691_v1 = vld [vmem:[%s8502_s0 + $0x122] sm:$0x2]   ;;  %v3699_v24 = vld [vmem:[%s8502_s0 + $0x113] sm:$0x1]   ;;  %vm3_vm7 = vcmask 261120   ;;  %vm255_vm8 = vcmask 1048320  }
   0x3   :  { %v3692_v2 = vld [vmem:[%s8502_s0 + $0x141] sm:$0x4]   ;;  %v297_v4 = vsel %vm227_vm0, %v3691_v1, %v3690_v0  ;;  %v3700_v25 = vld [vmem:[%s8502_s0 + $0x132] sm:$0x2]   ;;  %vm1374_vm9 = vcmask 785920   ;;  %vm2493_vm10 = vcmask 523520  }
   0x4   :  { %v3693_v3 = vld [vmem:[%s8502_s0 + $0x160] sm:$0x8]   ;;  %v301_v8 = vsel %vm231_vm1, %v3692_v2, %v297_v4  ;;  %v3701_v26 = vld [vmem:[%s8502_s0 + $0x151] sm:$0x4]   ;;  %v332_v29 = vsel %vm227_vm0, %v3700_v25, %v3699_v24 }
   0x5   :  { %v3694_v5 = vld [vmem:[%s8502_s0 + $0x17f] sm:$0x10]   ;;  %v305_v12 = vsel %vm235_vm2, %v3693_v3, %v301_v8  ;;  %v3702_v30 = vld [vmem:[%s8502_s0 + $0x170] sm:$0x8]   ;;  %v336_v35 = vsel %vm231_vm1, %v3701_v26, %v332_v29 }
   0x6   :  { %v3695_v6 = vld [vmem:[%s8502_s0 + $0x19e] sm:$0x20]   ;;  %v309_v17 = vsel %vm239_vm3, %v3694_v5, %v305_v12  ;;  %v3703_v31 = vld [vmem:[%s8502_s0 + $0x18f] sm:$0x10]   ;;  %v340_v40 = vsel %vm235_vm2, %v3702_v30, %v336_v35 }
   0x7   :  { %v3696_v7 = vld [vmem:[%s8502_s0 + $0x1bd] sm:$0x40]   ;;  %v313_v22 = vsel %vm243_vm4, %v3695_v6, %v309_v17  ;;  %v3704_v32 = vld [vmem:[%s8502_s0 + $0x1ae] sm:$0x20]   ;;  %v344_v45 = vsel %vm239_vm3, %v3703_v31, %v340_v40 }
   0x8   :  { %v3697_v9 = vld [vmem:[%s8502_s0 + $0x1dc] sm:$0x80]   ;;  %v317_v27 = vsel %vm247_vm5, %v3696_v7, %v313_v22  ;;  %v3705_v36 = vld [vmem:[%s8502_s0 + $0x1cd] sm:$0x40]   ;;  %v348_v50 = vsel %vm243_vm4, %v3704_v32, %v344_v45 }
   0x9   :  { %v3673_v10 = vld [vmem:[%s8502_s0 + $0x3] sm:$0x1]   ;;  %v321_v33 = vsel %vm251_vm6, %v3697_v9, %v317_v27  ;;  %v3706_v37 = vld [vmem:[%s8502_s0 + $0x1ec] sm:$0x80]   ;;  %v352_v55 = vsel %vm247_vm5, %v3705_v36, %v348_v50  ;;  %v3753_v50 = vld [vmem:[%s8502_s0 + $0x17] sm:$0x1]  }
   0xa   :  { %v3674_v11 = vld [vmem:[%s8502_s0 + $0x22] sm:$0x2]   ;;  %v3681_v38 = vld [vmem:[%s8502_s0 + $0x13] sm:$0x1]   ;;  %322 = vrot.lane.b32.xlu1 %v321_v33, %s4537_s27  ;;  %v356_v61 = vsel %vm251_vm6, %v3706_v37, %v352_v55 }
   0xb   :  { %v228_v13 = vsel %vm227_vm0, %v3674_v11, %v3673_v10  ;;  %v3675_v14 = vld [vmem:[%s8502_s0 + $0x41] sm:$0x4]   ;;  %v3682_v41 = vld [vmem:[%s8502_s0 + $0x32] sm:$0x2]  }
   0xc   :  { %v3676_v15 = vld [vmem:[%s8502_s0 + $0x60] sm:$0x8]   ;;  %v232_v18 = vsel %vm231_vm1, %v3675_v14, %v228_v13  ;;  %v3683_v42 = vld [vmem:[%s8502_s0 + $0x51] sm:$0x4]   ;;  %v262_v46 = vsel %vm227_vm0, %v3682_v41, %v3681_v38 }
   0xd   :  { %v3677_v16 = vld [vmem:[%s8502_s0 + $0x7f] sm:$0x10]   ;;  %v236_v23 = vsel %vm235_vm2, %v3676_v15, %v232_v18  ;;  %v3684_v43 = vld [vmem:[%s8502_s0 + $0x70] sm:$0x8]   ;;  %v266_v51 = vsel %vm231_vm1, %v3683_v42, %v262_v46 }
   0xe   :  { %v3678_v19 = vld [vmem:[%s8502_s0 + $0x9e] sm:$0x20]   ;;  %v240_v28 = vsel %vm239_vm3, %v3677_v16, %v236_v23  ;;  %v3685_v47 = vld [vmem:[%s8502_s0 + $0x8f] sm:$0x10]   ;;  %v270_v56 = vsel %vm235_vm2, %v3684_v43, %v266_v51  ;;  %357 = vrot.lane.b32.xlu1 %v356_v61, %s4537_s27  ;;  %v3754_v51 = vld [vmem:[%s8502_s0 + $0x36] sm:$0x2]  }
   0xf   :  { %v3679_v20 = vld [vmem:[%s8502_s0 + $0xbd] sm:$0x40]   ;;  %v244_v34 = vsel %vm243_vm4, %v3678_v19, %v240_v28  ;;  %v3686_v48 = vld [vmem:[%s8502_s0 + $0xae] sm:$0x20]   ;;  %v274_v62 = vsel %vm239_vm3, %v3685_v47, %v270_v56  ;;  %v542_v55 = vsel %vm227_vm0, %v3754_v51, %v3753_v50  ;;  %v3756_v56 = vld [vmem:[%s8502_s0 + $0x74] sm:$0x8]  }
  0x10   :  { %v3680_v21 = vld [vmem:[%s8502_s0 + $0xdc] sm:$0x80]   ;;  %v248_v39 = vsel %vm247_vm5, %v3679_v20, %v244_v34  ;;  %v3687_v49 = vld [vmem:[%s8502_s0 + $0xcd] sm:$0x40]   ;;  %v278_v3 = vsel %vm243_vm4, %v3686_v48, %v274_v62  ;;  %v3759_v62 = vld [vmem:[%s8502_s0 + $0xd1] sm:$0x40]  }
  0x11   :  { %v252_v44 = vsel %vm251_vm6, %v3680_v21, %v248_v39  ;;  %v3688_v52 = vld [vmem:[%s8502_s0 + $0xec] sm:$0x80]   ;;  %v3708_v5 = vld [vmem:[%s8502_s0 + $0x203] sm:$0x1]   ;;  %v282_v8 = vsel %vm247_vm5, %v3687_v49, %v278_v3  ;;  %v3745_v3 = vld [vmem:[%s8502_s0 + $0x26] sm:$0x2]  }
  0x12   :  { %253 = vrot.lane.b32.xlu0 %v252_v44, %s4537_s27  ;;  %v3717_v53 = vld [vmem:[%s8502_s0 + $0x213] sm:$0x1]   ;;  %v3709_v6 = vld [vmem:[%s8502_s0 + $0x222] sm:$0x2]   ;;  %v286_v14 = vsel %vm251_vm6, %v3688_v52, %v282_v8  ;;  %v3755_v52 = vld [vmem:[%s8502_s0 + $0x55] sm:$0x4]  }
  0x13   :  { %v3718_v54 = vld [vmem:[%s8502_s0 + $0x232] sm:$0x2]   ;;  %v3710_v7 = vld [vmem:[%s8502_s0 + $0x241] sm:$0x4]   ;;  %v367_v10 = vsel %vm227_vm0, %v3709_v6, %v3708_v5  ;;  %v546_v61 = vsel %vm231_vm1, %v3755_v52, %v542_v55  ;;  %v3747_v5 = vld [vmem:[%s8502_s0 + $0x64] sm:$0x8]  }
  0x14   :  { %v402_v57 = vsel %vm227_vm0, %v3718_v54, %v3717_v53  ;;  %v3719_v58 = vld [vmem:[%s8502_s0 + $0x251] sm:$0x4]   ;;  %v3711_v11 = vld [vmem:[%s8502_s0 + $0x260] sm:$0x8]   ;;  %v371_v16 = vsel %vm231_vm1, %v3710_v7, %v367_v10  ;;  %v3749_v10 = vld [vmem:[%s8502_s0 + $0xa2] sm:$0x20]  }
  0x15   :  { %v3720_v59 = vld [vmem:[%s8502_s0 + $0x270] sm:$0x8]   ;;  %v406_v63 = vsel %vm231_vm1, %v3719_v58, %v402_v57  ;;  %v3712_v12 = vld [vmem:[%s8502_s0 + $0x27f] sm:$0x10]   ;;  %v375_v21 = vsel %vm235_vm2, %v3711_v11, %v371_v16  ;;  %v3757_v57 = vld [vmem:[%s8502_s0 + $0x93] sm:$0x10]  }
  0x16   :  { %v3721_v60 = vld [vmem:[%s8502_s0 + $0x28f] sm:$0x10]   ;;  %v410_v4 = vsel %vm235_vm2, %v3720_v59, %v406_v63  ;;  %v3713_v13 = vld [vmem:[%s8502_s0 + $0x29e] sm:$0x20]   ;;  %287 = vrot.lane.b32.xlu0 %v286_v14, %s4537_s27  ;;  %v379_v26 = vsel %vm239_vm3, %v3712_v12, %v375_v21  ;;  %v3758_v58 = vld [vmem:[%s8502_s0 + $0xb2] sm:$0x20]  }
  0x17   :  { %v3722_v0 = vld [vmem:[%s8502_s0 + $0x2ae] sm:$0x20]   ;;  %v414_v9 = vsel %vm239_vm3, %v3721_v60, %v410_v4  ;;  %v3714_v17 = vld [vmem:[%s8502_s0 + $0x2bd] sm:$0x40]   ;;  %v383_v31 = vsel %vm243_vm4, %v3713_v13, %v379_v26  ;;  %v3760_v63 = vld [vmem:[%s8502_s0 + $0xf0] sm:$0x80]  }
  0x18   :  { %v3723_v1 = vld [vmem:[%s8502_s0 + $0x2cd] sm:$0x40]   ;;  %v418_v15 = vsel %vm243_vm4, %v3722_v0, %v414_v9  ;;  %v3715_v18 = vld [vmem:[%s8502_s0 + $0x2dc] sm:$0x80]   ;;  %v387_v36 = vsel %vm247_vm5, %v3714_v17, %v383_v31  ;;  %v3744_v0 = vld [vmem:[%s8502_s0 + $0x7] sm:$0x1]  }
  0x19   :  { %v3724_v2 = vld [vmem:[%s8502_s0 + $0x2ec] sm:$0x80]   ;;  %v422_v20 = vsel %vm247_vm5, %v3723_v1, %v418_v15  ;;  %v3726_v34 = vld [vmem:[%s8502_s0 + $0x303] sm:$0x1]   ;;  %v391_v42 = vsel %vm251_vm6, %v3715_v18, %v387_v36  ;;  %v3746_v4 = vld [vmem:[%s8502_s0 + $0x45] sm:$0x4]   ;;  %v507_v8 = vsel %vm227_vm0, %v3745_v3, %v3744_v0 }
  0x1a   :  { %v3735_v19 = vld [vmem:[%s8502_s0 + $0x313] sm:$0x1]   ;;  %v426_v25 = vsel %vm251_vm6, %v3724_v2, %v422_v20  ;;  %v3727_v35 = vld [vmem:[%s8502_s0 + $0x322] sm:$0x2]   ;;  %392 = vrot.lane.b32.xlu0 %v391_v42, %s4537_s27  ;;  %v550_v2 = vsel %vm235_vm2, %v3756_v56, %v546_v61  ;;  %v3748_v9 = vld [vmem:[%s8502_s0 + $0x83] sm:$0x10]   ;;  %v511_v13 = vsel %vm231_vm1, %v3746_v4, %v507_v8 }
  0x1b   :  { %v3736_v22 = vld [vmem:[%s8502_s0 + $0x332] sm:$0x2]   ;;  %427 = vrot.lane.b32.xlu1 %v426_v25, %s4537_s27  ;;  %v437_v38 = vsel %vm227_vm0, %v3727_v35, %v3726_v34  ;;  %v3728_v39 = vld [vmem:[%s8502_s0 + $0x341] sm:$0x4]   ;;  %v554_v7 = vsel %vm239_vm3, %v3757_v57, %v550_v2  ;;  %v3750_v11 = vld [vmem:[%s8502_s0 + $0xc1] sm:$0x40]   ;;  %v515_v18 = vsel %vm235_vm2, %v3747_v5, %v511_v13 }
  0x1c   :  { %v3737_v23 = vld [vmem:[%s8502_s0 + $0x351] sm:$0x4]   ;;  %v472_v27 = vsel %vm227_vm0, %v3736_v22, %v3735_v19  ;;  %v3729_v40 = vld [vmem:[%s8502_s0 + $0x360] sm:$0x8]   ;;  %v441_v44 = vsel %vm231_vm1, %v3728_v39, %v437_v38  ;;  %v558_v12 = vsel %vm243_vm4, %v3758_v58, %v554_v7  ;;  %v3751_v14 = vld [vmem:[%s8502_s0 + $0xe0] sm:$0x80]  }
  0x1d   :  { %v3738_v24 = vld [vmem:[%s8502_s0 + $0x370] sm:$0x8]   ;;  %v476_v32 = vsel %vm231_vm1, %v3737_v23, %v472_v27  ;;  %v3730_v41 = vld [vmem:[%s8502_s0 + $0x37f] sm:$0x10]   ;;  %v445_v49 = vsel %vm235_vm2, %v3729_v40, %v441_v44  ;;  %v3771_v15 = vld [vmem:[%s8502_s0 + $0x117] sm:$0x1]   ;;  %v562_v17 = vsel %vm247_vm5, %v3759_v62, %v558_v12 }
  0x1e   :  { %v3739_v28 = vld [vmem:[%s8502_s0 + $0x38f] sm:$0x10]   ;;  %v480_v37 = vsel %vm235_vm2, %v3738_v24, %v476_v32  ;;  %v3731_v45 = vld [vmem:[%s8502_s0 + $0x39e] sm:$0x20]   ;;  %v449_v54 = vsel %vm239_vm3, %v3730_v41, %v445_v49  ;;  %v3772_v16 = vld [vmem:[%s8502_s0 + $0x136] sm:$0x2]   ;;  %v566_v23 = vsel %vm251_vm6, %v3760_v63, %v562_v17  ;;  %v519_v24 = vsel %vm239_vm3, %v3748_v9, %v515_v18 }
  0x1f   :  { %v3740_v29 = vld [vmem:[%s8502_s0 + $0x3ae] sm:$0x20]   ;;  %v484_v43 = vsel %vm239_vm3, %v3739_v28, %v480_v37  ;;  %v3732_v46 = vld [vmem:[%s8502_s0 + $0x3bd] sm:$0x40]   ;;  %v453_v60 = vsel %vm243_vm4, %v3731_v45, %v449_v54  ;;  %v612_v19 = vsel %vm227_vm0, %v3772_v16, %v3771_v15  ;;  %v3773_v20 = vld [vmem:[%s8502_s0 + $0x155] sm:$0x4]  }
  0x20   :  { %v3741_v30 = vld [vmem:[%s8502_s0 + $0x3cd] sm:$0x40]   ;;  %v3733_v47 = vld [vmem:[%s8502_s0 + $0x3dc] sm:$0x80]   ;;  %v488_v48 = vsel %vm243_vm4, %v3740_v29, %v484_v43  ;;  %v457_v1 = vsel %vm247_vm5, %v3732_v46, %v453_v60  ;;  %v3774_v21 = vld [vmem:[%s8502_s0 + $0x174] sm:$0x8]   ;;  %v616_v25 = vsel %vm231_vm1, %v3773_v20, %v612_v19  ;;  %v523_v29 = vsel %vm243_vm4, %v3749_v10, %v519_v24 }
  0x21   :  { %v3742_v33 = vld [vmem:[%s8502_s0 + $0x3ec] sm:$0x80]   ;;  %v492_v53 = vsel %vm247_vm5, %v3741_v30, %v488_v48  ;;  %v461_v6 = vsel %vm251_vm6, %v3733_v47, %v457_v1  ;;  %v3775_v22 = vld [vmem:[%s8502_s0 + $0x193] sm:$0x10]   ;;  %v620_v30 = vsel %vm235_vm2, %v3774_v21, %v616_v25  ;;  %v3762_v31 = vld [vmem:[%s8502_s0 + $0x107] sm:$0x1]   ;;  %v527_v34 = vsel %vm247_vm5, %v3750_v11, %v523_v29 }
  0x22   :  { %v496_v59 = vsel %vm251_vm6, %v3742_v33, %v492_v53  ;;  %462 = vrot.lane.b32.xlu0 %v461_v6, %s4537_s27  ;;  %v3776_v26 = vld [vmem:[%s8502_s0 + $0x1b2] sm:$0x20]   ;;  %v3763_v32 = vld [vmem:[%s8502_s0 + $0x126] sm:$0x2]   ;;  %v624_v35 = vsel %vm239_vm3, %v3775_v22, %v620_v30  ;;  %v531_v40 = vsel %vm251_vm6, %v3751_v14, %v527_v34 }
  0x23   :  { %497 = vrot.lane.b32.xlu1 %v496_v59, %s4537_s27  ;;  %v3777_v27 = vld [vmem:[%s8502_s0 + $0x1d1] sm:$0x40]   ;;  %v3764_v33 = vld [vmem:[%s8502_s0 + $0x145] sm:$0x4]   ;;  %v577_v36 = vsel %vm227_vm0, %v3763_v32, %v3762_v31  ;;  %v628_v41 = vsel %vm243_vm4, %v3776_v26, %v624_v35 }
  0x24   :  { %v3778_v28 = vld [vmem:[%s8502_s0 + $0x1f0] sm:$0x80]   ;;  %v3765_v37 = vld [vmem:[%s8502_s0 + $0x164] sm:$0x8]   ;;  %v581_v42 = vsel %vm231_vm1, %v3764_v33, %v577_v36  ;;  %v632_v46 = vsel %vm247_vm5, %v3777_v27, %v628_v41  ;;  %v3825_v41 = vld [vmem:[%s8502_s0 + $0x1b] sm:$0x1]  }
  0x25   :  { %v3766_v38 = vld [vmem:[%s8502_s0 + $0x183] sm:$0x10]   ;;  %v3789_v45 = vld [vmem:[%s8502_s0 + $0x217] sm:$0x1]   ;;  %v585_v47 = vsel %vm235_vm2, %v3765_v37, %v581_v42  ;;  %v636_v51 = vsel %vm251_vm6, %v3778_v28, %v632_v46  ;;  %v3826_v42 = vld [vmem:[%s8502_s0 + $0x3a] sm:$0x2]  }
  0x26   :  { %v3767_v39 = vld [vmem:[%s8502_s0 + $0x1a2] sm:$0x20]   ;;  %532 = vrot.lane.b32.xlu0 %v531_v40, %s4537_s27  ;;  %v3790_v48 = vld [vmem:[%s8502_s0 + $0x236] sm:$0x2]   ;;  %v589_v52 = vsel %vm239_vm3, %v3766_v38, %v585_v47  ;;  %v3827_v46 = vld [vmem:[%s8502_s0 + $0x59] sm:$0x4]  }
  0x27   :  { %567 = vrot.lane.b32.xlu1 %v566_v23, %s4537_s27  ;;  %v3768_v43 = vld [vmem:[%s8502_s0 + $0x1c1] sm:$0x40]   ;;  %v3791_v49 = vld [vmem:[%s8502_s0 + $0x255] sm:$0x4]   ;;  %v682_v53 = vsel %vm227_vm0, %v3790_v48, %v3789_v45  ;;  %v593_v57 = vsel %vm243_vm4, %v3767_v39, %v589_v52  ;;  %v822_v45 = vsel %vm227_vm0, %v3826_v42, %v3825_v41  ;;  %v3828_v47 = vld [vmem:[%s8502_s0 + $0x78] sm:$0x8]  }
  0x28   :  { %v3769_v44 = vld [vmem:[%s8502_s0 + $0x1e0] sm:$0x80]   ;;  %v3792_v50 = vld [vmem:[%s8502_s0 + $0x274] sm:$0x8]   ;;  %v686_v58 = vsel %vm231_vm1, %v3791_v49, %v682_v53  ;;  %v597_v62 = vsel %vm247_vm5, %v3768_v43, %v593_v57  ;;  %v3829_v48 = vld [vmem:[%s8502_s0 + $0x97] sm:$0x10]  }
  0x29   :  { %v3793_v54 = vld [vmem:[%s8502_s0 + $0x293] sm:$0x10]   ;;  %v3780_v60 = vld [vmem:[%s8502_s0 + $0x207] sm:$0x1]   ;;  %v690_v63 = vsel %vm235_vm2, %v3792_v50, %v686_v58  ;;  %v601_v4 = vsel %vm251_vm6, %v3769_v44, %v597_v62  ;;  %v3830_v52 = vld [vmem:[%s8502_s0 + $0xb6] sm:$0x20]  }
  0x2a   :  { %v3794_v55 = vld [vmem:[%s8502_s0 + $0x2b2] sm:$0x20]   ;;  %v3781_v61 = vld [vmem:[%s8502_s0 + $0x226] sm:$0x2]   ;;  %v694_v5 = vsel %vm239_vm3, %v3793_v54, %v690_v63  ;;  %602 = vrot.lane.b32.xlu0 %v601_v4, %s4537_s27  ;;  %v3831_v53 = vld [vmem:[%s8502_s0 + $0xd5] sm:$0x40]  }
  0x2b   :  { %v3795_v56 = vld [vmem:[%s8502_s0 + $0x2d1] sm:$0x40]   ;;  %637 = vrot.lane.b32.xlu1 %v636_v51, %s4537_s27  ;;  %v647_v0 = vsel %vm227_vm0, %v3781_v61, %v3780_v60  ;;  %v3782_v1 = vld [vmem:[%s8502_s0 + $0x245] sm:$0x4]   ;;  %v698_v10 = vsel %vm243_vm4, %v3794_v55, %v694_v5  ;;  %v826_v51 = vsel %vm231_vm1, %v3827_v46, %v822_v45  ;;  %v3832_v54 = vld [vmem:[%s8502_s0 + $0xf4] sm:$0x80]  }
  0x2c   :  { %v3796_v59 = vld [vmem:[%s8502_s0 + $0x2f0] sm:$0x80]   ;;  %v3783_v2 = vld [vmem:[%s8502_s0 + $0x264] sm:$0x8]   ;;  %v651_v6 = vsel %vm231_vm1, %v3782_v1, %v647_v0  ;;  %v702_v15 = vsel %vm247_vm5, %v3795_v56, %v698_v10  ;;  %v830_v56 = vsel %vm235_vm2, %v3828_v47, %v826_v51  ;;  %v3816_v57 = vld [vmem:[%s8502_s0 + $0xb] sm:$0x1]  }
  0x2d   :  { %v3784_v3 = vld [vmem:[%s8502_s0 + $0x283] sm:$0x10]   ;;  %v655_v11 = vsel %vm235_vm2, %v3783_v2, %v651_v6  ;;  %v3807_v12 = vld [vmem:[%s8502_s0 + $0x317] sm:$0x1]   ;;  %v706_v21 = vsel %vm251_vm6, %v3796_v59, %v702_v15  ;;  %v3817_v58 = vld [vmem:[%s8502_s0 + $0x2a] sm:$0x2]   ;;  %v834_v61 = vsel %vm239_vm3, %v3829_v48, %v830_v56 }
  0x2e   :  { %v3785_v7 = vld [vmem:[%s8502_s0 + $0x2a2] sm:$0x20]   ;;  %v3808_v13 = vld [vmem:[%s8502_s0 + $0x336] sm:$0x2]   ;;  %v659_v16 = vsel %vm239_vm3, %v3784_v3, %v655_v11  ;;  %v3818_v59 = vld [vmem:[%s8502_s0 + $0x49] sm:$0x4]   ;;  %v787_v62 = vsel %vm227_vm0, %v3817_v58, %v3816_v57  ;;  %v838_v3 = vsel %vm243_vm4, %v3830_v52, %v834_v61 }
  0x2f   :  { %v3786_v8 = vld [vmem:[%s8502_s0 + $0x2c1] sm:$0x40]   ;;  %v3809_v14 = vld [vmem:[%s8502_s0 + $0x355] sm:$0x4]   ;;  %v752_v17 = vsel %vm227_vm0, %v3808_v13, %v3807_v12  ;;  %v663_v22 = vsel %vm243_vm4, %v3785_v7, %v659_v16  ;;  %707 = vrot.lane.b32.xlu1 %v706_v21, %s4537_s27  ;;  %v3819_v63 = vld [vmem:[%s8502_s0 + $0x68] sm:$0x8]   ;;  %v791_v4 = vsel %vm231_vm1, %v3818_v59, %v787_v62 }
  0x30   :  { %v3787_v9 = vld [vmem:[%s8502_s0 + $0x2e0] sm:$0x80]   ;;  %v3810_v18 = vld [vmem:[%s8502_s0 + $0x374] sm:$0x8]   ;;  %v756_v23 = vsel %vm231_vm1, %v3809_v14, %v752_v17  ;;  %v667_v27 = vsel %vm247_vm5, %v3786_v8, %v663_v22  ;;  %v3820_v0 = vld [vmem:[%s8502_s0 + $0x87] sm:$0x10]   ;;  %v842_v8 = vsel %vm247_vm5, %v3831_v53, %v838_v3 }
  0x31   :  { %v3811_v19 = vld [vmem:[%s8502_s0 + $0x393] sm:$0x10]   ;;  %v3798_v26 = vld [vmem:[%s8502_s0 + $0x307] sm:$0x1]   ;;  %v760_v28 = vsel %vm235_vm2, %v3810_v18, %v756_v23  ;;  %v671_v32 = vsel %vm251_vm6, %v3787_v9, %v667_v27  ;;  %v3821_v1 = vld [vmem:[%s8502_s0 + $0xa6] sm:$0x20]   ;;  %v795_v9 = vsel %vm235_vm2, %v3819_v63, %v791_v4  ;;  %v846_v13 = vsel %vm251_vm6, %v3832_v54, %v842_v8 }
  0x32   :  { %v3812_v20 = vld [vmem:[%s8502_s0 + $0x3b2] sm:$0x20]   ;;  %v3799_v29 = vld [vmem:[%s8502_s0 + $0x326] sm:$0x2]   ;;  %v764_v33 = vsel %vm239_vm3, %v3811_v19, %v760_v28  ;;  %672 = vrot.lane.b32.xlu0 %v671_v32, %s4537_s27  ;;  %v3822_v5 = vld [vmem:[%s8502_s0 + $0xc5] sm:$0x40]   ;;  %v799_v14 = vsel %vm239_vm3, %v3820_v0, %v795_v9 }
  0x33   :  { %v3813_v24 = vld [vmem:[%s8502_s0 + $0x3d1] sm:$0x40]   ;;  %v3800_v30 = vld [vmem:[%s8502_s0 + $0x345] sm:$0x4]   ;;  %v717_v34 = vsel %vm227_vm0, %v3799_v29, %v3798_v26  ;;  %v768_v38 = vsel %vm243_vm4, %v3812_v20, %v764_v33  ;;  %v3823_v6 = vld [vmem:[%s8502_s0 + $0xe4] sm:$0x80]   ;;  %v803_v19 = vsel %vm243_vm4, %v3821_v1, %v799_v14 }
  0x34   :  { %v3814_v25 = vld [vmem:[%s8502_s0 + $0x3f0] sm:$0x80]   ;;  %v3801_v31 = vld [vmem:[%s8502_s0 + $0x364] sm:$0x8]   ;;  %v721_v39 = vsel %vm231_vm1, %v3800_v30, %v717_v34  ;;  %v772_v43 = vsel %vm247_vm5, %v3813_v24, %v768_v38  ;;  %v3843_v7 = vld [vmem:[%s8502_s0 + $0x11b] sm:$0x1]   ;;  %v807_v24 = vsel %vm247_vm5, %v3822_v5, %v803_v19 }
  0x35   :  { %v3802_v35 = vld [vmem:[%s8502_s0 + $0x383] sm:$0x10]   ;;  %v725_v44 = vsel %vm235_vm2, %v3801_v31, %v721_v39  ;;  %v776_v49 = vsel %vm251_vm6, %v3814_v25, %v772_v43  ;;  %v3844_v10 = vld [vmem:[%s8502_s0 + $0x13a] sm:$0x2]   ;;  %v3834_v22 = vld [vmem:[%s8502_s0 + $0x10b] sm:$0x1]   ;;  %v811_v30 = vsel %vm251_vm6, %v3823_v6, %v807_v24 }
  0x36   :  { %v3803_v36 = vld [vmem:[%s8502_s0 + $0x3a2] sm:$0x20]   ;;  %v729_v50 = vsel %vm239_vm3, %v3802_v35, %v725_v44  ;;  %777 = vrot.lane.b32.xlu1 %v776_v49, %s4537_s27  ;;  %v3845_v11 = vld [vmem:[%s8502_s0 + $0x159] sm:$0x4]   ;;  %v892_v15 = vsel %vm227_vm0, %v3844_v10, %v3843_v7  ;;  %v3835_v23 = vld [vmem:[%s8502_s0 + $0x12a] sm:$0x2]  }
  0x37   :  { %v3804_v37 = vld [vmem:[%s8502_s0 + $0x3c1] sm:$0x40]   ;;  %v733_v55 = vsel %vm243_vm4, %v3803_v36, %v729_v50  ;;  %v3846_v12 = vld [vmem:[%s8502_s0 + $0x178] sm:$0x8]   ;;  %v896_v20 = vsel %vm231_vm1, %v3845_v11, %v892_v15  ;;  %v857_v26 = vsel %vm227_vm0, %v3835_v23, %v3834_v22  ;;  %v3836_v27 = vld [vmem:[%s8502_s0 + $0x149] sm:$0x4]  }
  0x38   :  { %v3805_v40 = vld [vmem:[%s8502_s0 + $0x3e0] sm:$0x80]   ;;  %v737_v60 = vsel %vm247_vm5, %v3804_v37, %v733_v55  ;;  %v3847_v16 = vld [vmem:[%s8502_s0 + $0x197] sm:$0x10]   ;;  %v900_v25 = vsel %vm235_vm2, %v3846_v12, %v896_v20  ;;  %v3837_v28 = vld [vmem:[%s8502_s0 + $0x168] sm:$0x8]   ;;  %v861_v32 = vsel %vm231_vm1, %v3836_v27, %v857_v26 }
  0x39   :  { %v741_v2 = vsel %vm251_vm6, %v3805_v40, %v737_v60  ;;  %v3848_v17 = vld [vmem:[%s8502_s0 + $0x1b6] sm:$0x20]   ;;  %v3838_v29 = vld [vmem:[%s8502_s0 + $0x187] sm:$0x10]   ;;  %v904_v31 = vsel %vm239_vm3, %v3847_v16, %v900_v25  ;;  %v865_v37 = vsel %vm235_vm2, %v3837_v28, %v861_v32 }
  0x3a   :  { %742 = vrot.lane.b32.xlu0 %v741_v2, %s4537_s27  ;;  %v3849_v18 = vld [vmem:[%s8502_s0 + $0x1d5] sm:$0x40]   ;;  %847 = vrot.lane.b32.xlu1 %v846_v13, %s4537_s27  ;;  %v3839_v33 = vld [vmem:[%s8502_s0 + $0x1a6] sm:$0x20]   ;;  %v908_v36 = vsel %vm243_vm4, %v3848_v17, %v904_v31  ;;  %v869_v42 = vsel %vm239_vm3, %v3838_v29, %v865_v37 }
  0x3b   :  { %v3850_v21 = vld [vmem:[%s8502_s0 + $0x1f4] sm:$0x80]   ;;  %v3840_v34 = vld [vmem:[%s8502_s0 + $0x1c5] sm:$0x40]   ;;  %v912_v41 = vsel %vm247_vm5, %v3849_v18, %v908_v36  ;;  %v873_v48 = vsel %vm243_vm4, %v3839_v33, %v869_v42  ;;  %v3897_v33 = vld [vmem:[%s8502_s0 + $0x1f] sm:$0x1]  }
  0x3c   :  { %v3841_v35 = vld [vmem:[%s8502_s0 + $0x1e4] sm:$0x80]   ;;  %v3861_v38 = vld [vmem:[%s8502_s0 + $0x21b] sm:$0x1]   ;;  %v916_v47 = vsel %vm251_vm6, %v3850_v21, %v912_v41  ;;  %v877_v53 = vsel %vm247_vm5, %v3840_v34, %v873_v48  ;;  %v3898_v36 = vld [vmem:[%s8502_s0 + $0x3e] sm:$0x2]  }
  0x3d   :  { %v3862_v39 = vld [vmem:[%s8502_s0 + $0x23a] sm:$0x2]   ;;  %v3852_v52 = vld [vmem:[%s8502_s0 + $0x20b] sm:$0x1]   ;;  %v881_v58 = vsel %vm251_vm6, %v3841_v35, %v877_v53  ;;  %v3899_v37 = vld [vmem:[%s8502_s0 + $0x5d] sm:$0x4]   ;;  %v1102_v41 = vsel %vm227_vm0, %v3898_v36, %v3897_v33 }
  0x3e   :  { %812 = vrot.lane.b32.xlu0 %v811_v30, %s4537_s27  ;;  %v3863_v40 = vld [vmem:[%s8502_s0 + $0x259] sm:$0x4]   ;;  %v962_v43 = vsel %vm227_vm0, %v3862_v39, %v3861_v38  ;;  %917 = vrot.lane.b32.xlu1 %v916_v47, %s4537_s27  ;;  %v3853_v55 = vld [vmem:[%s8502_s0 + $0x22a] sm:$0x2]  }
  0x3f   :  { %v3864_v44 = vld [vmem:[%s8502_s0 + $0x278] sm:$0x8]   ;;  %v966_v49 = vsel %vm231_vm1, %v3863_v40, %v962_v43  ;;  %v3854_v56 = vld [vmem:[%s8502_s0 + $0x249] sm:$0x4]   ;;  %v927_v60 = vsel %vm227_vm0, %v3853_v55, %v3852_v52  ;;  %v3900_v38 = vld [vmem:[%s8502_s0 + $0x7c] sm:$0x8]  }
  0x40   :  { %v3865_v45 = vld [vmem:[%s8502_s0 + $0x297] sm:$0x10]   ;;  %v970_v54 = vsel %vm235_vm2, %v3864_v44, %v966_v49  ;;  %v3855_v57 = vld [vmem:[%s8502_s0 + $0x268] sm:$0x8]   ;;  %v931_v1 = vsel %vm231_vm1, %v3854_v56, %v927_v60  ;;  %v3901_v42 = vld [vmem:[%s8502_s0 + $0x9b] sm:$0x10]  }
  0x41   :  { %v3866_v46 = vld [vmem:[%s8502_s0 + $0x2b6] sm:$0x20]   ;;  %v974_v59 = vsel %vm239_vm3, %v3865_v45, %v970_v54  ;;  %v3856_v61 = vld [vmem:[%s8502_s0 + $0x287] sm:$0x10]   ;;  %v935_v6 = vsel %vm235_vm2, %v3855_v57, %v931_v1  ;;  %v3902_v43 = vld [vmem:[%s8502_s0 + $0xba] sm:$0x20]  }
  0x42   :  { %v3867_v50 = vld [vmem:[%s8502_s0 + $0x2d5] sm:$0x40]   ;;  %v3857_v62 = vld [vmem:[%s8502_s0 + $0x2a6] sm:$0x20]   ;;  %882 = vrot.lane.b32.xlu0 %v881_v58, %s4537_s27  ;;  %v978_v0 = vsel %vm243_vm4, %v3866_v46, %v974_v59  ;;  %v939_v12 = vsel %vm239_vm3, %v3856_v61, %v935_v6  ;;  %v3903_v44 = vld [vmem:[%s8502_s0 + $0xd9] sm:$0x40]   ;;  %v1106_v46 = vsel %vm231_vm1, %v3899_v37, %v1102_v41 }
  0x43   :  { %v3868_v51 = vld [vmem:[%s8502_s0 + $0x2f4] sm:$0x80]   ;;  %v3858_v63 = vld [vmem:[%s8502_s0 + $0x2c5] sm:$0x40]   ;;  %v982_v5 = vsel %vm247_vm5, %v3867_v50, %v978_v0  ;;  %v943_v17 = vsel %vm243_vm4, %v3857_v62, %v939_v12  ;;  %v3904_v47 = vld [vmem:[%s8502_s0 + $0xf8] sm:$0x80]  }
  0x44   :  { %v3859_v2 = vld [vmem:[%s8502_s0 + $0x2e4] sm:$0x80]   ;;  %v3879_v3 = vld [vmem:[%s8502_s0 + $0x31b] sm:$0x1]   ;;  %v986_v11 = vsel %vm251_vm6, %v3868_v51, %v982_v5  ;;  %v947_v22 = vsel %vm247_vm5, %v3858_v63, %v943_v17  ;;  %v3888_v48 = vld [vmem:[%s8502_s0 + $0xf] sm:$0x1]   ;;  %v1110_v51 = vsel %vm235_vm2, %v3900_v38, %v1106_v46 }
  0x45   :  { %v3880_v4 = vld [vmem:[%s8502_s0 + $0x33a] sm:$0x2]   ;;  %987 = vrot.lane.b32.xlu1 %v986_v11, %s4537_s27  ;;  %v3870_v19 = vld [vmem:[%s8502_s0 + $0x30b] sm:$0x1]   ;;  %v951_v28 = vsel %vm251_vm6, %v3859_v2, %v947_v22  ;;  %v3889_v49 = vld [vmem:[%s8502_s0 + $0x2e] sm:$0x2]   ;;  %v1114_v57 = vsel %vm239_vm3, %v3901_v42, %v1110_v51 }
  0x46   :  { %v1032_v7 = vsel %vm227_vm0, %v3880_v4, %v3879_v3  ;;  %v3881_v8 = vld [vmem:[%s8502_s0 + $0x359] sm:$0x4]   ;;  %v3871_v20 = vld [vmem:[%s8502_s0 + $0x32a] sm:$0x2]   ;;  %952 = vrot.lane.b32.xlu0 %v951_v28, %s4537_s27  ;;  %v1067_v52 = vsel %vm227_vm0, %v3889_v49, %v3888_v48  ;;  %v3890_v53 = vld [vmem:[%s8502_s0 + $0x4d] sm:$0x4]   ;;  %v1118_v62 = vsel %vm243_vm4, %v3902_v43, %v1114_v57 }
  0x47   :  { %v3882_v9 = vld [vmem:[%s8502_s0 + $0x378] sm:$0x8]   ;;  %v1036_v13 = vsel %vm231_vm1, %v3881_v8, %v1032_v7  ;;  %v3872_v21 = vld [vmem:[%s8502_s0 + $0x349] sm:$0x4]   ;;  %v997_v24 = vsel %vm227_vm0, %v3871_v20, %v3870_v19  ;;  %v3891_v54 = vld [vmem:[%s8502_s0 + $0x6c] sm:$0x8]   ;;  %v1071_v58 = vsel %vm231_vm1, %v3890_v53, %v1067_v52  ;;  %v1122_v3 = vsel %vm247_vm5, %v3903_v44, %v1118_v62 }
  0x48   :  { %v3883_v10 = vld [vmem:[%s8502_s0 + $0x397] sm:$0x10]   ;;  %v1040_v18 = vsel %vm235_vm2, %v3882_v9, %v1036_v13  ;;  %v3873_v25 = vld [vmem:[%s8502_s0 + $0x368] sm:$0x8]   ;;  %v1001_v30 = vsel %vm231_vm1, %v3872_v21, %v997_v24  ;;  %v3892_v55 = vld [vmem:[%s8502_s0 + $0x8b] sm:$0x10]   ;;  %v1075_v63 = vsel %vm235_vm2, %v3891_v54, %v1071_v58  ;;  %v1126_v9 = vsel %vm251_vm6, %v3904_v47, %v1122_v3 }
  0x49   :  { %v3884_v14 = vld [vmem:[%s8502_s0 + $0x3b6] sm:$0x20]   ;;  %v1044_v23 = vsel %vm239_vm3, %v3883_v10, %v1040_v18  ;;  %v3874_v26 = vld [vmem:[%s8502_s0 + $0x387] sm:$0x10]   ;;  %v1005_v35 = vsel %vm235_vm2, %v3873_v25, %v1001_v30  ;;  %v3893_v59 = vld [vmem:[%s8502_s0 + $0xaa] sm:$0x20]   ;;  %v1079_v4 = vsel %vm239_vm3, %v3892_v55, %v1075_v63 }
  0x4a   :  { %v3885_v15 = vld [vmem:[%s8502_s0 + $0x3d5] sm:$0x40]   ;;  %v3875_v27 = vld [vmem:[%s8502_s0 + $0x3a6] sm:$0x20]   ;;  %v1048_v29 = vsel %vm243_vm4, %v3884_v14, %v1044_v23  ;;  %v1009_v40 = vsel %vm239_vm3, %v3874_v26, %v1005_v35  ;;  %v3894_v60 = vld [vmem:[%s8502_s0 + $0xc9] sm:$0x40]   ;;  %v1083_v10 = vsel %vm243_vm4, %v3893_v59, %v1079_v4 }
  0x4b   :  { %v3886_v16 = vld [vmem:[%s8502_s0 + $0x3f4] sm:$0x80]   ;;  %v3876_v31 = vld [vmem:[%s8502_s0 + $0x3c5] sm:$0x40]   ;;  %v1052_v34 = vsel %vm247_vm5, %v3885_v15, %v1048_v29  ;;  %v1013_v45 = vsel %vm243_vm4, %v3875_v27, %v1009_v40  ;;  %v3895_v61 = vld [vmem:[%s8502_s0 + $0xe8] sm:$0x80]   ;;  %v1087_v15 = vsel %vm247_vm5, %v3894_v60, %v1083_v10 }
  0x4c   :  { %v3877_v32 = vld [vmem:[%s8502_s0 + $0x3e4] sm:$0x80]   ;;  %v1056_v39 = vsel %vm251_vm6, %v3886_v16, %v1052_v34  ;;  %v1017_v50 = vsel %vm247_vm5, %v3876_v31, %v1013_v45  ;;  %v3915_v0 = vld [vmem:[%s8502_s0 + $0x11f] sm:$0x1]   ;;  %v3906_v14 = vld [vmem:[%s8502_s0 + $0x10f] sm:$0x1]   ;;  %v1091_v20 = vsel %vm251_vm6, %v3895_v61, %v1087_v15 }
  0x4d   :  { %1057 = vrot.lane.b32.xlu1 %v1056_v39, %s4537_s27  ;;  %v1021_v56 = vsel %vm251_vm6, %v3877_v32, %v1017_v50  ;;  %v3916_v1 = vld [vmem:[%s8502_s0 + $0x13e] sm:$0x2]   ;;  %v3907_v17 = vld [vmem:[%s8502_s0 + $0x12e] sm:$0x2]  }
  0x4e   :  { %1022 = vrot.lane.b32.xlu0 %v1021_v56, %s4537_s27  ;;  %v3917_v2 = vld [vmem:[%s8502_s0 + $0x15d] sm:$0x4]   ;;  %v1172_v5 = vsel %vm227_vm0, %v3916_v1, %v3915_v0  ;;  %v3908_v18 = vld [vmem:[%s8502_s0 + $0x14d] sm:$0x4]   ;;  %v1137_v22 = vsel %vm227_vm0, %v3907_v17, %v3906_v14 }
  0x4f   :  { %v3918_v6 = vld [vmem:[%s8502_s0 + $0x17c] sm:$0x8]   ;;  %v1176_v11 = vsel %vm231_vm1, %v3917_v2, %v1172_v5  ;;  %v3909_v19 = vld [vmem:[%s8502_s0 + $0x16c] sm:$0x8]   ;;  %v1141_v27 = vsel %vm231_vm1, %v3908_v18, %v1137_v22 }
  0x50   :  { %v3919_v7 = vld [vmem:[%s8502_s0 + $0x19b] sm:$0x10]   ;;  %v1180_v16 = vsel %vm235_vm2, %v3918_v6, %v1176_v11  ;;  %v3910_v23 = vld [vmem:[%s8502_s0 + $0x18b] sm:$0x10]   ;;  %v1145_v32 = vsel %vm235_vm2, %v3909_v19, %v1141_v27  ;;  %v3969_v27 = vld [vmem:[%s8502_s0 + $0x31] sm:$0x2]  }
  0x51   :  { %v3920_v8 = vld [vmem:[%s8502_s0 + $0x1ba] sm:$0x20]   ;;  %1127 = vrot.lane.b32.xlu1 %v1126_v9, %s4537_s27  ;;  %v1184_v21 = vsel %vm239_vm3, %v3919_v7, %v1180_v16  ;;  %v3911_v24 = vld [vmem:[%s8502_s0 + $0x1aa] sm:$0x20]   ;;  %v1149_v38 = vsel %vm239_vm3, %v3910_v23, %v1145_v32  ;;  %v3971_v32 = vld [vmem:[%s8502_s0 + $0x6f] sm:$0x8]  }
  0x52   :  { %v3921_v12 = vld [vmem:[%s8502_s0 + $0x1d9] sm:$0x40]   ;;  %v3912_v25 = vld [vmem:[%s8502_s0 + $0x1c9] sm:$0x40]   ;;  %1092 = vrot.lane.b32.xlu0 %v1091_v20, %s4537_s27  ;;  %v1188_v26 = vsel %vm243_vm4, %v3920_v8, %v1184_v21  ;;  %v1153_v43 = vsel %vm243_vm4, %v3911_v24, %v1149_v38  ;;  %v3974_v38 = vld [vmem:[%s8502_s0 + $0xcc] sm:$0x40]  }
  0x53   :  { %v3922_v13 = vld [vmem:[%s8502_s0 + $0x1f8] sm:$0x80]   ;;  %v3913_v28 = vld [vmem:[%s8502_s0 + $0x1e8] sm:$0x80]   ;;  %v1192_v31 = vsel %vm247_vm5, %v3921_v12, %v1188_v26  ;;  %v1157_v48 = vsel %vm247_vm5, %v3912_v25, %v1153_v43  ;;  %v3968_v26 = vld [vmem:[%s8502_s0 + $0x12] sm:$0x1]  }
  0x54   :  { %v3933_v29 = vld [vmem:[%s8502_s0 + $0x21f] sm:$0x1]   ;;  %v1196_v37 = vsel %vm251_vm6, %v3922_v13, %v1192_v31  ;;  %v3924_v45 = vld [vmem:[%s8502_s0 + $0x20f] sm:$0x1]   ;;  %v1161_v54 = vsel %vm251_vm6, %v3913_v28, %v1157_v48  ;;  %v3970_v28 = vld [vmem:[%s8502_s0 + $0x50] sm:$0x4]   ;;  %v1381_v31 = vsel %vm227_vm0, %v3969_v27, %v3968_v26 }
  0x55   :  { %v3934_v30 = vld [vmem:[%s8502_s0 + $0x23e] sm:$0x2]   ;;  %1197 = vrot.lane.b32.xlu1 %v1196_v37, %s4537_s27  ;;  %v3925_v46 = vld [vmem:[%s8502_s0 + $0x22e] sm:$0x2]   ;;  %v1385_v37 = vsel %vm231_vm1, %v3970_v28, %v1381_v31  ;;  %v3961_v43 = vld [vmem:[%s8502_s0 + $0x21] sm:$0x2]  }
  0x56   :  { %v1242_v33 = vsel %vm227_vm0, %v3934_v30, %v3933_v29  ;;  %v3935_v34 = vld [vmem:[%s8502_s0 + $0x25d] sm:$0x4]   ;;  %v3926_v47 = vld [vmem:[%s8502_s0 + $0x24d] sm:$0x4]   ;;  %v1207_v50 = vsel %vm227_vm0, %v3925_v46, %v3924_v45  ;;  %1162 = vrot.lane.b32.xlu0 %v1161_v54, %s4537_s27  ;;  %v3963_v45 = vld [vmem:[%s8502_s0 + $0x5f] sm:$0x8]  }
  0x57   :  { %v3936_v35 = vld [vmem:[%s8502_s0 + $0x27c] sm:$0x8]   ;;  %v1246_v39 = vsel %vm231_vm1, %v3935_v34, %v1242_v33  ;;  %v3927_v51 = vld [vmem:[%s8502_s0 + $0x26c] sm:$0x8]   ;;  %v1211_v56 = vsel %vm231_vm1, %v3926_v47, %v1207_v50  ;;  %v3972_v33 = vld [vmem:[%s8502_s0 + $0x8e] sm:$0x10]  }
  0x58   :  { %v3937_v36 = vld [vmem:[%s8502_s0 + $0x29b] sm:$0x10]   ;;  %v1250_v44 = vsel %vm235_vm2, %v3936_v35, %v1246_v39  ;;  %v3928_v52 = vld [vmem:[%s8502_s0 + $0x28b] sm:$0x10]   ;;  %v1215_v61 = vsel %vm235_vm2, %v3927_v51, %v1211_v56  ;;  %v3973_v34 = vld [vmem:[%s8502_s0 + $0xad] sm:$0x20]  }
  0x59   :  { %v3938_v40 = vld [vmem:[%s8502_s0 + $0x2ba] sm:$0x20]   ;;  %v1254_v49 = vsel %vm239_vm3, %v3937_v36, %v1250_v44  ;;  %v3929_v53 = vld [vmem:[%s8502_s0 + $0x2aa] sm:$0x20]   ;;  %v1219_v2 = vsel %vm239_vm3, %v3928_v52, %v1215_v61  ;;  %v3975_v39 = vld [vmem:[%s8502_s0 + $0xeb] sm:$0x80]  }
  0x5a   :  { %v3939_v41 = vld [vmem:[%s8502_s0 + $0x2d9] sm:$0x40]   ;;  %v1258_v55 = vsel %vm243_vm4, %v3938_v40, %v1254_v49  ;;  %v3930_v57 = vld [vmem:[%s8502_s0 + $0x2c9] sm:$0x40]   ;;  %v1223_v7 = vsel %vm243_vm4, %v3929_v53, %v1219_v2  ;;  %v3960_v40 = vld [vmem:[%s8502_s0 + $0x2] sm:$0x1]  }
  0x5b   :  { %v3940_v42 = vld [vmem:[%s8502_s0 + $0x2f8] sm:$0x80]   ;;  %v3931_v58 = vld [vmem:[%s8502_s0 + $0x2e8] sm:$0x80]   ;;  %v1262_v60 = vsel %vm247_vm5, %v3939_v41, %v1258_v55  ;;  %v1227_v12 = vsel %vm247_vm5, %v3930_v57, %v1223_v7  ;;  %v3962_v44 = vld [vmem:[%s8502_s0 + $0x40] sm:$0x4]   ;;  %v1347_v48 = vsel %vm227_vm0, %v3961_v43, %v3960_v40 }
  0x5c   :  { %v3951_v59 = vld [vmem:[%s8502_s0 + $0x31f] sm:$0x1]   ;;  %v1266_v1 = vsel %vm251_vm6, %v3940_v42, %v1262_v60  ;;  %v3942_v10 = vld [vmem:[%s8502_s0 + $0x30f] sm:$0x1]   ;;  %v1231_v18 = vsel %vm251_vm6, %v3931_v58, %v1227_v12  ;;  %v1389_v42 = vsel %vm235_vm2, %v3971_v32, %v1385_v37  ;;  %v3964_v49 = vld [vmem:[%s8502_s0 + $0x7e] sm:$0x10]   ;;  %v1351_v53 = vsel %vm231_vm1, %v3962_v44, %v1347_v48 }
  0x5d   :  { %v3952_v62 = vld [vmem:[%s8502_s0 + $0x33e] sm:$0x2]   ;;  %1267 = vrot.lane.b32.xlu1 %v1266_v1, %s4537_s27  ;;  %v3943_v11 = vld [vmem:[%s8502_s0 + $0x32e] sm:$0x2]   ;;  %1232 = vrot.lane.b32.xlu0 %v1231_v18, %s4537_s27  ;;  %v1393_v47 = vsel %vm239_vm3, %v3972_v33, %v1389_v42  ;;  %v1355_v58 = vsel %vm235_vm2, %v3963_v45, %v1351_v53 }
  0x5e   :  { %v3953_v63 = vld [vmem:[%s8502_s0 + $0x35d] sm:$0x4]   ;;  %v1312_v3 = vsel %vm227_vm0, %v3952_v62, %v3951_v59  ;;  %v1277_v14 = vsel %vm227_vm0, %v3943_v11, %v3942_v10  ;;  %v3944_v15 = vld [vmem:[%s8502_s0 + $0x34d] sm:$0x4]   ;;  %v3965_v50 = vld [vmem:[%s8502_s0 + $0x9d] sm:$0x20]   ;;  %v1397_v52 = vsel %vm243_vm4, %v3973_v34, %v1393_v47 }
  0x5f   :  { %v3954_v0 = vld [vmem:[%s8502_s0 + $0x37c] sm:$0x8]   ;;  %v1316_v8 = vsel %vm231_vm1, %v3953_v63, %v1312_v3  ;;  %v3945_v16 = vld [vmem:[%s8502_s0 + $0x36c] sm:$0x8]   ;;  %v1281_v20 = vsel %vm231_vm1, %v3944_v15, %v1277_v14  ;;  %v3966_v51 = vld [vmem:[%s8502_s0 + $0xbc] sm:$0x40]   ;;  %v1401_v57 = vsel %vm247_vm5, %v3974_v38, %v1397_v52 }
  0x60   :  { %v3955_v4 = vld [vmem:[%s8502_s0 + $0x39b] sm:$0x10]   ;;  %v1320_v13 = vsel %vm235_vm2, %v3954_v0, %v1316_v8  ;;  %v3946_v17 = vld [vmem:[%s8502_s0 + $0x38b] sm:$0x10]   ;;  %v1285_v25 = vsel %vm235_vm2, %v3945_v16, %v1281_v20  ;;  %v3967_v54 = vld [vmem:[%s8502_s0 + $0xdb] sm:$0x80]   ;;  %v1405_v63 = vsel %vm251_vm6, %v3975_v39, %v1401_v57  ;;  %v1359_v0 = vsel %vm239_vm3, %v3964_v49, %v1355_v58 }
  0x61   :  { %v3956_v5 = vld [vmem:[%s8502_s0 + $0x3ba] sm:$0x20]   ;;  %v1324_v19 = vsel %vm239_vm3, %v3955_v4, %v1320_v13  ;;  %v3947_v21 = vld [vmem:[%s8502_s0 + $0x3aa] sm:$0x20]   ;;  %v1289_v30 = vsel %vm239_vm3, %v3946_v17, %v1285_v25  ;;  %v3986_v55 = vld [vmem:[%s8502_s0 + $0x112] sm:$0x1]  }
  0x62   :  { %v3957_v6 = vld [vmem:[%s8502_s0 + $0x3d9] sm:$0x40]   ;;  %v3948_v22 = vld [vmem:[%s8502_s0 + $0x3c9] sm:$0x40]   ;;  %v1328_v24 = vsel %vm243_vm4, %v3956_v5, %v1324_v19  ;;  %v1293_v36 = vsel %vm243_vm4, %v3947_v21, %v1289_v30  ;;  %v3987_v56 = vld [vmem:[%s8502_s0 + $0x131] sm:$0x2]   ;;  %v1363_v5 = vsel %vm243_vm4, %v3965_v50, %v1359_v0 }
  0x63   :  { %v3958_v9 = vld [vmem:[%s8502_s0 + $0x3f8] sm:$0x80]   ;;  %v3949_v23 = vld [vmem:[%s8502_s0 + $0x3e8] sm:$0x80]   ;;  %v1332_v29 = vsel %vm247_vm5, %v3957_v6, %v1328_v24  ;;  %v1297_v41 = vsel %vm247_vm5, %v3948_v22, %v1293_v36  ;;  %v1451_v59 = vsel %vm227_vm0, %v3987_v56, %v3986_v55  ;;  %v3988_v60 = vld [vmem:[%s8502_s0 + $0x150] sm:$0x4]   ;;  %v1367_v10 = vsel %vm247_vm5, %v3966_v51, %v1363_v5 }
  0x64   :  { %v1336_v35 = vsel %vm251_vm6, %v3958_v9, %v1332_v29  ;;  %v1301_v46 = vsel %vm251_vm6, %v3949_v23, %v1297_v41  ;;  %v3989_v61 = vld [vmem:[%s8502_s0 + $0x16f] sm:$0x8]   ;;  %v1455_v1 = vsel %vm231_vm1, %v3988_v60, %v1451_v59  ;;  %v3977_v7 = vld [vmem:[%s8502_s0 + $0x102] sm:$0x1]   ;;  %v1371_v16 = vsel %vm251_vm6, %v3967_v54, %v1367_v10 }
  0x65   :  { %1337 = vrot.lane.b32.xlu1 %v1336_v35, %s4537_s27  ;;  %1302 = vrot.lane.b32.xlu0 %v1301_v46, %s4537_s27  ;;  %v3990_v62 = vld [vmem:[%s8502_s0 + $0x18e] sm:$0x10]   ;;  %v1459_v6 = vsel %vm235_vm2, %v3989_v61, %v1455_v1  ;;  %v3978_v8 = vld [vmem:[%s8502_s0 + $0x121] sm:$0x2]  }
  0x66   :  { %v3991_v2 = vld [vmem:[%s8502_s0 + $0x1ad] sm:$0x20]   ;;  %v3979_v9 = vld [vmem:[%s8502_s0 + $0x140] sm:$0x4]   ;;  %v1463_v11 = vsel %vm239_vm3, %v3990_v62, %v1459_v6  ;;  %v1416_v12 = vsel %vm227_vm0, %v3978_v8, %v3977_v7 }
  0x67   :  { %v3992_v3 = vld [vmem:[%s8502_s0 + $0x1cc] sm:$0x40]   ;;  %v3980_v13 = vld [vmem:[%s8502_s0 + $0x15f] sm:$0x8]   ;;  %v1467_v17 = vsel %vm243_vm4, %v3991_v2, %v1463_v11  ;;  %v1420_v18 = vsel %vm231_vm1, %v3979_v9, %v1416_v12 }
  0x68   :  { %v3993_v4 = vld [vmem:[%s8502_s0 + $0x1eb] sm:$0x80]   ;;  %v3981_v14 = vld [vmem:[%s8502_s0 + $0x17e] sm:$0x10]   ;;  %v1471_v22 = vsel %vm247_vm5, %v3992_v3, %v1467_v17  ;;  %v1424_v23 = vsel %vm235_vm2, %v3980_v13, %v1420_v18  ;;  %v4040_v17 = vld [vmem:[%s8502_s0 + $0x16] sm:$0x1]  }
  0x69   :  { %1406 = vrot.lane.b32.xlu1 %v1405_v63, %s4538_s4  ;;  %v3982_v15 = vld [vmem:[%s8502_s0 + $0x19d] sm:$0x20]   ;;  %v4004_v21 = vld [vmem:[%s8502_s0 + $0x212] sm:$0x1]   ;;  %1372 = vrot.lane.b32.xlu0 %v1371_v16, %s4538_s4  ;;  %v1475_v27 = vsel %vm251_vm6, %v3993_v4, %v1471_v22  ;;  %v1428_v28 = vsel %vm239_vm3, %v3981_v14, %v1424_v23 }
  0x6a   :  { %v3983_v19 = vld [vmem:[%s8502_s0 + $0x1bc] sm:$0x40]   ;;  %v4005_v24 = vld [vmem:[%s8502_s0 + $0x231] sm:$0x2]   ;;  %v1432_v33 = vsel %vm243_vm4, %v3982_v15, %v1428_v28  ;;  %v4041_v18 = vld [vmem:[%s8502_s0 + $0x35] sm:$0x2]  }
  0x6b   :  { %v3984_v20 = vld [vmem:[%s8502_s0 + $0x1db] sm:$0x80]   ;;  %v4006_v25 = vld [vmem:[%s8502_s0 + $0x250] sm:$0x4]   ;;  %v1521_v29 = vsel %vm227_vm0, %v4005_v24, %v4004_v21  ;;  %v1436_v38 = vsel %vm247_vm5, %v3983_v19, %v1432_v33  ;;  %v1661_v21 = vsel %vm227_vm0, %v4041_v18, %v4040_v17  ;;  %v4042_v22 = vld [vmem:[%s8502_s0 + $0x54] sm:$0x4]  }
  0x6c   :  { %v4007_v26 = vld [vmem:[%s8502_s0 + $0x26f] sm:$0x8]   ;;  %v1525_v34 = vsel %vm231_vm1, %v4006_v25, %v1521_v29  ;;  %v3995_v36 = vld [vmem:[%s8502_s0 + $0x202] sm:$0x1]   ;;  %v1440_v44 = vsel %vm251_vm6, %v3984_v20, %v1436_v38  ;;  %v4043_v23 = vld [vmem:[%s8502_s0 + $0x73] sm:$0x8]  }
  0x6d   :  { %v4008_v30 = vld [vmem:[%s8502_s0 + $0x28e] sm:$0x10]   ;;  %1476 = vrot.lane.b32.xlu1 %v1475_v27, %s4538_s4  ;;  %v3996_v37 = vld [vmem:[%s8502_s0 + $0x221] sm:$0x2]   ;;  %v1529_v39 = vsel %vm235_vm2, %v4007_v26, %v1525_v34  ;;  %1441 = vrot.lane.b32.xlu0 %v1440_v44, %s4538_s4  ;;  %v1665_v27 = vsel %vm231_vm1, %v4042_v22, %v1661_v21 }
  0x6e   :  { %v4009_v31 = vld [vmem:[%s8502_s0 + $0x2ad] sm:$0x20]   ;;  %v1486_v40 = vsel %vm227_vm0, %v3996_v37, %v3995_v36  ;;  %v3997_v41 = vld [vmem:[%s8502_s0 + $0x240] sm:$0x4]   ;;  %v1533_v45 = vsel %vm239_vm3, %v4008_v30, %v1529_v39  ;;  %v4044_v24 = vld [vmem:[%s8502_s0 + $0x92] sm:$0x10]  }
  0x6f   :  { %v4010_v32 = vld [vmem:[%s8502_s0 + $0x2cc] sm:$0x40]   ;;  %v3998_v42 = vld [vmem:[%s8502_s0 + $0x25f] sm:$0x8]   ;;  %v1490_v46 = vsel %vm231_vm1, %v3997_v41, %v1486_v40  ;;  %v1537_v50 = vsel %vm243_vm4, %v4009_v31, %v1533_v45  ;;  %v4045_v28 = vld [vmem:[%s8502_s0 + $0xb1] sm:$0x20]  }
  0x70   :  { %v4011_v35 = vld [vmem:[%s8502_s0 + $0x2eb] sm:$0x80]   ;;  %v3999_v43 = vld [vmem:[%s8502_s0 + $0x27e] sm:$0x10]   ;;  %v1494_v51 = vsel %vm235_vm2, %v3998_v42, %v1490_v46  ;;  %v1541_v55 = vsel %vm247_vm5, %v4010_v32, %v1537_v50  ;;  %v4046_v29 = vld [vmem:[%s8502_s0 + $0xd0] sm:$0x40]   ;;  %v1669_v32 = vsel %vm235_vm2, %v4043_v23, %v1665_v27 }
  0x71   :  { %v4000_v47 = vld [vmem:[%s8502_s0 + $0x29d] sm:$0x20]   ;;  %v4022_v52 = vld [vmem:[%s8502_s0 + $0x312] sm:$0x1]   ;;  %v1498_v56 = vsel %vm239_vm3, %v3999_v43, %v1494_v51  ;;  %v1545_v61 = vsel %vm251_vm6, %v4011_v35, %v1541_v55  ;;  %v4047_v30 = vld [vmem:[%s8502_s0 + $0xef] sm:$0x80]   ;;  %v1673_v37 = vsel %vm239_vm3, %v4044_v24, %v1669_v32 }
  0x72   :  { %v4001_v48 = vld [vmem:[%s8502_s0 + $0x2bc] sm:$0x40]   ;;  %v4023_v53 = vld [vmem:[%s8502_s0 + $0x331] sm:$0x2]   ;;  %v1502_v62 = vsel %vm243_vm4, %v4000_v47, %v1498_v56  ;;  %1546 = vrot.lane.b32.xlu1 %v1545_v61, %s4538_s4  ;;  %v4031_v33 = vld [vmem:[%s8502_s0 + $0x6] sm:$0x1]   ;;  %v1677_v43 = vsel %vm243_vm4, %v4045_v28, %v1673_v37 }
  0x73   :  { %v4002_v49 = vld [vmem:[%s8502_s0 + $0x2db] sm:$0x80]   ;;  %v4024_v54 = vld [vmem:[%s8502_s0 + $0x350] sm:$0x4]   ;;  %v1591_v57 = vsel %vm227_vm0, %v4023_v53, %v4022_v52  ;;  %v1506_v3 = vsel %vm247_vm5, %v4001_v48, %v1502_v62  ;;  %v4032_v34 = vld [vmem:[%s8502_s0 + $0x25] sm:$0x2]   ;;  %v1681_v48 = vsel %vm247_vm5, %v4046_v29, %v1677_v43 }
  0x74   :  { %v4025_v58 = vld [vmem:[%s8502_s0 + $0x36f] sm:$0x8]   ;;  %v1595_v63 = vsel %vm231_vm1, %v4024_v54, %v1591_v57  ;;  %v4013_v2 = vld [vmem:[%s8502_s0 + $0x302] sm:$0x1]   ;;  %v1510_v8 = vsel %vm251_vm6, %v4002_v49, %v1506_v3  ;;  %v4033_v35 = vld [vmem:[%s8502_s0 + $0x44] sm:$0x4]   ;;  %v1626_v38 = vsel %vm227_vm0, %v4032_v34, %v4031_v33  ;;  %v1685_v53 = vsel %vm251_vm6, %v4047_v30, %v1681_v48 }
  0x75   :  { %v4026_v59 = vld [vmem:[%s8502_s0 + $0x38e] sm:$0x10]   ;;  %v1599_v4 = vsel %vm235_vm2, %v4025_v58, %v1595_v63  ;;  %v4014_v5 = vld [vmem:[%s8502_s0 + $0x321] sm:$0x2]   ;;  %1511 = vrot.lane.b32.xlu0 %v1510_v8, %s4538_s4  ;;  %v4034_v39 = vld [vmem:[%s8502_s0 + $0x63] sm:$0x8]   ;;  %v1630_v44 = vsel %vm231_vm1, %v4033_v35, %v1626_v38 }
  0x76   :  { %v4027_v60 = vld [vmem:[%s8502_s0 + $0x3ad] sm:$0x20]   ;;  %v4015_v6 = vld [vmem:[%s8502_s0 + $0x340] sm:$0x4]   ;;  %v1603_v9 = vsel %vm239_vm3, %v4026_v59, %v1599_v4  ;;  %v1556_v10 = vsel %vm227_vm0, %v4014_v5, %v4013_v2  ;;  %v4035_v40 = vld [vmem:[%s8502_s0 + $0x82] sm:$0x10]   ;;  %v1634_v49 = vsel %vm235_vm2, %v4034_v39, %v1630_v44 }
  0x77   :  { %v4028_v0 = vld [vmem:[%s8502_s0 + $0x3cc] sm:$0x40]   ;;  %v4016_v7 = vld [vmem:[%s8502_s0 + $0x35f] sm:$0x8]   ;;  %v1607_v14 = vsel %vm243_vm4, %v4027_v60, %v1603_v9  ;;  %v1560_v15 = vsel %vm231_vm1, %v4015_v6, %v1556_v10  ;;  %v4036_v41 = vld [vmem:[%s8502_s0 + $0xa1] sm:$0x20]   ;;  %v1638_v54 = vsel %vm239_vm3, %v4035_v40, %v1634_v49 }
  0x78   :  { %v4029_v1 = vld [vmem:[%s8502_s0 + $0x3eb] sm:$0x80]   ;;  %v4017_v11 = vld [vmem:[%s8502_s0 + $0x37e] sm:$0x10]   ;;  %v1611_v19 = vsel %vm247_vm5, %v4028_v0, %v1607_v14  ;;  %v1564_v20 = vsel %vm235_vm2, %v4016_v7, %v1560_v15  ;;  %v4037_v45 = vld [vmem:[%s8502_s0 + $0xc0] sm:$0x40]   ;;  %v1642_v59 = vsel %vm243_vm4, %v4036_v41, %v1638_v54 }
  0x79   :  { %v4018_v12 = vld [vmem:[%s8502_s0 + $0x39d] sm:$0x20]   ;;  %v1615_v25 = vsel %vm251_vm6, %v4029_v1, %v1611_v19  ;;  %v1568_v26 = vsel %vm239_vm3, %v4017_v11, %v1564_v20  ;;  %v4038_v46 = vld [vmem:[%s8502_s0 + $0xdf] sm:$0x80]   ;;  %v4058_v47 = vld [vmem:[%s8502_s0 + $0x116] sm:$0x1]   ;;  %v1646_v0 = vsel %vm247_vm5, %v4037_v45, %v1642_v59 }
  0x7a   :  { %v4019_v13 = vld [vmem:[%s8502_s0 + $0x3bc] sm:$0x40]   ;;  %1616 = vrot.lane.b32.xlu1 %v1615_v25, %s4538_s4  ;;  %v1572_v31 = vsel %vm243_vm4, %v4018_v12, %v1568_v26  ;;  %v4059_v50 = vld [vmem:[%s8502_s0 + $0x135] sm:$0x2]   ;;  %v4049_v62 = vld [vmem:[%s8502_s0 + $0x106] sm:$0x1]   ;;  %v1650_v6 = vsel %vm251_vm6, %v4038_v46, %v1646_v0 }
  0x7b   :  { %v4020_v16 = vld [vmem:[%s8502_s0 + $0x3db] sm:$0x80]   ;;  %v1576_v36 = vsel %vm247_vm5, %v4019_v13, %v1572_v31  ;;  %v4060_v51 = vld [vmem:[%s8502_s0 + $0x154] sm:$0x4]   ;;  %v1731_v55 = vsel %vm227_vm0, %v4059_v50, %v4058_v47  ;;  %v4050_v63 = vld [vmem:[%s8502_s0 + $0x125] sm:$0x2]  }
  0x7c   :  { %v1580_v42 = vsel %vm251_vm6, %v4020_v16, %v1576_v36  ;;  %v4061_v52 = vld [vmem:[%s8502_s0 + $0x173] sm:$0x8]   ;;  %v1735_v60 = vsel %vm231_vm1, %v4060_v51, %v1731_v55  ;;  %v1696_v2 = vsel %vm227_vm0, %v4050_v63, %v4049_v62  ;;  %v4051_v3 = vld [vmem:[%s8502_s0 + $0x144] sm:$0x4]   ;;  %v6019_v45 = vpop.permute.xlu1 %322  }
  0x7d   :  { %1581 = vrot.lane.b32.xlu0 %v1580_v42, %s4538_s4  ;;  %v4062_v56 = vld [vmem:[%s8502_s0 + $0x192] sm:$0x10]   ;;  %v1739_v1 = vsel %vm235_vm2, %v4061_v52, %v1735_v60  ;;  %v4052_v4 = vld [vmem:[%s8502_s0 + $0x163] sm:$0x8]   ;;  %v1700_v8 = vsel %vm231_vm1, %v4051_v3, %v1696_v2 }
  0x7e   :  { %v4063_v57 = vld [vmem:[%s8502_s0 + $0x1b1] sm:$0x20]   ;;  %1686 = vrot.lane.b32.xlu1 %v1685_v53, %s4538_s4  ;;  %v4053_v5 = vld [vmem:[%s8502_s0 + $0x182] sm:$0x10]   ;;  %v1743_v7 = vsel %vm239_vm3, %v4062_v56, %v1739_v1  ;;  %v1704_v13 = vsel %vm235_vm2, %v4052_v4, %v1700_v8 }
  0x7f   :  { %v4064_v58 = vld [vmem:[%s8502_s0 + $0x1d0] sm:$0x40]   ;;  %v4054_v9 = vld [vmem:[%s8502_s0 + $0x1a1] sm:$0x20]   ;;  %v1747_v12 = vsel %vm243_vm4, %v4063_v57, %v1743_v7  ;;  %v1708_v18 = vsel %vm239_vm3, %v4053_v5, %v1704_v13 }
  0x80   :  { %v4065_v61 = vld [vmem:[%s8502_s0 + $0x1ef] sm:$0x80]   ;;  %v4055_v10 = vld [vmem:[%s8502_s0 + $0x1c0] sm:$0x40]   ;;  %v1751_v17 = vsel %vm247_vm5, %v4064_v58, %v1747_v12  ;;  %v1712_v24 = vsel %vm243_vm4, %v4054_v9, %v1708_v18  ;;  %v6083_v12 = vpop.permute.xlu1 %357  }
  0x81   :  { %v4056_v11 = vld [vmem:[%s8502_s0 + $0x1df] sm:$0x80]   ;;  %1651 = vrot.lane.b32.xlu0 %v1650_v6, %s4538_s4  ;;  %v4076_v14 = vld [vmem:[%s8502_s0 + $0x216] sm:$0x1]   ;;  %v1755_v23 = vsel %vm251_vm6, %v4065_v61, %v1751_v17  ;;  %v1716_v29 = vsel %vm247_vm5, %v4055_v10, %v1712_v24  ;;  %v4115_v17 = vld [vmem:[%s8502_s0 + $0x77] sm:$0x8]  }
  0x82   :  { %v4077_v15 = vld [vmem:[%s8502_s0 + $0x235] sm:$0x2]   ;;  %v4067_v28 = vld [vmem:[%s8502_s0 + $0x206] sm:$0x1]   ;;  %1756 = vrot.lane.b32.xlu1 %v1755_v23, %s4538_s4  ;;  %v1720_v34 = vsel %vm251_vm6, %v4056_v11, %v1716_v29  ;;  %v4112_v11 = vld [vmem:[%s8502_s0 + $0x1a] sm:$0x1]  }
  0x83   :  { %v4078_v16 = vld [vmem:[%s8502_s0 + $0x254] sm:$0x4]   ;;  %v1801_v19 = vsel %vm227_vm0, %v4077_v15, %v4076_v14  ;;  %v4068_v31 = vld [vmem:[%s8502_s0 + $0x225] sm:$0x2]   ;;  %v4113_v15 = vld [vmem:[%s8502_s0 + $0x39] sm:$0x2]  }
  0x84   :  { %v4079_v20 = vld [vmem:[%s8502_s0 + $0x273] sm:$0x8]   ;;  %v1805_v25 = vsel %vm231_vm1, %v4078_v16, %v1801_v19  ;;  %v4069_v32 = vld [vmem:[%s8502_s0 + $0x244] sm:$0x4]   ;;  %v1766_v36 = vsel %vm227_vm0, %v4068_v31, %v4067_v28  ;;  %v6045_v58 = vpop.permute.xlu0 %253   ;;  %v4114_v16 = vld [vmem:[%s8502_s0 + $0x58] sm:$0x4]  }
  0x85   :  { %v4080_v21 = vld [vmem:[%s8502_s0 + $0x292] sm:$0x10]   ;;  %v1809_v30 = vsel %vm235_vm2, %v4079_v20, %v1805_v25  ;;  %v4070_v33 = vld [vmem:[%s8502_s0 + $0x263] sm:$0x8]   ;;  %1721 = vrot.lane.b32.xlu0 %v1720_v34, %s4538_s4  ;;  %v1770_v41 = vsel %vm231_vm1, %v4069_v32, %v1766_v36  ;;  %v1941_v20 = vsel %vm227_vm0, %v4113_v15, %v4112_v11  ;;  %v4118_v23 = vld [vmem:[%s8502_s0 + $0xd4] sm:$0x40]  }
  0x86   :  { %v4081_v22 = vld [vmem:[%s8502_s0 + $0x2b1] sm:$0x20]   ;;  %v1813_v35 = vsel %vm239_vm3, %v4080_v21, %v1809_v30  ;;  %v4071_v37 = vld [vmem:[%s8502_s0 + $0x282] sm:$0x10]   ;;  %v1774_v47 = vsel %vm235_vm2, %v4070_v33, %v1770_v41  ;;  %v4116_v21 = vld [vmem:[%s8502_s0 + $0x96] sm:$0x10]   ;;  %v1945_v25 = vsel %vm231_vm1, %v4114_v16, %v1941_v20 }
  0x87   :  { %v4082_v26 = vld [vmem:[%s8502_s0 + $0x2d0] sm:$0x40]   ;;  %v4072_v38 = vld [vmem:[%s8502_s0 + $0x2a1] sm:$0x20]   ;;  %v1817_v40 = vsel %vm243_vm4, %v4081_v22, %v1813_v35  ;;  %v1778_v53 = vsel %vm239_vm3, %v4071_v37, %v1774_v47  ;;  %v4117_v22 = vld [vmem:[%s8502_s0 + $0xb5] sm:$0x20]   ;;  %v1949_v31 = vsel %vm235_vm2, %v4115_v17, %v1945_v25 }
  0x88   :  { %v4083_v27 = vld [vmem:[%s8502_s0 + $0x2ef] sm:$0x80]   ;;  %v4073_v39 = vld [vmem:[%s8502_s0 + $0x2c0] sm:$0x40]   ;;  %v1821_v46 = vsel %vm247_vm5, %v4082_v26, %v1817_v40  ;;  %v1782_v59 = vsel %vm243_vm4, %v4072_v38, %v1778_v53  ;;  %v4119_v26 = vld [vmem:[%s8502_s0 + $0xf3] sm:$0x80]   ;;  %v6121_v29 = vpop.permute.xlu0 %287   ;;  %v1953_v37 = vsel %vm239_vm3, %v4116_v21, %v1949_v31 }
  0x89   :  { %v4074_v42 = vld [vmem:[%s8502_s0 + $0x2df] sm:$0x80]   ;;  %v4094_v43 = vld [vmem:[%s8502_s0 + $0x316] sm:$0x1]   ;;  %v1825_v52 = vsel %vm251_vm6, %v4083_v27, %v1821_v46  ;;  %v1786_v0 = vsel %vm247_vm5, %v4073_v39, %v1782_v59  ;;  %v4103_v27 = vld [vmem:[%s8502_s0 + $0xa] sm:$0x1]  }
  0x8a   :  { %v4095_v44 = vld [vmem:[%s8502_s0 + $0x335] sm:$0x2]   ;;  %1826 = vrot.lane.b32.xlu1 %v1825_v52, %s4538_s4  ;;  %v4085_v61 = vld [vmem:[%s8502_s0 + $0x306] sm:$0x1]   ;;  %v1790_v6 = vsel %vm251_vm6, %v4074_v42, %v1786_v0  ;;  %v4104_v28 = vld [vmem:[%s8502_s0 + $0x29] sm:$0x2]  }
  0x8b   :  { %v1871_v48 = vsel %vm227_vm0, %v4095_v44, %v4094_v43  ;;  %v4096_v49 = vld [vmem:[%s8502_s0 + $0x354] sm:$0x4]   ;;  %v4086_v62 = vld [vmem:[%s8502_s0 + $0x325] sm:$0x2]   ;;  %1791 = vrot.lane.b32.xlu0 %v1790_v6, %s4538_s4  ;;  %v1906_v32 = vsel %vm227_vm0, %v4104_v28, %v4103_v27  ;;  %v4105_v33 = vld [vmem:[%s8502_s0 + $0x48] sm:$0x4]   ;;  %v1957_v43 = vsel %vm243_vm4, %v4117_v22, %v1953_v37 }
  0x8c   :  { %v4097_v50 = vld [vmem:[%s8502_s0 + $0x373] sm:$0x8]   ;;  %v1875_v54 = vsel %vm231_vm1, %v4096_v49, %v1871_v48  ;;  %v4087_v63 = vld [vmem:[%s8502_s0 + $0x344] sm:$0x4]   ;;  %v1836_v2 = vsel %vm227_vm0, %v4086_v62, %v4085_v61  ;;  %v4106_v34 = vld [vmem:[%s8502_s0 + $0x67] sm:$0x8]   ;;  %v1910_v38 = vsel %vm231_vm1, %v4105_v33, %v1906_v32  ;;  %v1961_v49 = vsel %vm247_vm5, %v4118_v23, %v1957_v43  ;;  %v6185_v62 = vpop.permute.xlu0 %392  }
  0x8d   :  { %v4098_v51 = vld [vmem:[%s8502_s0 + $0x392] sm:$0x10]   ;;  %v1879_v60 = vsel %vm235_vm2, %v4097_v50, %v1875_v54  ;;  %v4088_v3 = vld [vmem:[%s8502_s0 + $0x363] sm:$0x8]   ;;  %v1840_v8 = vsel %vm231_vm1, %v4087_v63, %v1836_v2  ;;  %v4107_v35 = vld [vmem:[%s8502_s0 + $0x86] sm:$0x10]   ;;  %v6147_v42 = vpop.permute.xlu1 %427   ;;  %v1914_v44 = vsel %vm235_vm2, %v4106_v34, %v1910_v38 }
  0x8e   :  { %v4099_v55 = vld [vmem:[%s8502_s0 + $0x3b1] sm:$0x20]   ;;  %v1883_v1 = vsel %vm239_vm3, %v4098_v51, %v1879_v60  ;;  %v4089_v4 = vld [vmem:[%s8502_s0 + $0x382] sm:$0x10]   ;;  %v1844_v14 = vsel %vm235_vm2, %v4088_v3, %v1840_v8  ;;  %v4108_v39 = vld [vmem:[%s8502_s0 + $0xa5] sm:$0x20]   ;;  %v1918_v50 = vsel %vm239_vm3, %v4107_v35, %v1914_v44 }
  0x8f   :  { %v4100_v56 = vld [vmem:[%s8502_s0 + $0x3d0] sm:$0x40]   ;;  %v4090_v5 = vld [vmem:[%s8502_s0 + $0x3a1] sm:$0x20]   ;;  %v1887_v7 = vsel %vm243_vm4, %v4099_v55, %v1883_v1  ;;  %v1848_v19 = vsel %vm239_vm3, %v4089_v4, %v1844_v14  ;;  %v4109_v40 = vld [vmem:[%s8502_s0 + $0xc4] sm:$0x40]   ;;  %v1965_v55 = vsel %vm251_vm6, %v4119_v26, %v1961_v49 }
  0x90   :  { %v4101_v57 = vld [vmem:[%s8502_s0 + $0x3ef] sm:$0x80]   ;;  %v4091_v9 = vld [vmem:[%s8502_s0 + $0x3c0] sm:$0x40]   ;;  %v1891_v13 = vsel %vm247_vm5, %v4100_v56, %v1887_v7  ;;  %v1852_v24 = vsel %vm243_vm4, %v4090_v5, %v1848_v19  ;;  %v4110_v41 = vld [vmem:[%s8502_s0 + $0xe3] sm:$0x80]   ;;  %v1922_v56 = vsel %vm243_vm4, %v4108_v39, %v1918_v50 }
  0x91   :  { %v4092_v10 = vld [vmem:[%s8502_s0 + $0x3df] sm:$0x80]   ;;  %v1895_v18 = vsel %vm251_vm6, %v4101_v57, %v1891_v13  ;;  %v1856_v30 = vsel %vm247_vm5, %v4091_v9, %v1852_v24  ;;  %v4130_v46 = vld [vmem:[%s8502_s0 + $0x11a] sm:$0x1]   ;;  %v4121_v61 = vld [vmem:[%s8502_s0 + $0x10a] sm:$0x1]   ;;  %v1926_v63 = vsel %vm247_vm5, %v4109_v40, %v1922_v56 }
  0x92   :  { %1896 = vrot.lane.b32.xlu1 %v1895_v18, %s4538_s4  ;;  %v1860_v36 = vsel %vm251_vm6, %v4092_v10, %v1856_v30  ;;  %v4131_v47 = vld [vmem:[%s8502_s0 + $0x139] sm:$0x2]   ;;  %v4122_v1 = vld [vmem:[%s8502_s0 + $0x129] sm:$0x2]   ;;  %v1930_v4 = vsel %vm251_vm6, %v4110_v41, %v1926_v63 }
  0x93   :  { %1861 = vrot.lane.b32.xlu0 %v1860_v36, %s4538_s4  ;;  %v4132_v48 = vld [vmem:[%s8502_s0 + $0x158] sm:$0x4]   ;;  %v2011_v51 = vsel %vm227_vm0, %v4131_v47, %v4130_v46  ;;  %v4123_v2 = vld [vmem:[%s8502_s0 + $0x148] sm:$0x4]   ;;  %v1976_v6 = vsel %vm227_vm0, %v4122_v1, %v4121_v61 }
  0x94   :  { %v4133_v52 = vld [vmem:[%s8502_s0 + $0x177] sm:$0x8]   ;;  %v2015_v57 = vsel %vm231_vm1, %v4132_v48, %v2011_v51  ;;  %v4124_v3 = vld [vmem:[%s8502_s0 + $0x167] sm:$0x8]   ;;  %v1980_v11 = vsel %vm231_vm1, %v4123_v2, %v1976_v6  ;;  %v6249_v30 = vpop.permute.xlu0 %462  }
  0x95   :  { %v4134_v53 = vld [vmem:[%s8502_s0 + $0x196] sm:$0x10]   ;;  %v2019_v0 = vsel %vm235_vm2, %v4133_v52, %v2015_v57  ;;  %v4125_v7 = vld [vmem:[%s8502_s0 + $0x186] sm:$0x10]   ;;  %v6223_v16 = vpop.permute.xlu1 %497   ;;  %v1984_v18 = vsel %vm235_vm2, %v4124_v3, %v1980_v11 }
  0x96   :  { %v4135_v54 = vld [vmem:[%s8502_s0 + $0x1b5] sm:$0x20]   ;;  %1966 = vrot.lane.b32.xlu1 %v1965_v55, %s4538_s4  ;;  %v2023_v5 = vsel %vm239_vm3, %v4134_v53, %v2019_v0  ;;  %v4126_v8 = vld [vmem:[%s8502_s0 + $0x1a5] sm:$0x20]   ;;  %v1988_v24 = vsel %vm239_vm3, %v4125_v7, %v1984_v18 }
  0x97   :  { %v4136_v59 = vld [vmem:[%s8502_s0 + $0x1d4] sm:$0x40]   ;;  %v4127_v9 = vld [vmem:[%s8502_s0 + $0x1c4] sm:$0x40]   ;;  %1931 = vrot.lane.b32.xlu0 %v1930_v4, %s4538_s4  ;;  %v2027_v10 = vsel %vm243_vm4, %v4135_v54, %v2023_v5  ;;  %v1992_v31 = vsel %vm243_vm4, %v4126_v8, %v1988_v24  ;;  %v4185_v24 = vld [vmem:[%s8502_s0 + $0x3d] sm:$0x2]  }
  0x98   :  { %v4137_v60 = vld [vmem:[%s8502_s0 + $0x1f3] sm:$0x80]   ;;  %v4128_v13 = vld [vmem:[%s8502_s0 + $0x1e3] sm:$0x80]   ;;  %v2031_v17 = vsel %vm247_vm5, %v4136_v59, %v2027_v10  ;;  %v1996_v36 = vsel %vm247_vm5, %v4127_v9, %v1992_v31  ;;  %v6325_v5 = vpop.permute.xlu0 %532   ;;  %v4187_v31 = vld [vmem:[%s8502_s0 + $0x7b] sm:$0x8]  }
  0x99   :  { %v4148_v14 = vld [vmem:[%s8502_s0 + $0x21a] sm:$0x1]   ;;  %v2035_v23 = vsel %vm251_vm6, %v4137_v60, %v2031_v17  ;;  %v4139_v33 = vld [vmem:[%s8502_s0 + $0x20a] sm:$0x1]   ;;  %v2000_v43 = vsel %vm251_vm6, %v4128_v13, %v1996_v36  ;;  %v6287_v50 = vpop.permute.xlu1 %567  }
  0x9a   :  { %v4149_v15 = vld [vmem:[%s8502_s0 + $0x239] sm:$0x2]   ;;  %2036 = vrot.lane.b32.xlu1 %v2035_v23, %s4538_s4  ;;  %v4140_v34 = vld [vmem:[%s8502_s0 + $0x229] sm:$0x2]   ;;  %v4184_v23 = vld [vmem:[%s8502_s0 + $0x1e] sm:$0x1]  }
  0x9b   :  { %v2081_v19 = vsel %vm227_vm0, %v4149_v15, %v4148_v14  ;;  %v4150_v20 = vld [vmem:[%s8502_s0 + $0x258] sm:$0x4]   ;;  %v4141_v35 = vld [vmem:[%s8502_s0 + $0x248] sm:$0x4]   ;;  %v2046_v38 = vsel %vm227_vm0, %v4140_v34, %v4139_v33  ;;  %2001 = vrot.lane.b32.xlu0 %v2000_v43, %s4538_s4  ;;  %v4189_v33 = vld [vmem:[%s8502_s0 + $0xb9] sm:$0x20]  }
  0x9c   :  { %v4151_v21 = vld [vmem:[%s8502_s0 + $0x277] sm:$0x8]   ;;  %v2085_v25 = vsel %vm231_vm1, %v4150_v20, %v2081_v19  ;;  %v4142_v39 = vld [vmem:[%s8502_s0 + $0x267] sm:$0x8]   ;;  %v2050_v46 = vsel %vm231_vm1, %v4141_v35, %v2046_v38  ;;  %v4191_v38 = vld [vmem:[%s8502_s0 + $0xf7] sm:$0x80]  }
  0x9d   :  { %v4152_v22 = vld [vmem:[%s8502_s0 + $0x296] sm:$0x10]   ;;  %v2089_v32 = vsel %vm235_vm2, %v4151_v21, %v2085_v25  ;;  %v4143_v40 = vld [vmem:[%s8502_s0 + $0x286] sm:$0x10]   ;;  %v2054_v52 = vsel %vm235_vm2, %v4142_v39, %v2050_v46  ;;  %v6351_v20 = vpop.permute.xlu1 %637   ;;  %v4186_v25 = vld [vmem:[%s8502_s0 + $0x5c] sm:$0x4]  }
  0x9e   :  { %v4153_v26 = vld [vmem:[%s8502_s0 + $0x2b5] sm:$0x20]   ;;  %v2093_v37 = vsel %vm239_vm3, %v4152_v22, %v2089_v32  ;;  %v4144_v41 = vld [vmem:[%s8502_s0 + $0x2a5] sm:$0x20]   ;;  %v2058_v57 = vsel %vm239_vm3, %v4143_v40, %v2054_v52  ;;  %v4188_v32 = vld [vmem:[%s8502_s0 + $0x9a] sm:$0x10]   ;;  %v6389_v40 = vpop.permute.xlu0 %602  }
  0x9f   :  { %v4154_v27 = vld [vmem:[%s8502_s0 + $0x2d4] sm:$0x40]   ;;  %v2097_v44 = vsel %vm243_vm4, %v4153_v26, %v2093_v37  ;;  %v4145_v47 = vld [vmem:[%s8502_s0 + $0x2c4] sm:$0x40]   ;;  %v2062_v0 = vsel %vm243_vm4, %v4144_v41, %v2058_v57  ;;  %v4190_v37 = vld [vmem:[%s8502_s0 + $0xd8] sm:$0x40]  }
  0xa0   :  { %v4155_v28 = vld [vmem:[%s8502_s0 + $0x2f3] sm:$0x80]   ;;  %v4146_v48 = vld [vmem:[%s8502_s0 + $0x2e3] sm:$0x80]   ;;  %v2101_v51 = vsel %vm247_vm5, %v4154_v27, %v2097_v44  ;;  %v2066_v6 = vsel %vm247_vm5, %v4145_v47, %v2062_v0  ;;  %v4175_v39 = vld [vmem:[%s8502_s0 + $0xe] sm:$0x1]  }
  0xa1   :  { %v4166_v49 = vld [vmem:[%s8502_s0 + $0x31a] sm:$0x1]   ;;  %v2105_v56 = vsel %vm251_vm6, %v4155_v28, %v2101_v51  ;;  %v4157_v3 = vld [vmem:[%s8502_s0 + $0x30a] sm:$0x1]   ;;  %v2070_v13 = vsel %vm251_vm6, %v4146_v48, %v2066_v6  ;;  %v2221_v28 = vsel %vm227_vm0, %v4185_v24, %v4184_v23  ;;  %v4176_v44 = vld [vmem:[%s8502_s0 + $0x2d] sm:$0x2]  }
  0xa2   :  { %v4167_v53 = vld [vmem:[%s8502_s0 + $0x339] sm:$0x2]   ;;  %2106 = vrot.lane.b32.xlu1 %v2105_v56, %s4538_s4  ;;  %v4158_v4 = vld [vmem:[%s8502_s0 + $0x329] sm:$0x2]   ;;  %2071 = vrot.lane.b32.xlu0 %v2070_v13, %s4538_s4  ;;  %v2225_v36 = vsel %vm231_vm1, %v4186_v25, %v2221_v28  ;;  %v2186_v51 = vsel %vm227_vm0, %v4176_v44, %v4175_v39 }
  0xa3   :  { %v4168_v54 = vld [vmem:[%s8502_s0 + $0x358] sm:$0x4]   ;;  %v2151_v59 = vsel %vm227_vm0, %v4167_v53, %v4166_v49  ;;  %v2116_v8 = vsel %vm227_vm0, %v4158_v4, %v4157_v3  ;;  %v4159_v9 = vld [vmem:[%s8502_s0 + $0x348] sm:$0x4]   ;;  %v2229_v43 = vsel %vm235_vm2, %v4187_v31, %v2225_v36  ;;  %v4177_v46 = vld [vmem:[%s8502_s0 + $0x4c] sm:$0x4]  }
  0xa4   :  { %v4169_v55 = vld [vmem:[%s8502_s0 + $0x377] sm:$0x8]   ;;  %v2155_v1 = vsel %vm231_vm1, %v4168_v54, %v2151_v59  ;;  %v4160_v10 = vld [vmem:[%s8502_s0 + $0x367] sm:$0x8]   ;;  %v2120_v15 = vsel %vm231_vm1, %v4159_v9, %v2116_v8  ;;  %v4178_v47 = vld [vmem:[%s8502_s0 + $0x6b] sm:$0x8]   ;;  %v2233_v49 = vsel %vm239_vm3, %v4188_v32, %v2229_v43  ;;  %v2190_v56 = vsel %vm231_vm1, %v4177_v46, %v2186_v51  ;;  %v6453_v13 = vpop.permute.xlu0 %672  }
  0xa5   :  { %v4170_v60 = vld [vmem:[%s8502_s0 + $0x396] sm:$0x10]   ;;  %v2159_v7 = vsel %vm235_vm2, %v4169_v55, %v2155_v1  ;;  %v4161_v11 = vld [vmem:[%s8502_s0 + $0x386] sm:$0x10]   ;;  %v2124_v22 = vsel %vm235_vm2, %v4160_v10, %v2120_v15  ;;  %v4179_v52 = vld [vmem:[%s8502_s0 + $0x8a] sm:$0x10]   ;;  %v2237_v55 = vsel %vm243_vm4, %v4189_v33, %v2233_v49  ;;  %v2194_v0 = vsel %vm235_vm2, %v4178_v47, %v2190_v56 }
  0xa6   :  { %v4171_v61 = vld [vmem:[%s8502_s0 + $0x3b5] sm:$0x20]   ;;  %v2163_v14 = vsel %vm239_vm3, %v4170_v60, %v2159_v7  ;;  %v4162_v17 = vld [vmem:[%s8502_s0 + $0x3a5] sm:$0x20]   ;;  %v2128_v27 = vsel %vm239_vm3, %v4161_v11, %v2124_v22  ;;  %v4180_v53 = vld [vmem:[%s8502_s0 + $0xa9] sm:$0x20]   ;;  %v2198_v7 = vsel %vm239_vm3, %v4179_v52, %v2194_v0 }
  0xa7   :  { %v4172_v63 = vld [vmem:[%s8502_s0 + $0x3d4] sm:$0x40]   ;;  %v4163_v18 = vld [vmem:[%s8502_s0 + $0x3c4] sm:$0x40]   ;;  %v2167_v21 = vsel %vm243_vm4, %v4171_v61, %v2163_v14  ;;  %v2132_v35 = vsel %vm243_vm4, %v4162_v17, %v2128_v27  ;;  %v4181_v54 = vld [vmem:[%s8502_s0 + $0xc8] sm:$0x40]   ;;  %v6427_v61 = vpop.permute.xlu1 %707   ;;  %v2202_v14 = vsel %vm243_vm4, %v4180_v53, %v2198_v7 }
  0xa8   :  { %v4173_v2 = vld [vmem:[%s8502_s0 + $0x3f3] sm:$0x80]   ;;  %v4164_v19 = vld [vmem:[%s8502_s0 + $0x3e3] sm:$0x80]   ;;  %v2171_v26 = vsel %vm247_vm5, %v4172_v63, %v2167_v21  ;;  %v2136_v41 = vsel %vm247_vm5, %v4163_v18, %v2132_v35  ;;  %v4182_v57 = vld [vmem:[%s8502_s0 + $0xe7] sm:$0x80]   ;;  %v2241_v63 = vsel %vm247_vm5, %v4190_v37, %v2237_v55  ;;  %v2206_v21 = vsel %vm247_vm5, %v4181_v54, %v2202_v14 }
  0xa9   :  { %v2175_v34 = vsel %vm251_vm6, %v4173_v2, %v2171_v26  ;;  %v2140_v48 = vsel %vm251_vm6, %v4164_v19, %v2136_v41  ;;  %v4202_v59 = vld [vmem:[%s8502_s0 + $0x11e] sm:$0x1]   ;;  %v2245_v6 = vsel %vm251_vm6, %v4191_v38, %v2241_v63  ;;  %v4193_v17 = vld [vmem:[%s8502_s0 + $0x10e] sm:$0x1]   ;;  %v2210_v27 = vsel %vm251_vm6, %v4182_v57, %v2206_v21 }
  0xaa   :  { %2176 = vrot.lane.b32.xlu1 %v2175_v34, %s4538_s4  ;;  %2141 = vrot.lane.b32.xlu0 %v2140_v48, %s4538_s4  ;;  %v4203_v60 = vld [vmem:[%s8502_s0 + $0x13d] sm:$0x2]   ;;  %v4194_v18 = vld [vmem:[%s8502_s0 + $0x12d] sm:$0x2]  }
  0xab   :  { %v2291_v1 = vsel %vm227_vm0, %v4203_v60, %v4202_v59  ;;  %v4204_v2 = vld [vmem:[%s8502_s0 + $0x15c] sm:$0x4]   ;;  %v4195_v19 = vld [vmem:[%s8502_s0 + $0x14c] sm:$0x4]   ;;  %v2256_v23 = vsel %vm227_vm0, %v4194_v18, %v4193_v17  ;;  %v6491_v35 = vpop.permute.xlu1 %777  }
  0xac   :  { %v4205_v3 = vld [vmem:[%s8502_s0 + $0x17b] sm:$0x8]   ;;  %v2295_v8 = vsel %vm231_vm1, %v4204_v2, %v2291_v1  ;;  %v4196_v24 = vld [vmem:[%s8502_s0 + $0x16b] sm:$0x8]   ;;  %v2260_v31 = vsel %vm231_vm1, %v4195_v19, %v2256_v23  ;;  %v6529_v56 = vpop.permute.xlu0 %742  }
  0xad   :  { %v4206_v4 = vld [vmem:[%s8502_s0 + $0x19a] sm:$0x10]   ;;  %v2299_v15 = vsel %vm235_vm2, %v4205_v3, %v2295_v8  ;;  %v4197_v25 = vld [vmem:[%s8502_s0 + $0x18a] sm:$0x10]   ;;  %v2264_v37 = vsel %vm235_vm2, %v4196_v24, %v2260_v31 }
  0xae   :  { %v4207_v9 = vld [vmem:[%s8502_s0 + $0x1b9] sm:$0x20]   ;;  %2246 = vrot.lane.b32.xlu1 %v2245_v6, %s4538_s4  ;;  %v2303_v22 = vsel %vm239_vm3, %v4206_v4, %v2299_v15  ;;  %v4198_v26 = vld [vmem:[%s8502_s0 + $0x1a9] sm:$0x20]   ;;  %2211 = vrot.lane.b32.xlu0 %v2210_v27, %s4538_s4  ;;  %v2268_v44 = vsel %vm239_vm3, %v4197_v25, %v2264_v37 }
  0xaf   :  { %v4208_v10 = vld [vmem:[%s8502_s0 + $0x1d8] sm:$0x40]   ;;  %v2307_v28 = vsel %vm243_vm4, %v4207_v9, %v2303_v22  ;;  %v4199_v32 = vld [vmem:[%s8502_s0 + $0x1c8] sm:$0x40]   ;;  %v2272_v51 = vsel %vm243_vm4, %v4198_v26, %v2268_v44  ;;  %v6555_v9 = vpop.permute.xlu1 %847  }
  0xb0   :  { %v4209_v11 = vld [vmem:[%s8502_s0 + $0x1f7] sm:$0x80]   ;;  %v4200_v33 = vld [vmem:[%s8502_s0 + $0x1e7] sm:$0x80]   ;;  %v2311_v36 = vsel %vm247_vm5, %v4208_v10, %v2307_v28  ;;  %v2276_v57 = vsel %vm247_vm5, %v4199_v32, %v2272_v51 }
  0xb1   :  { %v4220_v34 = vld [vmem:[%s8502_s0 + $0x21e] sm:$0x1]   ;;  %v2315_v43 = vsel %vm251_vm6, %v4209_v11, %v2311_v36  ;;  %v4211_v54 = vld [vmem:[%s8502_s0 + $0x20e] sm:$0x1]   ;;  %v2280_v2 = vsel %vm251_vm6, %v4200_v33, %v2276_v57  ;;  %v6593_v33 = vpop.permute.xlu0 %812  }
  0xb2   :  { %v4221_v38 = vld [vmem:[%s8502_s0 + $0x23d] sm:$0x2]   ;;  %2316 = vrot.lane.b32.xlu1 %v2315_v43, %s4538_s4  ;;  %v4212_v55 = vld [vmem:[%s8502_s0 + $0x22d] sm:$0x2]   ;;  %2281 = vrot.lane.b32.xlu0 %v2280_v2, %s4538_s4 }
  0xb3   :  { %v4222_v39 = vld [vmem:[%s8502_s0 + $0x25c] sm:$0x4]   ;;  %v2361_v46 = vsel %vm227_vm0, %v4221_v38, %v4220_v34  ;;  %v2326_v60 = vsel %vm227_vm0, %v4212_v55, %v4211_v54  ;;  %v4213_v63 = vld [vmem:[%s8502_s0 + $0x24c] sm:$0x4]   ;;  %v6628_v54 = vpop.permute.xlu1 %917  }
  0xb4   :  { %v4223_v41 = vld [vmem:[%s8502_s0 + $0x27b] sm:$0x8]   ;;  %v2365_v52 = vsel %vm231_vm1, %v4222_v39, %v2361_v46  ;;  %v4214_v0 = vld [vmem:[%s8502_s0 + $0x26b] sm:$0x8]   ;;  %v2330_v4 = vsel %vm231_vm1, %v4213_v63, %v2326_v60  ;;  %v4257_v60 = vld [vmem:[%s8502_s0 + $0x4f] sm:$0x4]  }
  0xb5   :  { %v4224_v47 = vld [vmem:[%s8502_s0 + $0x29a] sm:$0x10]   ;;  %v2369_v59 = vsel %vm235_vm2, %v4223_v41, %v2365_v52  ;;  %v4215_v1 = vld [vmem:[%s8502_s0 + $0x28a] sm:$0x10]   ;;  %v2334_v11 = vsel %vm235_vm2, %v4214_v0, %v2330_v4  ;;  %v4258_v63 = vld [vmem:[%s8502_s0 + $0x6e] sm:$0x8]  }
  0xb6   :  { %v4225_v48 = vld [vmem:[%s8502_s0 + $0x2b9] sm:$0x20]   ;;  %v2373_v3 = vsel %vm239_vm3, %v4224_v47, %v2369_v59  ;;  %v4216_v6 = vld [vmem:[%s8502_s0 + $0x2a9] sm:$0x20]   ;;  %v2338_v19 = vsel %vm239_vm3, %v4215_v1, %v2334_v11  ;;  %v4256_v59 = vld [vmem:[%s8502_s0 + $0x30] sm:$0x2]  }
  0xb7   :  { %v4226_v49 = vld [vmem:[%s8502_s0 + $0x2d8] sm:$0x40]   ;;  %v4217_v7 = vld [vmem:[%s8502_s0 + $0x2c8] sm:$0x40]   ;;  %v2377_v10 = vsel %vm243_vm4, %v4225_v48, %v2373_v3  ;;  %v2342_v26 = vsel %vm243_vm4, %v4216_v6, %v2338_v19  ;;  %v4259_v3 = vld [vmem:[%s8502_s0 + $0x8d] sm:$0x10]  }
  0xb8   :  { %v4227_v53 = vld [vmem:[%s8502_s0 + $0x2f7] sm:$0x80]   ;;  %v4218_v8 = vld [vmem:[%s8502_s0 + $0x2e7] sm:$0x80]   ;;  %v2381_v18 = vsel %vm247_vm5, %v4226_v49, %v2377_v10  ;;  %v2346_v34 = vsel %vm247_vm5, %v4217_v7, %v2342_v26  ;;  %v4260_v4 = vld [vmem:[%s8502_s0 + $0xac] sm:$0x20]   ;;  %v6653_v7 = vpop.permute.xlu0 %882  }
  0xb9   :  { %v4238_v14 = vld [vmem:[%s8502_s0 + $0x31e] sm:$0x1]   ;;  %v2385_v25 = vsel %vm251_vm6, %v4227_v53, %v2381_v18  ;;  %v4229_v32 = vld [vmem:[%s8502_s0 + $0x30e] sm:$0x1]   ;;  %v2350_v41 = vsel %vm251_vm6, %v4218_v8, %v2346_v34  ;;  %v4255_v53 = vld [vmem:[%s8502_s0 + $0x11] sm:$0x1]  }
  0xba   :  { %v4239_v15 = vld [vmem:[%s8502_s0 + $0x33d] sm:$0x2]   ;;  %2386 = vrot.lane.b32.xlu1 %v2385_v25, %s4538_s4  ;;  %v4230_v37 = vld [vmem:[%s8502_s0 + $0x32d] sm:$0x2]   ;;  %2351 = vrot.lane.b32.xlu0 %v2350_v41, %s4538_s4  ;;  %v2500_v2 = vsel %vm227_vm0, %v4256_v59, %v4255_v53 }
  0xbb   :  { %v4240_v17 = vld [vmem:[%s8502_s0 + $0x35c] sm:$0x4]   ;;  %v2431_v21 = vsel %vm227_vm0, %v4239_v15, %v4238_v14  ;;  %v4231_v38 = vld [vmem:[%s8502_s0 + $0x34c] sm:$0x4]   ;;  %v2396_v44 = vsel %vm227_vm0, %v4230_v37, %v4229_v32  ;;  %v4261_v6 = vld [vmem:[%s8502_s0 + $0xcb] sm:$0x40]   ;;  %v2504_v10 = vsel %vm231_vm1, %v4257_v60, %v2500_v2  ;;  %v6691_v32 = vpop.permute.xlu1 %987  }
  0xbc   :  { %v4241_v22 = vld [vmem:[%s8502_s0 + $0x37b] sm:$0x8]   ;;  %v2435_v27 = vsel %vm231_vm1, %v4240_v17, %v2431_v21  ;;  %v4232_v39 = vld [vmem:[%s8502_s0 + $0x36b] sm:$0x8]   ;;  %v2400_v51 = vsel %vm231_vm1, %v4231_v38, %v2396_v44  ;;  %v4262_v11 = vld [vmem:[%s8502_s0 + $0xea] sm:$0x80]   ;;  %v2508_v18 = vsel %vm235_vm2, %v4258_v63, %v2504_v10  ;;  %v6729_v59 = vpop.permute.xlu0 %952  }
  0xbd   :  { %v4242_v23 = vld [vmem:[%s8502_s0 + $0x39a] sm:$0x10]   ;;  %v2439_v36 = vsel %vm235_vm2, %v4241_v22, %v2435_v27  ;;  %v4233_v46 = vld [vmem:[%s8502_s0 + $0x38a] sm:$0x10]   ;;  %v2404_v57 = vsel %vm235_vm2, %v4232_v39, %v2400_v51  ;;  %v4247_v14 = vld [vmem:[%s8502_s0 + $0x1] sm:$0x1]   ;;  %v2512_v25 = vsel %vm239_vm3, %v4259_v3, %v2508_v18 }
  0xbe   :  { %v4243_v24 = vld [vmem:[%s8502_s0 + $0x3b9] sm:$0x20]   ;;  %v2443_v43 = vsel %vm239_vm3, %v4242_v23, %v2439_v36  ;;  %v4234_v47 = vld [vmem:[%s8502_s0 + $0x3a9] sm:$0x20]   ;;  %v2408_v1 = vsel %vm239_vm3, %v4233_v46, %v2404_v57  ;;  %v4248_v15 = vld [vmem:[%s8502_s0 + $0x20] sm:$0x2]   ;;  %v2516_v34 = vsel %vm243_vm4, %v4260_v4, %v2512_v25 }
  0xbf   :  { %v4244_v28 = vld [vmem:[%s8502_s0 + $0x3d8] sm:$0x40]   ;;  %v4235_v48 = vld [vmem:[%s8502_s0 + $0x3c8] sm:$0x40]   ;;  %v2447_v49 = vsel %vm243_vm4, %v4243_v24, %v2443_v43  ;;  %v2412_v8 = vsel %vm243_vm4, %v4234_v47, %v2408_v1  ;;  %v2466_v19 = vsel %vm227_vm0, %v4248_v15, %v4247_v14  ;;  %v4249_v21 = vld [vmem:[%s8502_s0 + $0x3f] sm:$0x4]   ;;  %v2520_v41 = vsel %vm247_vm5, %v4261_v6, %v2516_v34  ;;  %v6755_v14 = vpop.permute.xlu1 %1057  }
  0xc0   :  { %v4245_v31 = vld [vmem:[%s8502_s0 + $0x3f7] sm:$0x80]   ;;  %v4236_v52 = vld [vmem:[%s8502_s0 + $0x3e7] sm:$0x80]   ;;  %v2451_v55 = vsel %vm247_vm5, %v4244_v28, %v2447_v49  ;;  %v2416_v17 = vsel %vm247_vm5, %v4235_v48, %v2412_v8  ;;  %v4250_v22 = vld [vmem:[%s8502_s0 + $0x5e] sm:$0x8]   ;;  %v2470_v26 = vsel %vm231_vm1, %v4249_v21, %v2466_v19  ;;  %v2524_v49 = vsel %vm251_vm6, %v4262_v11, %v2520_v41 }
  0xc1   :  { %v2455_v0 = vsel %vm251_vm6, %v4245_v31, %v2451_v55  ;;  %v4251_v23 = vld [vmem:[%s8502_s0 + $0x7d] sm:$0x10]   ;;  %v2420_v24 = vsel %vm251_vm6, %v4236_v52, %v2416_v17  ;;  %v2474_v36 = vsel %vm235_vm2, %v4250_v22, %v2470_v26  ;;  %v4273_v37 = vld [vmem:[%s8502_s0 + $0x111] sm:$0x1]  }
  0xc2   :  { %2456 = vrot.lane.b32.xlu1 %v2455_v0, %s4538_s4  ;;  %v4252_v27 = vld [vmem:[%s8502_s0 + $0x9c] sm:$0x20]   ;;  %2421 = vrot.lane.b32.xlu0 %v2420_v24, %s4538_s4  ;;  %v4274_v38 = vld [vmem:[%s8502_s0 + $0x130] sm:$0x2]   ;;  %v2478_v43 = vsel %vm239_vm3, %v4251_v23, %v2474_v36 }
  0xc3   :  { %v4253_v28 = vld [vmem:[%s8502_s0 + $0xbb] sm:$0x40]   ;;  %v4275_v39 = vld [vmem:[%s8502_s0 + $0x14f] sm:$0x4]   ;;  %v2570_v44 = vsel %vm227_vm0, %v4274_v38, %v4273_v37  ;;  %v2482_v51 = vsel %vm243_vm4, %v4252_v27, %v2478_v43 }
  0xc4   :  { %v4254_v31 = vld [vmem:[%s8502_s0 + $0xda] sm:$0x80]   ;;  %v4276_v46 = vld [vmem:[%s8502_s0 + $0x16e] sm:$0x8]   ;;  %v2574_v52 = vsel %vm231_vm1, %v4275_v39, %v2570_v44  ;;  %v2486_v60 = vsel %vm247_vm5, %v4253_v28, %v2482_v51  ;;  %v6793_v39 = vpop.permute.xlu0 %1022  }
  0xc5   :  { %v4277_v47 = vld [vmem:[%s8502_s0 + $0x18d] sm:$0x10]   ;;  %v4264_v57 = vld [vmem:[%s8502_s0 + $0x101] sm:$0x1]   ;;  %v2578_v63 = vsel %vm235_vm2, %v4276_v46, %v2574_v52  ;;  %v2490_v3 = vsel %vm251_vm6, %v4254_v31, %v2486_v60 }
  0xc6   :  { %v4278_v48 = vld [vmem:[%s8502_s0 + $0x1ac] sm:$0x20]   ;;  %2525 = vrot.lane.b32.xlu1 %v2524_v49, %s4539_s14  ;;  %v4265_v0 = vld [vmem:[%s8502_s0 + $0x120] sm:$0x2]   ;;  %v2582_v4 = vsel %vm239_vm3, %v4277_v47, %v2578_v63  ;;  %2491 = vrot.lane.b32.xlu0 %v2490_v3, %s4539_s14  ;;  %v6831_v3 = vpop.permute.xlu1 %1127  }
  0xc7   :  { %v4279_v53 = vld [vmem:[%s8502_s0 + $0x1cb] sm:$0x40]   ;;  %v4266_v1 = vld [vmem:[%s8502_s0 + $0x13f] sm:$0x4]   ;;  %v2535_v6 = vsel %vm227_vm0, %v4265_v0, %v4264_v57  ;;  %v2586_v15 = vsel %vm243_vm4, %v4278_v48, %v2582_v4 }
  0xc8   :  { %v4280_v55 = vld [vmem:[%s8502_s0 + $0x1ea] sm:$0x80]   ;;  %v4267_v2 = vld [vmem:[%s8502_s0 + $0x15e] sm:$0x8]   ;;  %v2539_v17 = vsel %vm231_vm1, %v4266_v1, %v2535_v6  ;;  %v2590_v22 = vsel %vm247_vm5, %v4279_v53, %v2586_v15 }
  0xc9   :  { %v4268_v8 = vld [vmem:[%s8502_s0 + $0x17d] sm:$0x10]   ;;  %v4291_v19 = vld [vmem:[%s8502_s0 + $0x211] sm:$0x1]   ;;  %v2543_v23 = vsel %vm235_vm2, %v4267_v2, %v2539_v17  ;;  %v2594_v28 = vsel %vm251_vm6, %v4280_v55, %v2590_v22 }
  0xca   :  { %v4269_v10 = vld [vmem:[%s8502_s0 + $0x19c] sm:$0x20]   ;;  %v4292_v21 = vld [vmem:[%s8502_s0 + $0x230] sm:$0x2]   ;;  %v2547_v31 = vsel %vm239_vm3, %v4268_v8, %v2543_v23  ;;  %2595 = vrot.lane.b32.xlu1 %v2594_v28, %s4539_s14  ;;  %v6857_v23 = vpop.permute.xlu0 %1092  }
  0xcb   :  { %v4270_v11 = vld [vmem:[%s8502_s0 + $0x1bb] sm:$0x40]   ;;  %v2640_v24 = vsel %vm227_vm0, %v4292_v21, %v4291_v19  ;;  %v4293_v25 = vld [vmem:[%s8502_s0 + $0x24f] sm:$0x4]   ;;  %v2551_v41 = vsel %vm243_vm4, %v4269_v10, %v2547_v31 }
  0xcc   :  { %v4271_v18 = vld [vmem:[%s8502_s0 + $0x1da] sm:$0x80]   ;;  %v4294_v26 = vld [vmem:[%s8502_s0 + $0x26e] sm:$0x8]   ;;  %v2644_v34 = vsel %vm231_vm1, %v4293_v25, %v2640_v24  ;;  %v2555_v48 = vsel %vm247_vm5, %v4270_v11, %v2551_v41 }
  0xcd   :  { %v4295_v27 = vld [vmem:[%s8502_s0 + $0x28d] sm:$0x10]   ;;  %v2648_v43 = vsel %vm235_vm2, %v4294_v26, %v2644_v34  ;;  %v4282_v44 = vld [vmem:[%s8502_s0 + $0x201] sm:$0x1]   ;;  %v2559_v57 = vsel %vm251_vm6, %v4271_v18, %v2555_v48 }
  0xce   :  { %v4296_v36 = vld [vmem:[%s8502_s0 + $0x2ac] sm:$0x20]   ;;  %v4283_v46 = vld [vmem:[%s8502_s0 + $0x220] sm:$0x2]   ;;  %v2652_v49 = vsel %vm239_vm3, %v4295_v27, %v2648_v43  ;;  %2560 = vrot.lane.b32.xlu0 %v2559_v57, %s4539_s14  ;;  %v4328_v57 = vld [vmem:[%s8502_s0 + $0x34] sm:$0x2]  }
  0xcf   :  { %v4297_v37 = vld [vmem:[%s8502_s0 + $0x2cb] sm:$0x40]   ;;  %v4284_v47 = vld [vmem:[%s8502_s0 + $0x23f] sm:$0x4]   ;;  %v2605_v51 = vsel %vm227_vm0, %v4283_v46, %v4282_v44  ;;  %v2656_v60 = vsel %vm243_vm4, %v4296_v36, %v2652_v49 }
  0xd0   :  { %v4298_v38 = vld [vmem:[%s8502_s0 + $0x2ea] sm:$0x80]   ;;  %v4285_v52 = vld [vmem:[%s8502_s0 + $0x25e] sm:$0x8]   ;;  %v2609_v63 = vsel %vm231_vm1, %v4284_v47, %v2605_v51  ;;  %v2660_v4 = vsel %vm247_vm5, %v4297_v37, %v2656_v60  ;;  %v6895_v51 = vpop.permute.xlu1 %1197   ;;  %v4329_v60 = vld [vmem:[%s8502_s0 + $0x53] sm:$0x4]  }
  0xd1   :  { %v4286_v53 = vld [vmem:[%s8502_s0 + $0x27d] sm:$0x10]   ;;  %v4309_v2 = vld [vmem:[%s8502_s0 + $0x311] sm:$0x1]   ;;  %v2613_v6 = vsel %vm235_vm2, %v4285_v52, %v2609_v63  ;;  %v2664_v15 = vsel %vm251_vm6, %v4298_v38, %v2660_v4  ;;  %v4331_v4 = vld [vmem:[%s8502_s0 + $0x91] sm:$0x10]  }
  0xd2   :  { %v4287_v55 = vld [vmem:[%s8502_s0 + $0x29c] sm:$0x20]   ;;  %v4310_v8 = vld [vmem:[%s8502_s0 + $0x330] sm:$0x2]   ;;  %v2617_v17 = vsel %vm239_vm3, %v4286_v53, %v2613_v6  ;;  %2665 = vrot.lane.b32.xlu1 %v2664_v15, %s4539_s14  ;;  %v4332_v6 = vld [vmem:[%s8502_s0 + $0xb0] sm:$0x20]  }
  0xd3   :  { %v4288_v0 = vld [vmem:[%s8502_s0 + $0x2bb] sm:$0x40]   ;;  %v4311_v10 = vld [vmem:[%s8502_s0 + $0x34f] sm:$0x4]   ;;  %v2710_v18 = vsel %vm227_vm0, %v4310_v8, %v4309_v2  ;;  %v2621_v24 = vsel %vm243_vm4, %v4287_v55, %v2617_v17  ;;  %v4327_v55 = vld [vmem:[%s8502_s0 + $0x15] sm:$0x1]  }
  0xd4   :  { %v4289_v1 = vld [vmem:[%s8502_s0 + $0x2da] sm:$0x80]   ;;  %v4312_v11 = vld [vmem:[%s8502_s0 + $0x36e] sm:$0x8]   ;;  %v2714_v25 = vsel %vm231_vm1, %v4311_v10, %v2710_v18  ;;  %v2625_v31 = vsel %vm247_vm5, %v4288_v0, %v2621_v24  ;;  %v4330_v2 = vld [vmem:[%s8502_s0 + $0x72] sm:$0x8]  }
  0xd5   :  { %v4313_v19 = vld [vmem:[%s8502_s0 + $0x38d] sm:$0x10]   ;;  %v4300_v27 = vld [vmem:[%s8502_s0 + $0x301] sm:$0x1]   ;;  %v2718_v34 = vsel %vm235_vm2, %v4312_v11, %v2714_v25  ;;  %v2629_v43 = vsel %vm251_vm6, %v4289_v1, %v2625_v31  ;;  %v2780_v1 = vsel %vm227_vm0, %v4328_v57, %v4327_v55  ;;  %v4333_v15 = vld [vmem:[%s8502_s0 + $0xcf] sm:$0x40]  }
  0xd6   :  { %v4314_v21 = vld [vmem:[%s8502_s0 + $0x3ac] sm:$0x20]   ;;  %v4301_v28 = vld [vmem:[%s8502_s0 + $0x320] sm:$0x2]   ;;  %v2722_v44 = vsel %vm239_vm3, %v4313_v19, %v2718_v34  ;;  %2630 = vrot.lane.b32.xlu0 %v2629_v43, %s4539_s14  ;;  %v2784_v11 = vsel %vm231_vm1, %v4329_v60, %v2780_v1  ;;  %v4334_v17 = vld [vmem:[%s8502_s0 + $0xee] sm:$0x80]   ;;  %v6933_v19 = vpop.permute.xlu0 %1162  }
  0xd7   :  { %v4315_v22 = vld [vmem:[%s8502_s0 + $0x3cb] sm:$0x40]   ;;  %v2675_v36 = vsel %vm227_vm0, %v4301_v28, %v4300_v27  ;;  %v4302_v37 = vld [vmem:[%s8502_s0 + $0x33f] sm:$0x4]   ;;  %v2726_v52 = vsel %vm243_vm4, %v4314_v21, %v2722_v44  ;;  %v4318_v18 = vld [vmem:[%s8502_s0 + $0x5] sm:$0x1]  }
  0xd8   :  { %v4316_v26 = vld [vmem:[%s8502_s0 + $0x3ea] sm:$0x80]   ;;  %v4303_v38 = vld [vmem:[%s8502_s0 + $0x35e] sm:$0x8]   ;;  %v2679_v46 = vsel %vm231_vm1, %v4302_v37, %v2675_v36  ;;  %v2730_v63 = vsel %vm247_vm5, %v4315_v22, %v2726_v52  ;;  %v2788_v22 = vsel %vm235_vm2, %v4330_v2, %v2784_v11  ;;  %v4319_v24 = vld [vmem:[%s8502_s0 + $0x24] sm:$0x2]  }
  0xd9   :  { %v4304_v41 = vld [vmem:[%s8502_s0 + $0x37d] sm:$0x10]   ;;  %v2683_v53 = vsel %vm235_vm2, %v4303_v38, %v2679_v46  ;;  %v2734_v8 = vsel %vm251_vm6, %v4316_v26, %v2730_v63  ;;  %v4320_v25 = vld [vmem:[%s8502_s0 + $0x43] sm:$0x4]   ;;  %v2792_v28 = vsel %vm239_vm3, %v4331_v4, %v2788_v22  ;;  %v2745_v31 = vsel %vm227_vm0, %v4319_v24, %v4318_v18  ;;  %v6959_v38 = vpop.permute.xlu1 %1267   ;;  %v4345_v46 = vld [vmem:[%s8502_s0 + $0x115] sm:$0x1]  }
  0xda   :  { %v4305_v47 = vld [vmem:[%s8502_s0 + $0x39c] sm:$0x20]   ;;  %v2687_v0 = vsel %vm239_vm3, %v4304_v41, %v2683_v53  ;;  %2735 = vrot.lane.b32.xlu1 %v2734_v8, %s4539_s14  ;;  %v4321_v26 = vld [vmem:[%s8502_s0 + $0x62] sm:$0x8]   ;;  %v2796_v41 = vsel %vm243_vm4, %v4332_v6, %v2792_v28  ;;  %v2749_v43 = vsel %vm231_vm1, %v4320_v25, %v2745_v31  ;;  %v4347_v53 = vld [vmem:[%s8502_s0 + $0x153] sm:$0x4]   ;;  %v6997_v6 = vpop.permute.xlu0 %1232  }
  0xdb   :  { %v4306_v48 = vld [vmem:[%s8502_s0 + $0x3bb] sm:$0x40]   ;;  %v2691_v10 = vsel %vm243_vm4, %v4305_v47, %v2687_v0  ;;  %v4322_v34 = vld [vmem:[%s8502_s0 + $0x81] sm:$0x10]   ;;  %v4346_v47 = vld [vmem:[%s8502_s0 + $0x134] sm:$0x2]  }
  0xdc   :  { %v4307_v49 = vld [vmem:[%s8502_s0 + $0x3da] sm:$0x80]   ;;  %v2695_v21 = vsel %vm247_vm5, %v4306_v48, %v2691_v10  ;;  %v4323_v36 = vld [vmem:[%s8502_s0 + $0xa0] sm:$0x20]   ;;  %v2800_v48 = vsel %vm247_vm5, %v4333_v15, %v2796_v41  ;;  %v2850_v52 = vsel %vm227_vm0, %v4346_v47, %v4345_v46  ;;  %v4348_v55 = vld [vmem:[%s8502_s0 + $0x172] sm:$0x8]  }
  0xdd   :  { %v2699_v27 = vsel %vm251_vm6, %v4307_v49, %v2695_v21  ;;  %v4324_v37 = vld [vmem:[%s8502_s0 + $0xbf] sm:$0x40]   ;;  %v2753_v49 = vsel %vm235_vm2, %v4321_v26, %v2749_v43  ;;  %v4349_v57 = vld [vmem:[%s8502_s0 + $0x191] sm:$0x10]   ;;  %v2804_v60 = vsel %vm251_vm6, %v4334_v17, %v2800_v48  ;;  %v2854_v0 = vsel %vm231_vm1, %v4347_v53, %v2850_v52  ;;  %v7035_v41 = vpop.permute.xlu1 %1337  }
  0xde   :  { %2700 = vrot.lane.b32.xlu0 %v2699_v27, %s4539_s14  ;;  %v4325_v44 = vld [vmem:[%s8502_s0 + $0xde] sm:$0x80]   ;;  %v2757_v63 = vsel %vm239_vm3, %v4322_v34, %v2753_v49  ;;  %v4350_v1 = vld [vmem:[%s8502_s0 + $0x1b0] sm:$0x20]   ;;  %2805 = vrot.lane.b32.xlu1 %v2804_v60, %s4539_s14  ;;  %v2858_v10 = vsel %vm235_vm2, %v4348_v55, %v2854_v0 }
  0xdf   :  { %v4351_v2 = vld [vmem:[%s8502_s0 + $0x1cf] sm:$0x40]   ;;  %v2761_v8 = vsel %vm243_vm4, %v4323_v36, %v2757_v63  ;;  %v4336_v11 = vld [vmem:[%s8502_s0 + $0x105] sm:$0x1]   ;;  %v2862_v21 = vsel %vm239_vm3, %v4349_v57, %v2858_v10  ;;  %v7061_v63 = vpop.permute.xlu0 %1302  }
  0xe0   :  { %v4352_v4 = vld [vmem:[%s8502_s0 + $0x1ee] sm:$0x80]   ;;  %v4337_v15 = vld [vmem:[%s8502_s0 + $0x124] sm:$0x2]   ;;  %v2765_v18 = vsel %vm247_vm5, %v4324_v37, %v2761_v8  ;;  %v2866_v28 = vsel %vm243_vm4, %v4350_v1, %v2862_v21 }
  0xe1   :  { %v4338_v17 = vld [vmem:[%s8502_s0 + $0x143] sm:$0x4]   ;;  %v2815_v22 = vsel %vm227_vm0, %v4337_v15, %v4336_v11  ;;  %v2769_v27 = vsel %vm251_vm6, %v4325_v44, %v2765_v18  ;;  %v4363_v37 = vld [vmem:[%s8502_s0 + $0x215] sm:$0x1]   ;;  %v2870_v43 = vsel %vm247_vm5, %v4351_v2, %v2866_v28 }
  0xe2   :  { %v4339_v24 = vld [vmem:[%s8502_s0 + $0x162] sm:$0x8]   ;;  %v2819_v31 = vsel %vm231_vm1, %v4338_v17, %v2815_v22  ;;  %2770 = vrot.lane.b32.xlu0 %v2769_v27, %s4539_s14  ;;  %v4364_v46 = vld [vmem:[%s8502_s0 + $0x234] sm:$0x2]   ;;  %v2874_v49 = vsel %vm251_vm6, %v4352_v4, %v2870_v43 }
  0xe3   :  { %v4340_v25 = vld [vmem:[%s8502_s0 + $0x181] sm:$0x10]   ;;  %v2823_v44 = vsel %vm235_vm2, %v4339_v24, %v2819_v31  ;;  %v4365_v47 = vld [vmem:[%s8502_s0 + $0x253] sm:$0x4]   ;;  %v2920_v53 = vsel %vm227_vm0, %v4364_v46, %v4363_v37  ;;  %2875 = vrot.lane.b32.xlu1 %v2874_v49, %s4539_s14  ;;  %v7099_v31 = vpop.permute.xlu1 %1406  }
  0xe4   :  { %v4341_v26 = vld [vmem:[%s8502_s0 + $0x1a0] sm:$0x20]   ;;  %v4366_v48 = vld [vmem:[%s8502_s0 + $0x272] sm:$0x8]   ;;  %v2827_v52 = vsel %vm239_vm3, %v4340_v25, %v2823_v44  ;;  %v2924_v1 = vsel %vm231_vm1, %v4365_v47, %v2920_v53 }
  0xe5   :  { %v4342_v34 = vld [vmem:[%s8502_s0 + $0x1bf] sm:$0x40]   ;;  %v4367_v55 = vld [vmem:[%s8502_s0 + $0x291] sm:$0x10]   ;;  %v2831_v0 = vsel %vm243_vm4, %v4341_v26, %v2827_v52  ;;  %v2928_v11 = vsel %vm235_vm2, %v4366_v48, %v2924_v1 }
  0xe6   :  { %v4343_v36 = vld [vmem:[%s8502_s0 + $0x1de] sm:$0x80]   ;;  %v4368_v57 = vld [vmem:[%s8502_s0 + $0x2b0] sm:$0x20]   ;;  %v2835_v10 = vsel %vm247_vm5, %v4342_v34, %v2831_v0  ;;  %v2932_v24 = vsel %vm239_vm3, %v4367_v55, %v2928_v11 }
  0xe7   :  { %v4369_v60 = vld [vmem:[%s8502_s0 + $0x2cf] sm:$0x40]   ;;  %v4354_v4 = vld [vmem:[%s8502_s0 + $0x205] sm:$0x1]   ;;  %v2839_v22 = vsel %vm251_vm6, %v4343_v36, %v2835_v10  ;;  %v2936_v34 = vsel %vm243_vm4, %v4368_v57, %v2932_v24 }
  0xe8   :  { %v4370_v2 = vld [vmem:[%s8502_s0 + $0x2ee] sm:$0x80]   ;;  %v4355_v8 = vld [vmem:[%s8502_s0 + $0x224] sm:$0x2]   ;;  %2840 = vrot.lane.b32.xlu0 %v2839_v22, %s4539_s14  ;;  %v2940_v46 = vsel %vm247_vm5, %v4369_v60, %v2936_v34 }
  0xe9   :  { %v2885_v15 = vsel %vm227_vm0, %v4355_v8, %v4354_v4  ;;  %v4356_v17 = vld [vmem:[%s8502_s0 + $0x243] sm:$0x4]   ;;  %v4381_v37 = vld [vmem:[%s8502_s0 + $0x315] sm:$0x1]   ;;  %v2944_v55 = vsel %vm251_vm6, %v4370_v2, %v2940_v46  ;;  %v7137_v4 = vpop.permute.xlu0 %1372  }
  0xea   :  { %v4357_v18 = vld [vmem:[%s8502_s0 + $0x262] sm:$0x8]   ;;  %v2889_v25 = vsel %vm231_vm1, %v4356_v17, %v2885_v15  ;;  %v4382_v43 = vld [vmem:[%s8502_s0 + $0x334] sm:$0x2]   ;;  %2945 = vrot.lane.b32.xlu1 %v2944_v55, %s4539_s14 }
  0xeb   :  { %v4358_v21 = vld [vmem:[%s8502_s0 + $0x281] sm:$0x10]   ;;  %v2893_v36 = vsel %vm235_vm2, %v4357_v18, %v2889_v25  ;;  %v4383_v44 = vld [vmem:[%s8502_s0 + $0x353] sm:$0x4]   ;;  %v2990_v48 = vsel %vm227_vm0, %v4382_v43, %v4381_v37  ;;  %v4399_v37 = vld [vmem:[%s8502_s0 + $0x19] sm:$0x1]  }
  0xec   :  { %v4359_v26 = vld [vmem:[%s8502_s0 + $0x2a0] sm:$0x20]   ;;  %v2897_v47 = vsel %vm239_vm3, %v4358_v21, %v2893_v36  ;;  %v4384_v49 = vld [vmem:[%s8502_s0 + $0x372] sm:$0x8]   ;;  %v2994_v60 = vsel %vm231_vm1, %v4383_v44, %v2990_v48  ;;  %v4400_v43 = vld [vmem:[%s8502_s0 + $0x38] sm:$0x2]  }
  0xed   :  { %v4360_v27 = vld [vmem:[%s8502_s0 + $0x2bf] sm:$0x40]   ;;  %v4385_v52 = vld [vmem:[%s8502_s0 + $0x391] sm:$0x10]   ;;  %v2901_v57 = vsel %vm243_vm4, %v4359_v26, %v2897_v47  ;;  %v2998_v10 = vsel %vm235_vm2, %v4384_v49, %v2994_v60  ;;  %v3060_v47 = vsel %vm227_vm0, %v4400_v43, %v4399_v37  ;;  %v4401_v48 = vld [vmem:[%s8502_s0 + $0x57] sm:$0x4]  }
  0xee   :  { %v4361_v28 = vld [vmem:[%s8502_s0 + $0x2de] sm:$0x80]   ;;  %v4386_v53 = vld [vmem:[%s8502_s0 + $0x3b0] sm:$0x20]   ;;  %v2905_v8 = vsel %vm247_vm5, %v4360_v27, %v2901_v57  ;;  %v3002_v21 = vsel %vm239_vm3, %v4385_v52, %v2998_v10  ;;  %v7163_v27 = vpop.permute.xlu1 %1476   ;;  %v4402_v49 = vld [vmem:[%s8502_s0 + $0x76] sm:$0x8]   ;;  %v3064_v57 = vsel %vm231_vm1, %v4401_v48, %v3060_v47 }
  0xef   :  { %v4387_v0 = vld [vmem:[%s8502_s0 + $0x3cf] sm:$0x40]   ;;  %v4372_v2 = vld [vmem:[%s8502_s0 + $0x305] sm:$0x1]   ;;  %v2909_v18 = vsel %vm251_vm6, %v4361_v28, %v2905_v8  ;;  %v3006_v28 = vsel %vm243_vm4, %v4386_v53, %v3002_v21  ;;  %v4403_v52 = vld [vmem:[%s8502_s0 + $0x95] sm:$0x10]   ;;  %v3068_v10 = vsel %vm235_vm2, %v4402_v49, %v3064_v57 }
  0xf0   :  { %v4388_v1 = vld [vmem:[%s8502_s0 + $0x3ee] sm:$0x80]   ;;  %v4373_v11 = vld [vmem:[%s8502_s0 + $0x324] sm:$0x2]   ;;  %2910 = vrot.lane.b32.xlu0 %v2909_v18, %s4539_s14  ;;  %v3010_v44 = vsel %vm247_vm5, %v4387_v0, %v3006_v28  ;;  %v4404_v60 = vld [vmem:[%s8502_s0 + $0xb4] sm:$0x20]   ;;  %v3072_v21 = vsel %vm239_vm3, %v4403_v52, %v3068_v10 }
  0xf1   :  { %v4374_v15 = vld [vmem:[%s8502_s0 + $0x343] sm:$0x4]   ;;  %v2955_v22 = vsel %vm227_vm0, %v4373_v11, %v4372_v2  ;;  %v3014_v53 = vsel %vm251_vm6, %v4388_v1, %v3010_v44  ;;  %v4405_v0 = vld [vmem:[%s8502_s0 + $0xd3] sm:$0x40]   ;;  %v7201_v2 = vpop.permute.xlu0 %1441   ;;  %v4390_v11 = vld [vmem:[%s8502_s0 + $0x9] sm:$0x1]  }
  0xf2   :  { %v4375_v17 = vld [vmem:[%s8502_s0 + $0x362] sm:$0x8]   ;;  %v2959_v34 = vsel %vm231_vm1, %v4374_v15, %v2955_v22  ;;  %v4406_v1 = vld [vmem:[%s8502_s0 + $0xf2] sm:$0x80]   ;;  %3015 = vrot.lane.b32.xlu1 %v3014_v53, %s4539_s14  ;;  %v4391_v15 = vld [vmem:[%s8502_s0 + $0x28] sm:$0x2]  }
  0xf3   :  { %v4376_v24 = vld [vmem:[%s8502_s0 + $0x381] sm:$0x10]   ;;  %v2963_v46 = vsel %vm235_vm2, %v4375_v17, %v2959_v34  ;;  %v4392_v17 = vld [vmem:[%s8502_s0 + $0x47] sm:$0x4]   ;;  %v3025_v22 = vsel %vm227_vm0, %v4391_v15, %v4390_v11  ;;  %v3076_v34 = vsel %vm243_vm4, %v4404_v60, %v3072_v21  ;;  %v4417_v44 = vld [vmem:[%s8502_s0 + $0x119] sm:$0x1]  }
  0xf4   :  { %v4377_v25 = vld [vmem:[%s8502_s0 + $0x3a0] sm:$0x20]   ;;  %v2967_v55 = vsel %vm239_vm3, %v4376_v24, %v2963_v46  ;;  %v4393_v24 = vld [vmem:[%s8502_s0 + $0x66] sm:$0x8]   ;;  %v7239_v46 = vpop.permute.xlu1 %1546   ;;  %v3080_v47 = vsel %vm247_vm5, %v4405_v0, %v3076_v34  ;;  %v4418_v49 = vld [vmem:[%s8502_s0 + $0x138] sm:$0x2]  }
  0xf5   :  { %v4378_v26 = vld [vmem:[%s8502_s0 + $0x3bf] sm:$0x40]   ;;  %v2971_v8 = vsel %vm243_vm4, %v4377_v25, %v2967_v55  ;;  %v4394_v25 = vld [vmem:[%s8502_s0 + $0x85] sm:$0x10]   ;;  %v4419_v52 = vld [vmem:[%s8502_s0 + $0x157] sm:$0x4]   ;;  %v3084_v55 = vsel %vm251_vm6, %v4406_v1, %v3080_v47  ;;  %v3130_v60 = vsel %vm227_vm0, %v4418_v49, %v4417_v44  ;;  %v7265_v10 = vpop.permute.xlu0 %1511  }
  0xf6   :  { %v4379_v36 = vld [vmem:[%s8502_s0 + $0x3de] sm:$0x80]   ;;  %v2975_v18 = vsel %vm247_vm5, %v4378_v26, %v2971_v8  ;;  %v4395_v26 = vld [vmem:[%s8502_s0 + $0xa4] sm:$0x20]   ;;  %v4420_v53 = vld [vmem:[%s8502_s0 + $0x176] sm:$0x8]   ;;  %3085 = vrot.lane.b32.xlu1 %v3084_v55, %s4539_s14  ;;  %v3134_v15 = vsel %vm231_vm1, %v4419_v52, %v3130_v60 }
  0xf7   :  { %v2979_v28 = vsel %vm251_vm6, %v4379_v36, %v2975_v18  ;;  %v3029_v36 = vsel %vm231_vm1, %v4392_v17, %v3025_v22  ;;  %v4396_v37 = vld [vmem:[%s8502_s0 + $0xc3] sm:$0x40]   ;;  %v4421_v0 = vld [vmem:[%s8502_s0 + $0x195] sm:$0x10]  }
  0xf8   :  { %v4397_v43 = vld [vmem:[%s8502_s0 + $0xe2] sm:$0x80]   ;;  %2980 = vrot.lane.b32.xlu0 %v2979_v28, %s4539_s14  ;;  %v3033_v48 = vsel %vm235_vm2, %v4393_v24, %v3029_v36  ;;  %v4422_v1 = vld [vmem:[%s8502_s0 + $0x1b4] sm:$0x20]   ;;  %v3138_v24 = vsel %vm235_vm2, %v4420_v53, %v3134_v15  ;;  %v7303_v49 = vpop.permute.xlu1 %1616  }
  0xf9   :  { %v3037_v57 = vsel %vm239_vm3, %v4394_v25, %v3033_v48  ;;  %v4423_v8 = vld [vmem:[%s8502_s0 + $0x1d3] sm:$0x40]   ;;  %v4408_v18 = vld [vmem:[%s8502_s0 + $0x109] sm:$0x1]  }
  0xfa   :  { %v3041_v11 = vsel %vm243_vm4, %v4395_v26, %v3037_v57  ;;  %v4424_v17 = vld [vmem:[%s8502_s0 + $0x1f2] sm:$0x80]   ;;  %v4409_v21 = vld [vmem:[%s8502_s0 + $0x128] sm:$0x2]  }
  0xfb   :  { %v3045_v22 = vsel %vm247_vm5, %v4396_v37, %v3041_v11  ;;  %v3095_v25 = vsel %vm227_vm0, %v4409_v21, %v4408_v18  ;;  %v4410_v26 = vld [vmem:[%s8502_s0 + $0x147] sm:$0x4]   ;;  %v3142_v37 = vsel %vm239_vm3, %v4421_v0, %v3138_v24  ;;  %v4435_v55 = vld [vmem:[%s8502_s0 + $0x219] sm:$0x1]  }
  0xfc   :  { %v4411_v28 = vld [vmem:[%s8502_s0 + $0x166] sm:$0x8]   ;;  %v3049_v36 = vsel %vm251_vm6, %v4397_v43, %v3045_v22  ;;  %v3099_v43 = vsel %vm231_vm1, %v4410_v26, %v3095_v25  ;;  %v3146_v52 = vsel %vm243_vm4, %v4422_v1, %v3142_v37  ;;  %v4436_v57 = vld [vmem:[%s8502_s0 + $0x238] sm:$0x2]  }
  0xfd   :  { %v4412_v34 = vld [vmem:[%s8502_s0 + $0x185] sm:$0x10]   ;;  %3050 = vrot.lane.b32.xlu0 %v3049_v36, %s4539_s14  ;;  %v3103_v53 = vsel %vm235_vm2, %v4411_v28, %v3099_v43  ;;  %v4437_v60 = vld [vmem:[%s8502_s0 + $0x257] sm:$0x4]   ;;  %v3150_v0 = vsel %vm247_vm5, %v4423_v8, %v3146_v52  ;;  %v3200_v8 = vsel %vm227_vm0, %v4436_v57, %v4435_v55  ;;  %v7341_v28 = vpop.permute.xlu0 %1581  }
  0xfe   :  { %v4413_v44 = vld [vmem:[%s8502_s0 + $0x1a4] sm:$0x20]   ;;  %v3107_v1 = vsel %vm239_vm3, %v4412_v34, %v3103_v53  ;;  %v4438_v11 = vld [vmem:[%s8502_s0 + $0x276] sm:$0x8]   ;;  %v3154_v17 = vsel %vm251_vm6, %v4424_v17, %v3150_v0  ;;  %v3204_v22 = vsel %vm231_vm1, %v4437_v60, %v3200_v8  ;;  %v7367_v60 = vpop.permute.xlu1 %1686  }
  0xff   :  { %v4414_v47 = vld [vmem:[%s8502_s0 + $0x1c3] sm:$0x40]   ;;  %v4439_v15 = vld [vmem:[%s8502_s0 + $0x295] sm:$0x10]   ;;  %v3111_v21 = vsel %vm243_vm4, %v4413_v44, %v3107_v1  ;;  %3155 = vrot.lane.b32.xlu1 %v3154_v17, %s4539_s14  ;;  %v3208_v36 = vsel %vm235_vm2, %v4438_v11, %v3204_v22 }
 0x100   :  { %v4415_v48 = vld [vmem:[%s8502_s0 + $0x1e2] sm:$0x80]   ;;  %v4440_v18 = vld [vmem:[%s8502_s0 + $0x2b4] sm:$0x20]   ;;  %v3115_v34 = vsel %vm247_vm5, %v4414_v47, %v3111_v21 }
 0x101   :  { %v4441_v24 = vld [vmem:[%s8502_s0 + $0x2d3] sm:$0x40]   ;;  %v4426_v26 = vld [vmem:[%s8502_s0 + $0x209] sm:$0x1]   ;;  %v3119_v47 = vsel %vm251_vm6, %v4415_v48, %v3115_v34  ;;  %v3212_v48 = vsel %vm239_vm3, %v4439_v15, %v3208_v36 }
 0x102   :  { %v4442_v25 = vld [vmem:[%s8502_s0 + $0x2f2] sm:$0x80]   ;;  %v4427_v37 = vld [vmem:[%s8502_s0 + $0x228] sm:$0x2]   ;;  %3120 = vrot.lane.b32.xlu0 %v3119_v47, %s4539_s14  ;;  %v3216_v0 = vsel %vm243_vm4, %v4440_v18, %v3212_v48  ;;  %v7405_v47 = vpop.permute.xlu0 %1651  }
 0x103   :  { %v4428_v43 = vld [vmem:[%s8502_s0 + $0x247] sm:$0x4]   ;;  %v3165_v52 = vsel %vm227_vm0, %v4427_v37, %v4426_v26  ;;  %v4453_v11 = vld [vmem:[%s8502_s0 + $0x319] sm:$0x1]   ;;  %v3220_v18 = vsel %vm247_vm5, %v4441_v24, %v3216_v0 }
 0x104   :  { %v4429_v44 = vld [vmem:[%s8502_s0 + $0x266] sm:$0x8]   ;;  %v3169_v1 = vsel %vm231_vm1, %v4428_v43, %v3165_v52  ;;  %v4454_v15 = vld [vmem:[%s8502_s0 + $0x338] sm:$0x2]   ;;  %v3224_v25 = vsel %vm251_vm6, %v4442_v25, %v3220_v18 }
 0x105   :  { %v4430_v53 = vld [vmem:[%s8502_s0 + $0x285] sm:$0x10]   ;;  %v3173_v17 = vsel %vm235_vm2, %v4429_v44, %v3169_v1  ;;  %v3270_v21 = vsel %vm227_vm0, %v4454_v15, %v4453_v11  ;;  %v4455_v22 = vld [vmem:[%s8502_s0 + $0x357] sm:$0x4]   ;;  %3225 = vrot.lane.b32.xlu1 %v3224_v25, %s4539_s14  ;;  %v4471_v25 = vld [vmem:[%s8502_s0 + $0x1d] sm:$0x1]  }
 0x106   :  { %v4431_v55 = vld [vmem:[%s8502_s0 + $0x2a4] sm:$0x20]   ;;  %v4456_v24 = vld [vmem:[%s8502_s0 + $0x376] sm:$0x8]   ;;  %v3177_v34 = vsel %vm239_vm3, %v4430_v53, %v3173_v17  ;;  %v3274_v36 = vsel %vm231_vm1, %v4455_v22, %v3270_v21 }
 0x107   :  { %v4432_v57 = vld [vmem:[%s8502_s0 + $0x2c3] sm:$0x40]   ;;  %v4457_v26 = vld [vmem:[%s8502_s0 + $0x395] sm:$0x10]   ;;  %v3181_v48 = vsel %vm243_vm4, %v4431_v55, %v3177_v34  ;;  %v3278_v52 = vsel %vm235_vm2, %v4456_v24, %v3274_v36  ;;  %v7443_v34 = vpop.permute.xlu1 %1756  }
 0x108   :  { %v4433_v8 = vld [vmem:[%s8502_s0 + $0x2e2] sm:$0x80]   ;;  %v4458_v37 = vld [vmem:[%s8502_s0 + $0x3b4] sm:$0x20]   ;;  %v3185_v57 = vsel %vm247_vm5, %v4432_v57, %v3181_v48  ;;  %v3282_v1 = vsel %vm239_vm3, %v4457_v26, %v3278_v52  ;;  %v4473_v48 = vld [vmem:[%s8502_s0 + $0x5b] sm:$0x4]  }
 0x109   :  { %v4459_v43 = vld [vmem:[%s8502_s0 + $0x3d3] sm:$0x40]   ;;  %v4444_v53 = vld [vmem:[%s8502_s0 + $0x309] sm:$0x1]   ;;  %v3189_v8 = vsel %vm251_vm6, %v4433_v8, %v3185_v57  ;;  %v3286_v21 = vsel %vm243_vm4, %v4458_v37, %v3282_v1  ;;  %v4474_v52 = vld [vmem:[%s8502_s0 + $0x7a] sm:$0x8]  }
 0x10a   :  { %v4460_v44 = vld [vmem:[%s8502_s0 + $0x3f2] sm:$0x80]   ;;  %v4445_v55 = vld [vmem:[%s8502_s0 + $0x328] sm:$0x2]   ;;  %3190 = vrot.lane.b32.xlu0 %v3189_v8, %s4539_s14  ;;  %v3290_v36 = vsel %vm247_vm5, %v4459_v43, %v3286_v21  ;;  %v4472_v43 = vld [vmem:[%s8502_s0 + $0x3c] sm:$0x2]  }
 0x10b   :  { %v4446_v0 = vld [vmem:[%s8502_s0 + $0x347] sm:$0x4]   ;;  %v3235_v11 = vsel %vm227_vm0, %v4445_v55, %v4444_v53  ;;  %v3294_v44 = vsel %vm251_vm6, %v4460_v44, %v3290_v36  ;;  %v3340_v55 = vsel %vm227_vm0, %v4472_v43, %v4471_v25  ;;  %v4476_v57 = vld [vmem:[%s8502_s0 + $0xb8] sm:$0x20]   ;;  %v4462_v8 = vld [vmem:[%s8502_s0 + $0xd] sm:$0x1]  }
 0x10c   :  { %v4447_v15 = vld [vmem:[%s8502_s0 + $0x366] sm:$0x8]   ;;  %v3239_v22 = vsel %vm231_vm1, %v4446_v0, %v3235_v11  ;;  %v4475_v0 = vld [vmem:[%s8502_s0 + $0x99] sm:$0x10]   ;;  %v7469_v11 = vpop.permute.xlu0 %1721   ;;  %3295 = vrot.lane.b32.xlu1 %v3294_v44, %s4539_s14  ;;  %v4463_v21 = vld [vmem:[%s8502_s0 + $0x2c] sm:$0x2]  }
 0x10d   :  { %v4448_v18 = vld [vmem:[%s8502_s0 + $0x385] sm:$0x10]   ;;  %v3243_v37 = vsel %vm235_vm2, %v4447_v15, %v3239_v22  ;;  %v4477_v1 = vld [vmem:[%s8502_s0 + $0xd7] sm:$0x40]   ;;  %v3305_v25 = vsel %vm227_vm0, %v4463_v21, %v4462_v8  ;;  %v4464_v36 = vld [vmem:[%s8502_s0 + $0x4b] sm:$0x4]  }
 0x10e   :  { %v4449_v17 = vld [vmem:[%s8502_s0 + $0x3a4] sm:$0x20]   ;;  %v3247_v53 = vsel %vm239_vm3, %v4448_v18, %v3243_v37  ;;  %v3344_v18 = vsel %vm231_vm1, %v4473_v48, %v3340_v55  ;;  %v4465_v37 = vld [vmem:[%s8502_s0 + $0x6a] sm:$0x8]   ;;  %v3580_v8 = vld [vmem:[%s8502_s0 + $0x20] ss:$4 sm:$0xff]  }
 0x10f   :  { %v4450_v24 = vld [vmem:[%s8502_s0 + $0x3c3] sm:$0x40]   ;;  %v3251_v15 = vsel %vm243_vm4, %v4449_v17, %v3247_v53  ;;  %v4478_v17 = vld [vmem:[%s8502_s0 + $0xf6] sm:$0x80]   ;;  %v4466_v43 = vld [vmem:[%s8502_s0 + $0x89] sm:$0x10]  }
 0x110   :  { %v4451_v26 = vld [vmem:[%s8502_s0 + $0x3e2] sm:$0x80]   ;;  %v3255_v22 = vsel %vm247_vm5, %v4450_v24, %v3251_v15  ;;  %v3348_v24 = vsel %vm235_vm2, %v4474_v52, %v3344_v18  ;;  %v3309_v52 = vsel %vm231_vm1, %v4464_v36, %v3305_v25  ;;  %v4467_v44 = vld [vmem:[%s8502_s0 + $0xa8] sm:$0x20]   ;;  %v2_v18 = vld [vmem:[%s8502_s0] ss:$4 sm:$0xff]  }
 0x111   :  { %v3259_v26 = vsel %vm251_vm6, %v4451_v26, %v3255_v22  ;;  %v3352_v48 = vsel %vm239_vm3, %v4475_v0, %v3348_v24  ;;  %v4468_v53 = vld [vmem:[%s8502_s0 + $0xc7] sm:$0x40]   ;;  %v7507_v0 = vpop.permute.xlu1 %1826   ;;  %v3313_v15 = vsel %vm235_vm2, %v4465_v37, %v3309_v52  ;;  %5 = vst.msk [vmem:[%s8503_s1] ss:$8 sm:$0xf0] %vm3_vm7, %v2_v18  }
 0x112   :  { %v4469_v55 = vld [vmem:[%s8502_s0 + $0xe6] sm:$0x80]   ;;  %3260 = vrot.lane.b32.xlu0 %v3259_v26, %s4539_s14  ;;  %v3356_v57 = vsel %vm243_vm4, %v4476_v57, %v3352_v48  ;;  %v3317_v21 = vsel %vm239_vm3, %v4466_v43, %v3313_v15  ;;  %3582 = vst.msk [vmem:[%s8503_s1 + $0x1] ss:$8 sm:$0xf0] %vm3_vm7, %v3580_v8   ;;  %v7580_v48 = vpop.permute.xlu0 %1791  }
 0x113   :  { %v3360_v1 = vsel %vm247_vm5, %v4477_v1, %v3356_v57  ;;  %v3583_v22 = vld [vmem:[%s8502_s0 + $0x40] ss:$4 sm:$0xff]   ;;  %4 = vst.msk [vmem:[%s8503_s1] ss:$8 sm:$0xf] %vm3_vm7, %v2_v18   ;;  %v3321_v36 = vsel %vm243_vm4, %v4467_v44, %v3317_v21 }
 0x114   :  { %v3586_v24 = vld [vmem:[%s8502_s0 + $0x60] ss:$4 sm:$0xff]   ;;  %3581 = vst.msk [vmem:[%s8503_s1 + $0x1] ss:$8 sm:$0xf] %vm3_vm7, %v3580_v8   ;;  %v3364_v17 = vsel %vm251_vm6, %v4478_v17, %v3360_v1  ;;  %v3325_v52 = vsel %vm247_vm5, %v4468_v53, %v3321_v36 }
 0x115   :  { %v3589_v25 = vld [vmem:[%s8502_s0 + $0x80] ss:$4 sm:$0xff]   ;;  %3585 = vst.msk [vmem:[%s8503_s1 + $0x2] ss:$8 sm:$0xf0] %vm3_vm7, %v3583_v22   ;;  %3365 = vrot.lane.b32.xlu1 %v3364_v17, %s4539_s14  ;;  %v3329_v55 = vsel %vm251_vm6, %v4469_v55, %v3325_v52 }
 0x116   :  { %3588 = vst.msk [vmem:[%s8503_s1 + $0x3] ss:$8 sm:$0xf0] %vm3_vm7, %v3586_v24   ;;  %3591 = vst.msk [vmem:[%s8503_s1 + $0x4] ss:$8 sm:$0xf0] %vm3_vm7, %v3589_v25   ;;  %3330 = vrot.lane.b32.xlu0 %v3329_v55, %s4539_s14 }
 0x117   :  { %v3592_v37 = vld [vmem:[%s8502_s0 + $0xa0] ss:$4 sm:$0xff]   ;;  %3584 = vst.msk [vmem:[%s8503_s1 + $0x2] ss:$8 sm:$0xf] %vm3_vm7, %v3583_v22  }
 0x118   :  { %v3595_v43 = vld [vmem:[%s8502_s0 + $0xc0] ss:$4 sm:$0xff]   ;;  %3587 = vst.msk [vmem:[%s8503_s1 + $0x3] ss:$8 sm:$0xf] %vm3_vm7, %v3586_v24   ;;  %v7722_v24 = vpop.permute.xlu0 %1861  }
 0x119   :  { %v3598_v26 = vld [vmem:[%s8502_s0 + $0xe0] ss:$4 sm:$0xff]   ;;  %3590 = vst.msk [vmem:[%s8503_s1 + $0x4] ss:$8 sm:$0xf] %vm3_vm7, %v3589_v25  }
 0x11a   :  { %3594 = vst.msk [vmem:[%s8503_s1 + $0x5] ss:$8 sm:$0xf0] %vm3_vm7, %v3592_v37   ;;  %3597 = vst.msk [vmem:[%s8503_s1 + $0x6] ss:$8 sm:$0xf0] %vm3_vm7, %v3595_v43  }
 0x11b   :  { %3600 = vst.msk [vmem:[%s8503_s1 + $0x7] ss:$8 sm:$0xf0] %vm3_vm7, %v3598_v26   ;;  %3593 = vst.msk [vmem:[%s8503_s1 + $0x5] ss:$8 sm:$0xf] %vm3_vm7, %v3592_v37  }
 0x11c   :  { %3596 = vst.msk [vmem:[%s8503_s1 + $0x6] ss:$8 sm:$0xf] %vm3_vm7, %v3595_v43   ;;  %3599 = vst.msk [vmem:[%s8503_s1 + $0x7] ss:$8 sm:$0xf] %vm3_vm7, %v3598_v26  }
 0x11d   :  { %v4489_v44 = vld [vmem:[%s8502_s0 + $0x11d] sm:$0x1]   ;;  %3689 = vst.msk [vmem:[%s8503_s1 + $0x20] sm:$0xff] %vm255_vm8, %v6121_v29   ;;  %3761 = vst.msk [vmem:[%s8503_s1 + $0x28] sm:$0xff] %vm255_vm8, %v6287_v50   ;;  %v4483_v15 = vld [vmem:[%s8502_s0 + $0x16a] sm:$0x8]  }
 0x11e   :  { %v4490_v53 = vld [vmem:[%s8502_s0 + $0x13c] sm:$0x2]   ;;  %3833 = vst.msk [vmem:[%s8503_s1 + $0x30] sm:$0xff] %vm255_vm8, %v6555_v9   ;;  %3905 = vst.msk [vmem:[%s8503_s1 + $0x38] sm:$0xff] %vm255_vm8, %v6831_v3   ;;  %v7668_v9 = vpop.permute.xlu1 %1896   ;;  %v4484_v1 = vld [vmem:[%s8502_s0 + $0x189] sm:$0x10]  }
 0x11f   :  { %v4491_v57 = vld [vmem:[%s8502_s0 + $0x15b] sm:$0x4]   ;;  %256 = vst.msk [vmem:[%s8503_s1] sm:$0xff] %vm255_vm8, %v6045_v58   ;;  %3752 = vst.msk [vmem:[%s8503_s1 + $0x8] sm:$0xff] %vm255_vm8, %v6325_v5   ;;  %v3410_v58 = vsel %vm227_vm0, %v4490_v53, %v4489_v44  ;;  %v4485_v21 = vld [vmem:[%s8502_s0 + $0x1a8] sm:$0x20]  }
 0x120   :  { %3824 = vst.msk [vmem:[%s8503_s1 + $0x10] sm:$0xff] %vm255_vm8, %v6593_v33   ;;  %3896 = vst.msk [vmem:[%s8503_s1 + $0x18] sm:$0xff] %vm255_vm8, %v6857_v23   ;;  %v4492_v29 = vld [vmem:[%s8502_s0 + $0x17a] sm:$0x8]   ;;  %v3414_v33 = vsel %vm231_vm1, %v4491_v57, %v3410_v58  ;;  %v4486_v22 = vld [vmem:[%s8502_s0 + $0x1c7] sm:$0x40]  }
 0x121   :  { %v4493_v50 = vld [vmem:[%s8502_s0 + $0x199] sm:$0x10]   ;;  %3976 = vst.msk [vmem:[%s8503_s1 + $0x20] sm:$0xff] %vm1374_vm9, %v7099_v31   ;;  %1375 = vst.msk [vmem:[%s8503_s1] sm:$0xff] %vm1374_vm9, %v7137_v4   ;;  %v4480_v31 = vld [vmem:[%s8502_s0 + $0x10d] sm:$0x1]   ;;  %v3418_v4 = vsel %vm235_vm2, %v4492_v29, %v3414_v33 }
 0x122   :  { %v4494_v5 = vld [vmem:[%s8502_s0 + $0x1b8] sm:$0x20]   ;;  %4048 = vst.msk [vmem:[%s8503_s1 + $0x28] sm:$0xff] %vm1374_vm9, %v7367_v60   ;;  %4039 = vst.msk [vmem:[%s8503_s1 + $0x8] sm:$0xff] %vm1374_vm9, %v7405_v47   ;;  %v4481_v60 = vld [vmem:[%s8502_s0 + $0x12c] sm:$0x2]   ;;  %v3422_v18 = vsel %vm239_vm3, %v4493_v50, %v3418_v4  ;;  %v1967_v33 = vpop.permute.xlu1 %1966  }
 0x123   :  { %v4495_v3 = vld [vmem:[%s8502_s0 + $0x1d7] sm:$0x40]   ;;  %v4482_v47 = vld [vmem:[%s8502_s0 + $0x14b] sm:$0x4]   ;;  %v3375_v8 = vsel %vm227_vm0, %v4481_v60, %v4480_v31  ;;  %v3426_v25 = vsel %vm243_vm4, %v4494_v5, %v3422_v18  ;;  %v3601_v37 = vld [vmem:[%s8502_s0 + $0x100] ss:$4 sm:$0xff]  }
 0x124   :  { %v4496_v23 = vld [vmem:[%s8502_s0 + $0x1f6] sm:$0x80]   ;;  %v3379_v17 = vsel %vm231_vm1, %v4482_v47, %v3375_v8  ;;  %v4487_v36 = vld [vmem:[%s8502_s0 + $0x1e6] sm:$0x80]   ;;  %v3604_v43 = vld [vmem:[%s8502_s0 + $0x120] ss:$4 sm:$0xff]   ;;  %v3430_v26 = vsel %vm247_vm5, %v4495_v3, %v3426_v25 }
 0x125   :  { %v3383_v52 = vsel %vm235_vm2, %v4483_v15, %v3379_v17  ;;  %3603 = vst.msk [vmem:[%s8503_s1 + $0x40] ss:$8 sm:$0xf0] %vm3_vm7, %v3601_v37   ;;  %3606 = vst.msk [vmem:[%s8503_s1 + $0x41] ss:$8 sm:$0xf0] %vm3_vm7, %v3604_v43   ;;  %v3434_v55 = vsel %vm251_vm6, %v4496_v23, %v3430_v26 }
 0x126   :  { %v3607_v44 = vld [vmem:[%s8502_s0 + $0x140] ss:$4 sm:$0xff]   ;;  %3602 = vst.msk [vmem:[%s8503_s1 + $0x40] ss:$8 sm:$0xf] %vm3_vm7, %v3601_v37   ;;  %v3387_v58 = vsel %vm239_vm3, %v4484_v1, %v3383_v52  ;;  %3435 = vrot.lane.b32.xlu1 %v3434_v55, %s4539_s14  ;;  %v2037_v25 = vpop.permute.xlu1 %2036  }
 0x127   :  { %v3610_v53 = vld [vmem:[%s8502_s0 + $0x160] ss:$4 sm:$0xff]   ;;  %3605 = vst.msk [vmem:[%s8503_s1 + $0x41] ss:$8 sm:$0xf] %vm3_vm7, %v3604_v43   ;;  %v3391_v3 = vsel %vm243_vm4, %v4485_v21, %v3387_v58 }
 0x128   :  { %v3613_v57 = vld [vmem:[%s8502_s0 + $0x180] ss:$4 sm:$0xff]   ;;  %3609 = vst.msk [vmem:[%s8503_s1 + $0x42] ss:$8 sm:$0xf0] %vm3_vm7, %v3607_v44   ;;  %v3395_v60 = vsel %vm247_vm5, %v4486_v22, %v3391_v3 }
 0x129   :  { %3612 = vst.msk [vmem:[%s8503_s1 + $0x43] ss:$8 sm:$0xf0] %vm3_vm7, %v3610_v53   ;;  %3615 = vst.msk [vmem:[%s8503_s1 + $0x44] ss:$8 sm:$0xf0] %vm3_vm7, %v3613_v57  }
 0x12a   :  { %v3616_v29 = vld [vmem:[%s8502_s0 + $0x1a0] ss:$4 sm:$0xff]   ;;  %3608 = vst.msk [vmem:[%s8503_s1 + $0x42] ss:$8 sm:$0xf] %vm3_vm7, %v3607_v44  }
 0x12b   :  { %v3619_v50 = vld [vmem:[%s8502_s0 + $0x1c0] ss:$4 sm:$0xff]   ;;  %3611 = vst.msk [vmem:[%s8503_s1 + $0x43] ss:$8 sm:$0xf] %vm3_vm7, %v3610_v53  }
 0x12c   :  { %v3622_v5 = vld [vmem:[%s8502_s0 + $0x1e0] ss:$4 sm:$0xff]   ;;  %3614 = vst.msk [vmem:[%s8503_s1 + $0x44] ss:$8 sm:$0xf] %vm3_vm7, %v3613_v57  }
 0x12d   :  { %3618 = vst.msk [vmem:[%s8503_s1 + $0x45] ss:$8 sm:$0xf0] %vm3_vm7, %v3616_v29   ;;  %3621 = vst.msk [vmem:[%s8503_s1 + $0x46] ss:$8 sm:$0xf0] %vm3_vm7, %v3619_v50  }
 0x12e   :  { %3624 = vst.msk [vmem:[%s8503_s1 + $0x47] ss:$8 sm:$0xf0] %vm3_vm7, %v3622_v5   ;;  %3617 = vst.msk [vmem:[%s8503_s1 + $0x45] ss:$8 sm:$0xf] %vm3_vm7, %v3616_v29  }
 0x12f   :  { %3620 = vst.msk [vmem:[%s8503_s1 + $0x46] ss:$8 sm:$0xf] %vm3_vm7, %v3619_v50   ;;  %3623 = vst.msk [vmem:[%s8503_s1 + $0x47] ss:$8 sm:$0xf] %vm3_vm7, %v3622_v5  }
 0x130   :  { %v4507_v23 = vld [vmem:[%s8502_s0 + $0x21d] sm:$0x1]   ;;  %4120 = vst.msk [vmem:[%s8503_s1 + $0x30] sm:$0xff] %vm1374_vm9, %v1967_v33   ;;  %v4500_v47 = vld [vmem:[%s8502_s0 + $0x24b] sm:$0x4]  }
 0x131   :  { %v4508_v31 = vld [vmem:[%s8502_s0 + $0x23c] sm:$0x2]   ;;  %3707 = vst.msk [vmem:[%s8503_s1 + $0x60] sm:$0xff] %vm255_vm8, %v6083_v12   ;;  %3779 = vst.msk [vmem:[%s8503_s1 + $0x68] sm:$0xff] %vm255_vm8, %v6351_v20   ;;  %v4501_v15 = vld [vmem:[%s8502_s0 + $0x26a] sm:$0x8]  }
 0x132   :  { %v4509_v4 = vld [vmem:[%s8502_s0 + $0x25b] sm:$0x4]   ;;  %3851 = vst.msk [vmem:[%s8503_s1 + $0x70] sm:$0xff] %vm255_vm8, %v6628_v54   ;;  %3923 = vst.msk [vmem:[%s8503_s1 + $0x78] sm:$0xff] %vm255_vm8, %v6895_v51   ;;  %v1932_v54 = vpop.permute.xlu0 %1931   ;;  %v4502_v1 = vld [vmem:[%s8502_s0 + $0x289] sm:$0x10]  }
 0x133   :  { %3698 = vst.msk [vmem:[%s8503_s1 + $0x40] sm:$0xff] %vm255_vm8, %v6019_v45   ;;  %3770 = vst.msk [vmem:[%s8503_s1 + $0x48] sm:$0xff] %vm255_vm8, %v6389_v40   ;;  %v3480_v45 = vsel %vm227_vm0, %v4508_v31, %v4507_v23  ;;  %v4510_v12 = vld [vmem:[%s8502_s0 + $0x27a] sm:$0x8]   ;;  %v4503_v21 = vld [vmem:[%s8502_s0 + $0x2a8] sm:$0x20]  }
 0x134   :  { %3842 = vst.msk [vmem:[%s8503_s1 + $0x50] sm:$0xff] %vm255_vm8, %v6653_v7   ;;  %3914 = vst.msk [vmem:[%s8503_s1 + $0x58] sm:$0xff] %vm255_vm8, %v6933_v19   ;;  %v4511_v20 = vld [vmem:[%s8502_s0 + $0x299] sm:$0x10]   ;;  %v3399_v7 = vsel %vm251_vm6, %v4487_v36, %v3395_v60  ;;  %v3484_v51 = vsel %vm231_vm1, %v4509_v4, %v3480_v45  ;;  %v4504_v22 = vld [vmem:[%s8502_s0 + $0x2c7] sm:$0x40]  }
 0x135   :  { %v4512_v40 = vld [vmem:[%s8502_s0 + $0x2b8] sm:$0x20]   ;;  %3994 = vst.msk [vmem:[%s8503_s1 + $0x60] sm:$0xff] %vm1374_vm9, %v7163_v27   ;;  %3985 = vst.msk [vmem:[%s8503_s1 + $0x40] sm:$0xff] %vm1374_vm9, %v7201_v2   ;;  %v4498_v2 = vld [vmem:[%s8502_s0 + $0x20d] sm:$0x1]  }
 0x136   :  { %v4513_v19 = vld [vmem:[%s8502_s0 + $0x2d7] sm:$0x40]   ;;  %4066 = vst.msk [vmem:[%s8503_s1 + $0x68] sm:$0xff] %vm1374_vm9, %v7443_v34   ;;  %4057 = vst.msk [vmem:[%s8503_s1 + $0x48] sm:$0xff] %vm1374_vm9, %v7469_v11   ;;  %3400 = vrot.lane.b32.xlu0 %v3399_v7, %s4539_s14  ;;  %v3488_v34 = vsel %vm235_vm2, %v4510_v12, %v3484_v51  ;;  %v2002_v3 = vpop.permute.xlu0 %2001  }
 0x137   :  { %v4514_v27 = vld [vmem:[%s8502_s0 + $0x2f6] sm:$0x80]   ;;  %4111 = vst.msk [vmem:[%s8503_s1 + $0x10] sm:$0xff] %vm1374_vm9, %v1932_v54   ;;  %v4499_v11 = vld [vmem:[%s8502_s0 + $0x22c] sm:$0x2]   ;;  %v3492_v18 = vsel %vm239_vm3, %v4511_v20, %v3488_v34  ;;  %4138 = vst.msk [vmem:[%s8503_s1 + $0x70] sm:$0xff] %vm1374_vm9, %v2037_v25  }
 0x138   :  { %v3445_v8 = vsel %vm227_vm0, %v4499_v11, %v4498_v2  ;;  %v3496_v17 = vsel %vm243_vm4, %v4512_v40, %v3492_v18  ;;  %v4505_v37 = vld [vmem:[%s8502_s0 + $0x2e6] sm:$0x80]   ;;  %v3625_v43 = vld [vmem:[%s8502_s0 + $0x200] ss:$4 sm:$0xff]   ;;  %v4525_v31 = vld [vmem:[%s8502_s0 + $0x31d] sm:$0x1]  }
 0x139   :  { %v3449_v36 = vsel %vm231_vm1, %v4500_v47, %v3445_v8  ;;  %v3628_v26 = vld [vmem:[%s8502_s0 + $0x220] ss:$4 sm:$0xff]   ;;  %v3500_v52 = vsel %vm247_vm5, %v4513_v19, %v3496_v17  ;;  %3627 = vst.msk [vmem:[%s8503_s1 + $0x80] ss:$8 sm:$0xf0] %vm3_vm7, %v3625_v43  }
 0x13a   :  { %v3453_v44 = vsel %vm235_vm2, %v4501_v15, %v3449_v36  ;;  %3630 = vst.msk [vmem:[%s8503_s1 + $0x81] ss:$8 sm:$0xf0] %vm3_vm7, %v3628_v26   ;;  %v3631_v53 = vld [vmem:[%s8502_s0 + $0x240] ss:$4 sm:$0xff]   ;;  %v3504_v58 = vsel %vm251_vm6, %v4514_v27, %v3500_v52  ;;  %v2072_v27 = vpop.permute.xlu0 %2071  }
 0x13b   :  { %v3634_v57 = vld [vmem:[%s8502_s0 + $0x260] ss:$4 sm:$0xff]   ;;  %3626 = vst.msk [vmem:[%s8503_s1 + $0x80] ss:$8 sm:$0xf] %vm3_vm7, %v3625_v43   ;;  %v3457_v29 = vsel %vm239_vm3, %v4502_v1, %v3453_v44  ;;  %3505 = vrot.lane.b32.xlu1 %v3504_v58, %s4539_s14 }
 0x13c   :  { %v3637_v55 = vld [vmem:[%s8502_s0 + $0x280] ss:$4 sm:$0xff]   ;;  %3629 = vst.msk [vmem:[%s8503_s1 + $0x81] ss:$8 sm:$0xf] %vm3_vm7, %v3628_v26   ;;  %v3461_v23 = vsel %vm243_vm4, %v4503_v21, %v3457_v29 }
 0x13d   :  { %3633 = vst.msk [vmem:[%s8503_s1 + $0x82] ss:$8 sm:$0xf0] %vm3_vm7, %v3631_v53   ;;  %3636 = vst.msk [vmem:[%s8503_s1 + $0x83] ss:$8 sm:$0xf0] %vm3_vm7, %v3634_v57   ;;  %v3465_v45 = vsel %vm247_vm5, %v4504_v22, %v3461_v23 }
 0x13e   :  { %3639 = vst.msk [vmem:[%s8503_s1 + $0x84] ss:$8 sm:$0xf0] %vm3_vm7, %v3637_v55   ;;  %v3640_v50 = vld [vmem:[%s8502_s0 + $0x2a0] ss:$4 sm:$0xff]  }
 0x13f   :  { %v3643_v5 = vld [vmem:[%s8502_s0 + $0x2c0] ss:$4 sm:$0xff]   ;;  %3632 = vst.msk [vmem:[%s8503_s1 + $0x82] ss:$8 sm:$0xf] %vm3_vm7, %v3631_v53  }
 0x140   :  { %v3646_v33 = vld [vmem:[%s8502_s0 + $0x2e0] ss:$4 sm:$0xff]   ;;  %3635 = vst.msk [vmem:[%s8503_s1 + $0x83] ss:$8 sm:$0xf] %vm3_vm7, %v3634_v57  }
 0x141   :  { %3638 = vst.msk [vmem:[%s8503_s1 + $0x84] ss:$8 sm:$0xf] %vm3_vm7, %v3637_v55   ;;  %3642 = vst.msk [vmem:[%s8503_s1 + $0x85] ss:$8 sm:$0xf0] %vm3_vm7, %v3640_v50  }
 0x142   :  { %3645 = vst.msk [vmem:[%s8503_s1 + $0x86] ss:$8 sm:$0xf0] %vm3_vm7, %v3643_v5   ;;  %3648 = vst.msk [vmem:[%s8503_s1 + $0x87] ss:$8 sm:$0xf0] %vm3_vm7, %v3646_v33  }
 0x143   :  { %3641 = vst.msk [vmem:[%s8503_s1 + $0x85] ss:$8 sm:$0xf] %vm3_vm7, %v3640_v50   ;;  %3644 = vst.msk [vmem:[%s8503_s1 + $0x86] ss:$8 sm:$0xf] %vm3_vm7, %v3643_v5  }
 0x144   :  { %3647 = vst.msk [vmem:[%s8503_s1 + $0x87] ss:$8 sm:$0xf] %vm3_vm7, %v3646_v33   ;;  %v4526_v4 = vld [vmem:[%s8502_s0 + $0x33c] sm:$0x2]  }
 0x145   :  { %v4527_v60 = vld [vmem:[%s8502_s0 + $0x35b] sm:$0x4]   ;;  %4129 = vst.msk [vmem:[%s8503_s1 + $0x50] sm:$0xff] %vm1374_vm9, %v2002_v3   ;;  %v4518_v12 = vld [vmem:[%s8502_s0 + $0x34b] sm:$0x4]  }
 0x146   :  { %3725 = vst.msk [vmem:[%s8503_s1 + $0xa0] sm:$0xff] %vm255_vm8, %v6147_v42   ;;  %3797 = vst.msk [vmem:[%s8503_s1 + $0xa8] sm:$0xff] %vm255_vm8, %v6427_v61   ;;  %v3550_v42 = vsel %vm227_vm0, %v4526_v4, %v4525_v31  ;;  %v4529_v61 = vld [vmem:[%s8502_s0 + $0x399] sm:$0x10]   ;;  %v4519_v20 = vld [vmem:[%s8502_s0 + $0x36a] sm:$0x8]  }
 0x147   :  { %3869 = vst.msk [vmem:[%s8503_s1 + $0xb0] sm:$0xff] %vm255_vm8, %v6691_v32   ;;  %3941 = vst.msk [vmem:[%s8503_s1 + $0xb8] sm:$0xff] %vm255_vm8, %v6959_v38   ;;  %v2107_v32 = vpop.permute.xlu1 %2106   ;;  %v3554_v38 = vsel %vm231_vm1, %v4527_v60, %v3550_v42  ;;  %v4520_v7 = vld [vmem:[%s8502_s0 + $0x389] sm:$0x10]   ;;  %v3649_v47 = vld [vmem:[%s8502_s0 + $0x300] ss:$4 sm:$0xff]  }
 0x148   :  { %3716 = vst.msk [vmem:[%s8503_s1 + $0x80] sm:$0xff] %vm255_vm8, %v6185_v62   ;;  %3788 = vst.msk [vmem:[%s8503_s1 + $0x88] sm:$0xff] %vm255_vm8, %v6453_v13   ;;  %v4528_v62 = vld [vmem:[%s8502_s0 + $0x37a] sm:$0x8]   ;;  %v4521_v51 = vld [vmem:[%s8502_s0 + $0x3a8] sm:$0x20]  }
 0x149   :  { %3860 = vst.msk [vmem:[%s8503_s1 + $0x90] sm:$0xff] %vm255_vm8, %v6729_v59   ;;  %3932 = vst.msk [vmem:[%s8503_s1 + $0x98] sm:$0xff] %vm255_vm8, %v6997_v6   ;;  %v4530_v13 = vld [vmem:[%s8502_s0 + $0x3b8] sm:$0x20]   ;;  %v3469_v59 = vsel %vm251_vm6, %v4505_v37, %v3465_v45  ;;  %v4522_v19 = vld [vmem:[%s8502_s0 + $0x3c7] sm:$0x40]  }
 0x14a   :  { %4012 = vst.msk [vmem:[%s8503_s1 + $0xa0] sm:$0xff] %vm1374_vm9, %v7239_v46   ;;  %4003 = vst.msk [vmem:[%s8503_s1 + $0x80] sm:$0xff] %vm1374_vm9, %v7265_v10   ;;  %v4531_v6 = vld [vmem:[%s8502_s0 + $0x3d7] sm:$0x40]   ;;  %v4516_v10 = vld [vmem:[%s8502_s0 + $0x30d] sm:$0x1]  }
 0x14b   :  { %v4532_v46 = vld [vmem:[%s8502_s0 + $0x3f6] sm:$0x80]   ;;  %4084 = vst.msk [vmem:[%s8503_s1 + $0xa8] sm:$0xff] %vm1374_vm9, %v7507_v0   ;;  %4075 = vst.msk [vmem:[%s8503_s1 + $0x88] sm:$0xff] %vm1374_vm9, %v7580_v48   ;;  %3470 = vrot.lane.b32.xlu0 %v3469_v59, %s4539_s14  ;;  %v3558_v0 = vsel %vm235_vm2, %v4528_v62, %v3554_v38  ;;  %v2177_v26 = vpop.permute.xlu1 %2176  }
 0x14c   :  { %4156 = vst.msk [vmem:[%s8503_s1 + $0xb0] sm:$0xff] %vm1374_vm9, %v2107_v32   ;;  %v4517_v48 = vld [vmem:[%s8502_s0 + $0x32c] sm:$0x2]   ;;  %v3562_v40 = vsel %vm239_vm3, %v4529_v61, %v3558_v0  ;;  %v3652_v15 = vld [vmem:[%s8502_s0 + $0x320] ss:$4 sm:$0xff]   ;;  %4147 = vst.msk [vmem:[%s8503_s1 + $0x90] sm:$0xff] %vm1374_vm9, %v2072_v27  }
 0x14d   :  { %v3515_v54 = vsel %vm227_vm0, %v4517_v48, %v4516_v10  ;;  %v3566_v2 = vsel %vm243_vm4, %v4530_v13, %v3562_v40  ;;  %v4523_v11 = vld [vmem:[%s8502_s0 + $0x3e6] sm:$0x80]   ;;  %3651 = vst.msk [vmem:[%s8503_s1 + $0xc0] ss:$8 sm:$0xf0] %vm3_vm7, %v3649_v47  }
 0x14e   :  { %v3519_v34 = vsel %vm231_vm1, %v4518_v12, %v3515_v54  ;;  %v3570_v18 = vsel %vm247_vm5, %v4531_v6, %v3566_v2  ;;  %3654 = vst.msk [vmem:[%s8503_s1 + $0xc1] ss:$8 sm:$0xf0] %vm3_vm7, %v3652_v15   ;;  %v3655_v1 = vld [vmem:[%s8502_s0 + $0x340] ss:$4 sm:$0xff]  }
 0x14f   :  { %v3523_v8 = vsel %vm235_vm2, %v4519_v20, %v3519_v34  ;;  %v3658_v21 = vld [vmem:[%s8502_s0 + $0x360] ss:$4 sm:$0xff]   ;;  %3650 = vst.msk [vmem:[%s8503_s1 + $0xc0] ss:$8 sm:$0xf] %vm3_vm7, %v3649_v47   ;;  %v3574_v25 = vsel %vm251_vm6, %v4532_v46, %v3570_v18 }
 0x150   :  { %v3661_v22 = vld [vmem:[%s8502_s0 + $0x380] ss:$4 sm:$0xff]   ;;  %3653 = vst.msk [vmem:[%s8503_s1 + $0xc1] ss:$8 sm:$0xf] %vm3_vm7, %v3652_v15   ;;  %v3527_v17 = vsel %vm239_vm3, %v4520_v7, %v3523_v8  ;;  %3575 = vrot.lane.b32.xlu1 %v3574_v25, %s4539_s14 }
 0x151   :  { %3657 = vst.msk [vmem:[%s8503_s1 + $0xc2] ss:$8 sm:$0xf0] %vm3_vm7, %v3655_v1   ;;  %3660 = vst.msk [vmem:[%s8503_s1 + $0xc3] ss:$8 sm:$0xf0] %vm3_vm7, %v3658_v21   ;;  %v3531_v52 = vsel %vm243_vm4, %v4521_v51, %v3527_v17 }
 0x152   :  { %3663 = vst.msk [vmem:[%s8503_s1 + $0xc4] ss:$8 sm:$0xf0] %vm3_vm7, %v3661_v22   ;;  %v3664_v36 = vld [vmem:[%s8502_s0 + $0x3a0] ss:$4 sm:$0xff]   ;;  %v3535_v44 = vsel %vm247_vm5, %v4522_v19, %v3531_v52 }
 0x153   :  { %v3667_v37 = vld [vmem:[%s8502_s0 + $0x3c0] ss:$4 sm:$0xff]   ;;  %3656 = vst.msk [vmem:[%s8503_s1 + $0xc2] ss:$8 sm:$0xf] %vm3_vm7, %v3655_v1  }
 0x154   :  { %v3670_v43 = vld [vmem:[%s8502_s0 + $0x3e0] ss:$4 sm:$0xff]   ;;  %3659 = vst.msk [vmem:[%s8503_s1 + $0xc3] ss:$8 sm:$0xf] %vm3_vm7, %v3658_v21  }
 0x155   :  { %3662 = vst.msk [vmem:[%s8503_s1 + $0xc4] ss:$8 sm:$0xf] %vm3_vm7, %v3661_v22   ;;  %3666 = vst.msk [vmem:[%s8503_s1 + $0xc5] ss:$8 sm:$0xf0] %vm3_vm7, %v3664_v36  }
 0x156   :  { %3669 = vst.msk [vmem:[%s8503_s1 + $0xc6] ss:$8 sm:$0xf0] %vm3_vm7, %v3667_v37   ;;  %3672 = vst.msk [vmem:[%s8503_s1 + $0xc7] ss:$8 sm:$0xf0] %vm3_vm7, %v3670_v43  }
 0x157   :  { %3665 = vst.msk [vmem:[%s8503_s1 + $0xc5] ss:$8 sm:$0xf] %vm3_vm7, %v3664_v36   ;;  %3668 = vst.msk [vmem:[%s8503_s1 + $0xc6] ss:$8 sm:$0xf] %vm3_vm7, %v3667_v37  }
 0x158   :  { %3671 = vst.msk [vmem:[%s8503_s1 + $0xc7] ss:$8 sm:$0xf] %vm3_vm7, %v3670_v43  }
 0x159   :  { %3743 = vst.msk [vmem:[%s8503_s1 + $0xe0] sm:$0xff] %vm255_vm8, %v6223_v16   ;;  %3815 = vst.msk [vmem:[%s8503_s1 + $0xe8] sm:$0xff] %vm255_vm8, %v6491_v35   ;;  %v2142_v16 = vpop.permute.xlu0 %2141   ;;  %v2247_v35 = vpop.permute.xlu1 %2246  }
 0x15a   :  { %3887 = vst.msk [vmem:[%s8503_s1 + $0xf0] sm:$0xff] %vm255_vm8, %v6755_v14   ;;  %3959 = vst.msk [vmem:[%s8503_s1 + $0xf8] sm:$0xff] %vm255_vm8, %v7035_v41  }
 0x15b   :  { %3734 = vst.msk [vmem:[%s8503_s1 + $0xc0] sm:$0xff] %vm255_vm8, %v6249_v30   ;;  %3806 = vst.msk [vmem:[%s8503_s1 + $0xc8] sm:$0xff] %vm255_vm8, %v6529_v56   ;;  %v3539_v30 = vsel %vm251_vm6, %v4523_v11, %v3535_v44 }
 0x15c   :  { %3878 = vst.msk [vmem:[%s8503_s1 + $0xd0] sm:$0xff] %vm255_vm8, %v6793_v39   ;;  %3950 = vst.msk [vmem:[%s8503_s1 + $0xd8] sm:$0xff] %vm255_vm8, %v7061_v63   ;;  %3540 = vrot.lane.b32.xlu0 %v3539_v30, %s4539_s14 }
 0x15d   :  { %4030 = vst.msk [vmem:[%s8503_s1 + $0xe0] sm:$0xff] %vm1374_vm9, %v7303_v49   ;;  %4021 = vst.msk [vmem:[%s8503_s1 + $0xc0] sm:$0xff] %vm1374_vm9, %v7341_v28   ;;  %v2212_v56 = vpop.permute.xlu0 %2211   ;;  %v2317_v14 = vpop.permute.xlu1 %2316  }
 0x15e   :  { %4102 = vst.msk [vmem:[%s8503_s1 + $0xe8] sm:$0xff] %vm1374_vm9, %v7668_v9   ;;  %4093 = vst.msk [vmem:[%s8503_s1 + $0xc8] sm:$0xff] %vm1374_vm9, %v7722_v24  }
 0x15f   :  { %4174 = vst.msk [vmem:[%s8503_s1 + $0xf0] sm:$0xff] %vm1374_vm9, %v2177_v26   ;;  %4165 = vst.msk [vmem:[%s8503_s1 + $0xd0] sm:$0xff] %vm1374_vm9, %v2142_v16  }
 0x160   :  { %4192 = vst.msk [vmem:[%s8503_s1 + $0x38] sm:$0xff] %vm1374_vm9, %v2247_v35   ;;  %4183 = vst.msk [vmem:[%s8503_s1 + $0x18] sm:$0xff] %vm1374_vm9, %v2212_v56  }
 0x161   :  { %4210 = vst.msk [vmem:[%s8503_s1 + $0x78] sm:$0xff] %vm1374_vm9, %v2317_v14   ;;  %v2282_v39 = vpop.permute.xlu0 %2281   ;;  %v2387_v41 = vpop.permute.xlu1 %2386  }
 0x162   :  { %4201 = vst.msk [vmem:[%s8503_s1 + $0x58] sm:$0xff] %vm1374_vm9, %v2282_v39   ;;  %4228 = vst.msk [vmem:[%s8503_s1 + $0xb8] sm:$0xff] %vm1374_vm9, %v2387_v41  }
 0x165   :  { %v2352_v63 = vpop.permute.xlu0 %2351   ;;  %v2457_v49 = vpop.permute.xlu1 %2456  }
 0x166   :  { %4219 = vst.msk [vmem:[%s8503_s1 + $0x98] sm:$0xff] %vm1374_vm9, %v2352_v63   ;;  %4246 = vst.msk [vmem:[%s8503_s1 + $0xf8] sm:$0xff] %vm1374_vm9, %v2457_v49  }
 0x169   :  { %v2422_v28 = vpop.permute.xlu0 %2421   ;;  %v2526_v9 = vpop.permute.xlu1 %2525  }
 0x16a   :  { %4237 = vst.msk [vmem:[%s8503_s1 + $0xd8] sm:$0xff] %vm1374_vm9, %v2422_v28  }
 0x16b   :  { %4263 = vst.msk [vmem:[%s8503_s1 + $0x20] sm:$0xff] %vm2493_vm10, %v2526_v9  }
 0x16d   :  { %v2492_v24 = vpop.permute.xlu0 %2491   ;;  %v2596_v53 = vpop.permute.xlu1 %2595  }
 0x16e   :  { %2494 = vst.msk [vmem:[%s8503_s1] sm:$0xff] %vm2493_vm10, %v2492_v24   ;;  %4281 = vst.msk [vmem:[%s8503_s1 + $0x60] sm:$0xff] %vm2493_vm10, %v2596_v53  }
 0x171   :  { %v2561_v57 = vpop.permute.xlu0 %2560   ;;  %v2666_v55 = vpop.permute.xlu1 %2665  }
 0x172   :  { %4272 = vst.msk [vmem:[%s8503_s1 + $0x40] sm:$0xff] %vm2493_vm10, %v2561_v57   ;;  %4299 = vst.msk [vmem:[%s8503_s1 + $0xa0] sm:$0xff] %vm2493_vm10, %v2666_v55  }
 0x175   :  { %v2631_v58 = vpop.permute.xlu0 %2630   ;;  %v2736_v29 = vpop.permute.xlu1 %2735  }
 0x176   :  { %4290 = vst.msk [vmem:[%s8503_s1 + $0x80] sm:$0xff] %vm2493_vm10, %v2631_v58   ;;  %4317 = vst.msk [vmem:[%s8503_s1 + $0xe0] sm:$0xff] %vm2493_vm10, %v2736_v29  }
 0x179   :  { %v2701_v50 = vpop.permute.xlu0 %2700   ;;  %v2806_v5 = vpop.permute.xlu1 %2805  }
 0x17a   :  { %4308 = vst.msk [vmem:[%s8503_s1 + $0xc0] sm:$0xff] %vm2493_vm10, %v2701_v50   ;;  %4335 = vst.msk [vmem:[%s8503_s1 + $0x28] sm:$0xff] %vm2493_vm10, %v2806_v5  }
 0x17d   :  { %v2771_v33 = vpop.permute.xlu0 %2770   ;;  %v2876_v3 = vpop.permute.xlu1 %2875  }
 0x17e   :  { %4326 = vst.msk [vmem:[%s8503_s1 + $0x8] sm:$0xff] %vm2493_vm10, %v2771_v33   ;;  %4353 = vst.msk [vmem:[%s8503_s1 + $0x68] sm:$0xff] %vm2493_vm10, %v2876_v3  }
 0x181   :  { %v2841_v23 = vpop.permute.xlu0 %2840   ;;  %v2946_v31 = vpop.permute.xlu1 %2945  }
 0x182   :  { %4344 = vst.msk [vmem:[%s8503_s1 + $0x48] sm:$0xff] %vm2493_vm10, %v2841_v23   ;;  %4371 = vst.msk [vmem:[%s8503_s1 + $0xa8] sm:$0xff] %vm2493_vm10, %v2946_v31  }
 0x185   :  { %v2911_v4 = vpop.permute.xlu0 %2910   ;;  %v3016_v60 = vpop.permute.xlu1 %3015  }
 0x186   :  { %4362 = vst.msk [vmem:[%s8503_s1 + $0x88] sm:$0xff] %vm2493_vm10, %v2911_v4   ;;  %4389 = vst.msk [vmem:[%s8503_s1 + $0xe8] sm:$0xff] %vm2493_vm10, %v3016_v60  }
 0x189   :  { %v2981_v45 = vpop.permute.xlu0 %2980   ;;  %v3086_v42 = vpop.permute.xlu1 %3085  }
 0x18a   :  { %4380 = vst.msk [vmem:[%s8503_s1 + $0xc8] sm:$0xff] %vm2493_vm10, %v2981_v45   ;;  %4407 = vst.msk [vmem:[%s8503_s1 + $0x30] sm:$0xff] %vm2493_vm10, %v3086_v42  }
 0x18d   :  { %v3051_v62 = vpop.permute.xlu0 %3050   ;;  %v3156_v61 = vpop.permute.xlu1 %3155  }
 0x18e   :  { %4398 = vst.msk [vmem:[%s8503_s1 + $0x10] sm:$0xff] %vm2493_vm10, %v3051_v62   ;;  %4425 = vst.msk [vmem:[%s8503_s1 + $0x70] sm:$0xff] %vm2493_vm10, %v3156_v61  }
 0x191   :  { %v3121_v13 = vpop.permute.xlu0 %3120   ;;  %v3226_v32 = vpop.permute.xlu1 %3225  }
 0x192   :  { %4416 = vst.msk [vmem:[%s8503_s1 + $0x50] sm:$0xff] %vm2493_vm10, %v3121_v13   ;;  %4443 = vst.msk [vmem:[%s8503_s1 + $0xb0] sm:$0xff] %vm2493_vm10, %v3226_v32  }
 0x195   :  { %v3191_v59 = vpop.permute.xlu0 %3190   ;;  %v3296_v38 = vpop.permute.xlu1 %3295  }
 0x196   :  { %4434 = vst.msk [vmem:[%s8503_s1 + $0x90] sm:$0xff] %vm2493_vm10, %v3191_v59   ;;  %4461 = vst.msk [vmem:[%s8503_s1 + $0xf0] sm:$0xff] %vm2493_vm10, %v3296_v38  }
 0x199   :  { %v3261_v6 = vpop.permute.xlu0 %3260   ;;  %v3366_v46 = vpop.permute.xlu1 %3365  }
 0x19a   :  { %4452 = vst.msk [vmem:[%s8503_s1 + $0xd0] sm:$0xff] %vm2493_vm10, %v3261_v6   ;;  %4479 = vst.msk [vmem:[%s8503_s1 + $0x38] sm:$0xff] %vm2493_vm10, %v3366_v46  }
 0x19d   :  { %v3331_v10 = vpop.permute.xlu0 %3330   ;;  %v3436_v0 = vpop.permute.xlu1 %3435  }
 0x19e   :  { %4470 = vst.msk [vmem:[%s8503_s1 + $0x18] sm:$0xff] %vm2493_vm10, %v3331_v10   ;;  %4497 = vst.msk [vmem:[%s8503_s1 + $0x78] sm:$0xff] %vm2493_vm10, %v3436_v0  }
 0x1a8   :  { %v3401_v48 = vpop.permute.xlu0 %3400  }
 0x1a9   :  { %4488 = vst.msk [vmem:[%s8503_s1 + $0x58] sm:$0xff] %vm2493_vm10, %v3401_v48  }
 0x1ad   :  { %v3506_v12 = vpop.permute.xlu1 %3505  }
 0x1ae   :  { %4515 = vst.msk [vmem:[%s8503_s1 + $0xb8] sm:$0xff] %vm2493_vm10, %v3506_v12  }
 0x1bd   :  { %v3471_v20 = vpop.permute.xlu0 %3470  }
 0x1be   :  { %4506 = vst.msk [vmem:[%s8503_s1 + $0x98] sm:$0xff] %vm2493_vm10, %v3471_v20  }
 0x1c2   :  { %v3576_v40 = vpop.permute.xlu1 %3575  }
 0x1c3   :  { %4533 = vst.msk [vmem:[%s8503_s1 + $0xf8] sm:$0xff] %vm2493_vm10, %v3576_v40  }
 0x1ce   :  { %v3541_v54 = vpop.permute.xlu0 %3540  }
 0x1cf   :  { %4524 = vst.msk [vmem:[%s8503_s1 + $0xd8] sm:$0xff] %vm2493_vm10, %v3541_v54  }

// kernel: hebbian_forward.1
= control target key start
LH: loop header
LB: loop body
LE: loop exit
PB: predicated region body
PF: predicated region fallthrough
CT: control target
= control target key end

     0   :  { %s2397_s29 = smov 0   ;;  %s3288_s0 = inlined_call_operand.vmem [shape: f32[16,48], index: 0, kind: input, shape index: {}]   ;;  %s3289_s1 = inlined_call_operand.vmem [shape: f32[16,1024], index: 1, kind: input, shape index: {}, may-alias: {1,14}]   ;;  %s3290_s2 = inlined_call_operand.vmem [shape: f32[48,1280], index: 2, kind: input, shape index: {}]   ;;  %s3291_s3 = inlined_call_operand.vmem [shape: f32[1,32], index: 3, kind: input, shape index: {}]   ;;  %s3292_s4 = inlined_call_operand.vmem [shape: f32[1,1024], index: 4, kind: input, shape index: {}]   ;;  %s3293_s5 = inlined_call_operand.vmem [shape: f32[1024,32], index: 5, kind: input, shape index: {}]   ;;  %s3294_s6 = inlined_call_operand.vmem [shape: f32[32,1024], index: 6, kind: input, shape index: {}]   ;;  %s3295_s7 = inlined_call_operand.vmem [shape: f32[32,33], index: 7, kind: input, shape index: {}]   ;;  %s3296_s8 = inlined_call_operand.vmem [shape: f32[1,33], index: 8, kind: input, shape index: {}]   ;;  %s3297_s9 = inlined_call_operand.vmem [shape: f32[32,5], index: 9, kind: input, shape index: {}]   ;;  %s3298_s10 = inlined_call_operand.vmem [shape: f32[1,5], index: 10, kind: input, shape index: {}]   ;;  %s3299_s11 = inlined_call_operand.vmem [shape: f32[1,32], index: 11, kind: input, shape index: {}]   ;;  %s3300_s12 = inlined_call_operand.vmem [shape: f32[1,32], index: 12, kind: input, shape index: {}]   ;;  %s3301_s13 = inlined_call_operand.vmem [shape: f32[16,64], index: 13, kind: output, shape index: {0}]   ;;  %s3302_s14 = inlined_call_operand.vmem [shape: f32[16,1024], index: 14, kind: output, shape index: {1}, may-alias: {1,14}]  }
   0x1 LB: > { %s2076_s30 = sadd.s32 4294967295, %s2316_s29   ;;  %p2080_p0 = scmp.ge.s32.totalorder %s2316_s29, 1  ;;  %s2316_s29 = sphi %s2397_s29, %s25_s29  }
   0x2   : > { %p424_p1 = scmp.lt.s32.totalorder %s2316_s29, 3 }
   0x4   : > { %p425_p2 = pnand %p2080_p0, %p424_p1 }
   0x5   : > { %p478_p3 = scmp.lt.s32.totalorder (!%p425_p2), %s2076_s30, 1 }
   0x6   : > { %428 = sbr.rel (%p425_p2) target bundleno = 1106 (0x452), region = 72 }
   0xb   : > { %v556_v0 = vld [vmem:[%s3290_s2 + $0x198] sm:$0xff]  ;;  %v558_v1 = vld [vmem:[%s3290_s2 + $0x1a8] sm:$0xff]  ;;  %v555_v2 = vld [vmem:[%s3290_s2 + $0x190] sm:$0xff]  ;;  %s3304_s30 = smov (!%p478_p3, %s2076_s30), 1  ;;  %vm565_vm0 = vcmask 392192   ;;  %v2318_v25 = vmov 0.0  }
   0xc   : > { %589 = vmatprep.subr.mxu0 %v556_v0  ;;  %660 = vmatprep.subr.mxu1 %v558_v1  ;;  %v557_v3 = vld [vmem:[%s3290_s2 + $0x1a0] sm:$0xff]  ;;  %v546_v4 = vld [vmem:[%s3290_s2 + $0x148] sm:$0xff]  ;;  %v548_v5 = vld [vmem:[%s3290_s2 + $0x158] sm:$0xff]  ;;  %s2081_s19 = sshll.u32 %s3304_s30, 3  ;;  %s2113_s24 = sshll.u32 %s3304_s30, 6  ;;  %vm1411_vm1 = vcmask 261120  }
   0xd   : > { %590 = vmatpush1.msra.mxu0 %v555_v2  ;;  %661 = vmatpush1.msra.mxu1 %v557_v3  ;;  %v545_v6 = vld [vmem:[%s3290_s2 + $0x140] sm:$0xff]  ;;  %v547_v7 = vld [vmem:[%s3290_s2 + $0x150] sm:$0xff]  ;;  %v536_v8 = vld [vmem:[%s3290_s2 + $0xf8] sm:$0xff]  ;;  %s481_s21 = scalar_lea.vmem %s3288_s0, %s2081_s19  ;;  %s2829_s27 = scalar_lea.vmem %s3289_s1, %s2113_s24  ;;  %vm2319_vm2 = vmmov 0   ;;  %vm1572_vm3 = vcmask 31744   ;;  %vm1589_vm4 = vcmask 294144  }
   0xe   : > { %591 = vmatprep.subr.mxu0 %v546_v4  ;;  %662 = vmatprep.subr.mxu1 %v548_v5  ;;  %v538_v9 = vld [vmem:[%s3290_s2 + $0x108] sm:$0xff]  ;;  %v535_v10 = vld [vmem:[%s3290_s2 + $0xf0] sm:$0xff]  ;;  %v537_v11 = vld [vmem:[%s3290_s2 + $0x100] sm:$0xff]  ;;  %s3262_s15 = scalar_lea.vmem %s3302_s14, %s2113_s24  ;;  %s2321_s30 = smov 32   ;;  %vm1595_vm5 = vcmask 302368  }
   0xf   : > { %592 = vmatpush1.msra.mxu0 %v545_v6  ;;  %663 = vmatpush1.msra.mxu1 %v547_v7  ;;  %v526_v12 = vld [vmem:[%s3290_s2 + $0xa8] sm:$0xff]  ;;  %v528_v13 = vld [vmem:[%s3290_s2 + $0xb8] sm:$0xff]  ;;  %v525_v14 = vld [vmem:[%s3290_s2 + $0xa0] sm:$0xff] }
  0x10   : > { %593 = vmatprep.subr.mxu0 %v536_v8  ;;  %664 = vmatprep.subr.mxu1 %v538_v9  ;;  %v527_v15 = vld [vmem:[%s3290_s2 + $0xb0] sm:$0xff]  ;;  %v516_v16 = vld [vmem:[%s3290_s2 + $0x58] sm:$0xff]  ;;  %v518_v17 = vld [vmem:[%s3290_s2 + $0x68] sm:$0xff] }
  0x11   : > { %594 = vmatpush1.msra.mxu0 %v535_v10  ;;  %665 = vmatpush1.msra.mxu1 %v537_v11  ;;  %v515_v18 = vld [vmem:[%s3290_s2 + $0x50] sm:$0xff]  ;;  %v517_v19 = vld [vmem:[%s3290_s2 + $0x60] sm:$0xff]  ;;  %v506_v20 = vld [vmem:[%s3290_s2 + $0x8] sm:$0xff] }
  0x12   : > { %595 = vmatprep.subr.mxu0 %v526_v12  ;;  %666 = vmatprep.subr.mxu1 %v528_v13  ;;  %v508_v21 = vld [vmem:[%s3290_s2 + $0x18] sm:$0xff]  ;;  %v505_v22 = vld [vmem:[%s3290_s2] sm:$0xff]  ;;  %v507_v23 = vld [vmem:[%s3290_s2 + $0x10] sm:$0xff] }
  0x13   : > { %596 = vmatpush1.msra.mxu0 %v525_v14  ;;  %667 = vmatpush1.msra.mxu1 %v527_v15  ;;  %v2485_v24 = vld [vmem:[%s481_s21] sm:$0xff]  ;;  %v560_v26 = vld [vmem:[%s3290_s2 + $0x1b8] sm:$0xff]  ;;  %v559_v27 = vld [vmem:[%s3290_s2 + $0x1b0] sm:$0xff]  ;;  %s3089_s21 = scalar_lea.vmem %s3301_s13, %s2081_s19 }
  0x14   : > { %597 = vmatprep.subr.mxu0 %v516_v16  ;;  %668 = vmatprep.subr.mxu1 %v518_v17  ;;  %v550_v28 = vld [vmem:[%s3290_s2 + $0x168] sm:$0xff]  ;;  %v549_v29 = vld [vmem:[%s3290_s2 + $0x160] sm:$0xff]  ;;  %v540_v30 = vld [vmem:[%s3290_s2 + $0x118] sm:$0xff] }
  0x15   : > { %598 = vmatpush1.msra.mxu0 %v515_v18  ;;  %669 = vmatpush1.msra.mxu1 %v517_v19  ;;  %v562_v31 = vld [vmem:[%s3290_s2 + $0x1c8] sm:$0xff]  ;;  %v561_v32 = vld [vmem:[%s3290_s2 + $0x1c0] sm:$0xff]  ;;  %v539_v33 = vld [vmem:[%s3290_s2 + $0x110] sm:$0xff] }
  0x16   : > { %599 = vmatprep.subr.mxu0 %v506_v20  ;;  %670 = vmatprep.subr.mxu1 %v508_v21  ;;  %v552_v34 = vld [vmem:[%s3290_s2 + $0x178] sm:$0xff]  ;;  %v530_v35 = vld [vmem:[%s3290_s2 + $0xc8] sm:$0xff]  ;;  %v551_v36 = vld [vmem:[%s3290_s2 + $0x170] sm:$0xff] }
  0x17   : > { %600 = vmatpush1.msra.mxu0 %v505_v22  ;;  %633 = vmatprep.mubr.f32.mxu0 %v2318_v25  ;;  %v542_v37 = vld [vmem:[%s3290_s2 + $0x128] sm:$0xff]  ;;  %v529_v38 = vld [vmem:[%s3290_s2 + $0xc0] sm:$0xff]  ;;  %v520_v40 = vld [vmem:[%s3290_s2 + $0x78] sm:$0xff] }
  0x18   : > { %671 = vmatpush1.msra.mxu1 %v507_v23  ;;  %704 = vmatprep.mubr.f32.mxu1 %v2318_v25  ;;  %v541_v39 = vld [vmem:[%s3290_s2 + $0x120] sm:$0xff]  ;;  %v532_v41 = vld [vmem:[%s3290_s2 + $0xd8] sm:$0xff]  ;;  %v519_v42 = vld [vmem:[%s3290_s2 + $0x70] sm:$0xff] }
  0x19   : > { %2087 = vmatmul.mubr.msk.f32.vlgmr.msra.gmra.mxu0 %vm565_vm0, %v2485_v24  ;;  %2088 = vmatmul.mubr.msk.f32.vlgmr.msra.gmra.mxu1 %vm565_vm0, %v2485_v24  ;;  %v531_v43 = vld [vmem:[%s3290_s2 + $0xd0] sm:$0xff]  ;;  %v510_v44 = vld [vmem:[%s3290_s2 + $0x28] sm:$0xff]  ;;  %v509_v46 = vld [vmem:[%s3290_s2 + $0x20] sm:$0xff] }
  0x1a   : > { %731 = vmatprep.subr.mxu0 %v560_v26  ;;  %775 = vmatprep.mubr.f32.mxu0 %v2318_v25  ;;  %v522_v45 = vld [vmem:[%s3290_s2 + $0x88] sm:$0xff]  ;;  %v521_v47 = vld [vmem:[%s3290_s2 + $0x80] sm:$0xff]  ;;  %v564_v48 = vld [vmem:[%s3290_s2 + $0x1d8] sm:$0xff] }
  0x1b   : > { %732 = vmatpush1.msra.mxu0 %v559_v27  ;;  %846 = vmatprep.mubr.f32.mxu1 %v2318_v25  ;;  %v563_v49 = vld [vmem:[%s3290_s2 + $0x1d0] sm:$0xff]  ;;  %v554_v50 = vld [vmem:[%s3290_s2 + $0x188] sm:$0xff]  ;;  %v512_v51 = vld [vmem:[%s3290_s2 + $0x38] sm:$0xff] }
  0x1c   : > { %733 = vmatprep.subr.mxu0 %v550_v28  ;;  %802 = vmatprep.subr.mxu1 %v562_v31  ;;  %v553_v52 = vld [vmem:[%s3290_s2 + $0x180] sm:$0xff]  ;;  %v511_v53 = vld [vmem:[%s3290_s2 + $0x30] sm:$0xff]  ;;  %v544_v54 = vld [vmem:[%s3290_s2 + $0x138] sm:$0xff] }
  0x1d   : > { %734 = vmatpush1.msra.mxu0 %v549_v29  ;;  %803 = vmatpush1.msra.mxu1 %v561_v32  ;;  %v543_v55 = vld [vmem:[%s3290_s2 + $0x130] sm:$0xff]  ;;  %v1022_v56 = vld [vmem:[%s3293_s5 + $0xf8] sm:$0xff]  ;;  %v534_v57 = vld [vmem:[%s3290_s2 + $0xe8] sm:$0xff] }
  0x1e   : > { %735 = vmatprep.subr.mxu0 %v540_v30  ;;  %804 = vmatprep.subr.mxu1 %v552_v34  ;;  %v1006_v58 = vld [vmem:[%s3293_s5 + $0x78] sm:$0xff]  ;;  %v533_v59 = vld [vmem:[%s3290_s2 + $0xe0] sm:$0xff]  ;;  %v1021_v60 = vld [vmem:[%s3293_s5 + $0xf0] sm:$0xff] }
  0x1f   : > { %736 = vmatpush1.msra.mxu0 %v539_v33  ;;  %805 = vmatpush1.msra.mxu1 %v551_v36  ;;  %v524_v61 = vld [vmem:[%s3290_s2 + $0x98] sm:$0xff]  ;;  %v1005_v62 = vld [vmem:[%s3293_s5 + $0x70] sm:$0xff]  ;;  %v1020_v0 = vld [vmem:[%s3293_s5 + $0xe8] sm:$0xff] }
  0x20   : > { %737 = vmatprep.subr.mxu0 %v530_v35  ;;  %806 = vmatprep.subr.mxu1 %v542_v37  ;;  %v523_v63 = vld [vmem:[%s3290_s2 + $0x90] sm:$0xff]  ;;  %v514_v1 = vld [vmem:[%s3290_s2 + $0x48] sm:$0xff]  ;;  %v513_v3 = vld [vmem:[%s3290_s2 + $0x40] sm:$0xff] }
  0x21   : > { %738 = vmatpush1.msra.mxu0 %v529_v38  ;;  %807 = vmatpush1.msra.mxu1 %v541_v39  ;;  %v1004_v2 = vld [vmem:[%s3293_s5 + $0x68] sm:$0xff]  ;;  %v1019_v4 = vld [vmem:[%s3293_s5 + $0xe0] sm:$0xff]  ;;  %v1054_v5 = vld [vmem:[%s3293_s5 + $0x1f8] sm:$0xff] }
  0x22   : > { %739 = vmatprep.subr.mxu0 %v520_v40  ;;  %808 = vmatprep.subr.mxu1 %v532_v41  ;;  %v1038_v6 = vld [vmem:[%s3293_s5 + $0x178] sm:$0xff]  ;;  %v1003_v7 = vld [vmem:[%s3293_s5 + $0x60] sm:$0xff]  ;;  %v1053_v8 = vld [vmem:[%s3293_s5 + $0x1f0] sm:$0xff] }
  0x23   : > { %740 = vmatpush1.msra.mxu0 %v519_v42  ;;  %809 = vmatpush1.msra.mxu1 %v531_v43  ;;  %v1018_v9 = vld [vmem:[%s3293_s5 + $0xd8] sm:$0xff]  ;;  %v1037_v10 = vld [vmem:[%s3293_s5 + $0x170] sm:$0xff]  ;;  %v1052_v12 = vld [vmem:[%s3293_s5 + $0x1e8] sm:$0xff] }
  0x24   : > { %741 = vmatprep.subr.mxu0 %v510_v44  ;;  %810 = vmatprep.subr.mxu1 %v522_v45  ;;  %v1002_v11 = vld [vmem:[%s3293_s5 + $0x58] sm:$0xff]  ;;  %v1017_v13 = vld [vmem:[%s3293_s5 + $0xd0] sm:$0xff]  ;;  %v1036_v14 = vld [vmem:[%s3293_s5 + $0x168] sm:$0xff] }
  0x25   : > { %742 = vmatpush1.msra.mxu0 %v509_v46  ;;  %811 = vmatpush1.msra.mxu1 %v521_v47  ;;  %v1001_v15 = vld [vmem:[%s3293_s5 + $0x50] sm:$0xff]  ;;  %v1051_v16 = vld [vmem:[%s3293_s5 + $0x1e0] sm:$0xff]  ;;  %v1016_v17 = vld [vmem:[%s3293_s5 + $0xc8] sm:$0xff] }
  0x26   : > { %873 = vmatprep.subr.mxu0 %v564_v48  ;;  %2089 = vmatmul.mubr.msk.f32.vlgmr.msra.gmra.mxu0 %vm565_vm0, %v2485_v24  ;;  %v1035_v18 = vld [vmem:[%s3293_s5 + $0x160] sm:$0xff]  ;;  %v1000_v19 = vld [vmem:[%s3293_s5 + $0x48] sm:$0xff]  ;;  %v1050_v20 = vld [vmem:[%s3293_s5 + $0x1d8] sm:$0xff] }
  0x27   : > { %874 = vmatpush1.msra.mxu0 %v563_v49  ;;  %917 = vmatprep.mubr.f32.mxu0 %v2318_v25  ;;  %v1015_v21 = vld [vmem:[%s3293_s5 + $0xc0] sm:$0xff]  ;;  %v1034_v22 = vld [vmem:[%s3293_s5 + $0x158] sm:$0xff]  ;;  %v1033_v27 = vld [vmem:[%s3293_s5 + $0x150] sm:$0xff] }
  0x28   : > { %875 = vmatprep.subr.mxu0 %v554_v50  ;;  %812 = vmatprep.subr.mxu1 %v512_v51  ;;  %v999_v23 = vld [vmem:[%s3293_s5 + $0x40] sm:$0xff]  ;;  %v1014_v26 = vld [vmem:[%s3293_s5 + $0xb8] sm:$0xff]  ;;  %v1048_v29 = vld [vmem:[%s3293_s5 + $0x1c8] sm:$0xff] }
  0x29   : > { %876 = vmatpush1.msra.mxu0 %v553_v52  ;;  %813 = vmatpush1.msra.mxu1 %v511_v53  ;;  %v998_v28 = vld [vmem:[%s3293_s5 + $0x38] sm:$0xff]  ;;  %v1013_v30 = vld [vmem:[%s3293_s5 + $0xb0] sm:$0xff]  ;;  %v1032_v31 = vld [vmem:[%s3293_s5 + $0x148] sm:$0xff] }
  0x2a   : > { %877 = vmatprep.subr.mxu0 %v544_v54  ;;  %2090 = vmatmul.mubr.msk.f32.vlgmr.msra.gmra.mxu1 %vm565_vm0, %v2485_v24  ;;  %v997_v32 = vld [vmem:[%s3293_s5 + $0x30] sm:$0xff]  ;;  %v1047_v33 = vld [vmem:[%s3293_s5 + $0x1c0] sm:$0xff]  ;;  %v1012_v34 = vld [vmem:[%s3293_s5 + $0xa8] sm:$0xff] }
  0x2b   : > { %878 = vmatpush1.msra.mxu0 %v543_v55  ;;  %2115 = vmatprep.subr.mxu1 %v1022_v56  ;;  %v1031_v35 = vld [vmem:[%s3293_s5 + $0x140] sm:$0xff]  ;;  %v996_v36 = vld [vmem:[%s3293_s5 + $0x28] sm:$0xff]  ;;  %v1046_v37 = vld [vmem:[%s3293_s5 + $0x1b8] sm:$0xff] }
  0x2c   : > { %879 = vmatprep.subr.mxu0 %v534_v57  ;;  %2116 = vmatpush3.msra.mxu1 %v1006_v58  ;;  %v1011_v38 = vld [vmem:[%s3293_s5 + $0xa0] sm:$0xff]  ;;  %v1030_v39 = vld [vmem:[%s3293_s5 + $0x138] sm:$0xff]  ;;  %v1045_v41 = vld [vmem:[%s3293_s5 + $0x1b0] sm:$0xff] }
  0x2d   : > { %880 = vmatpush1.msra.mxu0 %v533_v59  ;;  %2117 = vmatprep.subr.mxu1 %v1021_v60  ;;  %v995_v40 = vld [vmem:[%s3293_s5 + $0x20] sm:$0xff]  ;;  %v1010_v42 = vld [vmem:[%s3293_s5 + $0x98] sm:$0xff]  ;;  %v1029_v43 = vld [vmem:[%s3293_s5 + $0x130] sm:$0xff] }
  0x2e   : > { %881 = vmatprep.subr.mxu0 %v524_v61  ;;  %2118 = vmatpush3.msra.mxu1 %v1005_v62  ;;  %v1044_v44 = vld [vmem:[%s3293_s5 + $0x1a8] sm:$0xff]  ;;  %v1043_v46 = vld [vmem:[%s3293_s5 + $0x1a0] sm:$0xff]  ;;  %v1042_v48 = vld [vmem:[%s3293_s5 + $0x198] sm:$0xff] }
  0x2f   : > { %882 = vmatpush1.msra.mxu0 %v523_v63  ;;  %2119 = vmatprep.subr.mxu1 %v1020_v0  ;;  %v1028_v45 = vld [vmem:[%s3293_s5 + $0x128] sm:$0xff]  ;;  %v1027_v47 = vld [vmem:[%s3293_s5 + $0x120] sm:$0xff]  ;;  %v994_v49 = vld [vmem:[%s3293_s5 + $0x18] sm:$0xff] }
  0x30   : > { %883 = vmatprep.subr.mxu0 %v514_v1  ;;  %2120 = vmatpush3.msra.mxu1 %v1004_v2  ;;  %v1026_v50 = vld [vmem:[%s3293_s5 + $0x118] sm:$0xff]  ;;  %v1009_v51 = vld [vmem:[%s3293_s5 + $0x90] sm:$0xff]  ;;  %v1008_v55 = vld [vmem:[%s3293_s5 + $0x88] sm:$0xff]  ;;  %v935_v1 = vlaneseq }
  0x31   : > { %884 = vmatpush1.msra.mxu0 %v513_v3  ;;  %2121 = vmatprep.subr.mxu1 %v1019_v4  ;;  %v1041_v52 = vld [vmem:[%s3293_s5 + $0x190] sm:$0xff]  ;;  %v1040_v56 = vld [vmem:[%s3293_s5 + $0x188] sm:$0xff]  ;;  %v1007_v59 = vld [vmem:[%s3293_s5 + $0x80] sm:$0xff] }
  0x32   : > { %2091 = vmatmul.mubr.msk.f32.vlgmr.msra.gmra.mxu0 %vm565_vm0, %v2485_v24  ;;  %2150 = vmatprep.subr.mxu0 %v1054_v5  ;;  %v1049_v24 = vld [vmem:[%s3293_s5 + $0x1d0] sm:$0xff]  ;;  %v992_v57 = vld [vmem:[%s3293_s5 + $0x8] sm:$0xff]  ;;  %v1039_v60 = vld [vmem:[%s3293_s5 + $0x180] sm:$0xff]  ;;  %v2808_v2 = vshrl.u32 %v935_v1, 7 }
  0x33   : > { %2151 = vmatpush3.msra.mxu0 %v1038_v6  ;;  %2122 = vmatpush3.msra.mxu1 %v1003_v7  ;;  %v993_v53 = vld [vmem:[%s3293_s5 + $0x10] sm:$0xff]  ;;  %v1024_v58 = vld [vmem:[%s3293_s5 + $0x108] sm:$0xff]  ;;  %v991_v61 = vld [vmem:[%s3293_s5] sm:$0xff] }
  0x34   : > { %2152 = vmatprep.subr.mxu0 %v1053_v8  ;;  %2123 = vmatprep.subr.mxu1 %v1018_v9  ;;  %v1025_v54 = vld [vmem:[%s3293_s5 + $0x110] sm:$0xff]  ;;  %v1023_v62 = vld [vmem:[%s3293_s5 + $0x100] sm:$0xff]  ;;  %v1086_v63 = vld [vmem:[%s3293_s5 + $0x2f8] sm:$0xff]  ;;  %v945_v3 = vsub.s32 2, %v2808_v2  ;;  %v937_v4 = vsub.s32 0, %v2808_v2  ;;  %v941_v6 = vsub.s32 1, %v2808_v2 }
  0x35   : > { %2153 = vmatpush3.msra.mxu0 %v1037_v10  ;;  %2124 = vmatpush3.msra.mxu1 %v1002_v11  ;;  %v1118_v0 = vld [vmem:[%s3293_s5 + $0x3f8] sm:$0xff]  ;;  %v2815_v5 = vld [vmem:[%s3292_s4] sm:$0xff]  ;;  %v949_v7 = vsub.s32 3, %v2808_v2 }
  0x36   : > { %2154 = vmatprep.subr.mxu0 %v1052_v12  ;;  %2125 = vmatprep.subr.mxu1 %v1017_v13  ;;  %v946_v8 = vrot.slane %v2815_v5, %v945_v3  ;;  %v938_v9 = vrot.slane %v2815_v5, %v937_v4  ;;  %v942_v10 = vrot.slane %v2815_v5, %v941_v6  ;;  %v1078_v3 = vld [vmem:[%s3293_s5 + $0x2b8] sm:$0xff] }
  0x37   : > { %2155 = vmatpush3.msra.mxu0 %v1036_v14  ;;  %2126 = vmatpush3.msra.mxu1 %v1001_v15  ;;  %v950_v11 = vrot.slane %v2815_v5, %v949_v7  ;;  %v2836_v14 = vld [vmem:[%s2829_s27 + $0x10] sm:$0xff]  ;;  %v1110_v4 = vld [vmem:[%s3293_s5 + $0x3b8] sm:$0xff] }
  0x38   : > { %2156 = vmatprep.subr.mxu0 %v1051_v16  ;;  %2127 = vmatprep.subr.mxu1 %v1016_v17  ;;  %v2840_v16 = vld [vmem:[%s2829_s27 + $0x8] sm:$0xff]  ;;  %v2843_v17 = vld [vmem:[%s2829_s27 + $0x18] sm:$0xff] }
  0x39   : > { %2157 = vmatpush3.msra.mxu0 %v1035_v18  ;;  %2128 = vmatpush3.msra.mxu1 %v1000_v19  ;;  %v1062_v6 = vld [vmem:[%s3293_s5 + $0x238] sm:$0xff] }
  0x3a   : > { %2158 = vmatprep.subr.mxu0 %v1050_v20  ;;  %2129 = vmatprep.subr.mxu1 %v1015_v21  ;;  %v2851_v21 = vld [vmem:[%s2829_s27] sm:$0xff]  ;;  %v1094_v7 = vld [vmem:[%s3293_s5 + $0x338] sm:$0xff] }
  0x3b   : > { %2159 = vmatpush3.msra.mxu0 %v1034_v22  ;;  %2130 = vmatpush3.msra.mxu1 %v999_v23 }
  0x3c   : > { %2160 = vmatprep.subr.mxu0 %v1049_v24  ;;  %2131 = vmatprep.subr.mxu1 %v1014_v26 }
  0x3d   : > { %2161 = vmatpush3.msra.mxu0 %v1033_v27  ;;  %2132 = vmatpush3.msra.mxu1 %v998_v28 }
  0x3e   : > { %2162 = vmatprep.subr.mxu0 %v1048_v29  ;;  %2133 = vmatprep.subr.mxu1 %v1013_v30  ;;  %v1070_v29 = vld [vmem:[%s3293_s5 + $0x278] sm:$0xff] }
  0x3f   : > { %2163 = vmatpush3.msra.mxu0 %v1032_v31  ;;  %2134 = vmatpush3.msra.mxu1 %v997_v32  ;;  %v1102_v30 = vld [vmem:[%s3293_s5 + $0x378] sm:$0xff]  ;;  %v1085_v31 = vld [vmem:[%s3293_s5 + $0x2f0] sm:$0xff] }
  0x40   : > { %2164 = vmatprep.subr.mxu0 %v1047_v33  ;;  %2135 = vmatprep.subr.mxu1 %v1012_v34  ;;  %v1117_v32 = vld [vmem:[%s3293_s5 + $0x3f0] sm:$0xff] }
  0x41   : > { %2165 = vmatpush3.msra.mxu0 %v1031_v35  ;;  %2136 = vmatpush3.msra.mxu1 %v996_v36  ;;  %v1069_v33 = vld [vmem:[%s3293_s5 + $0x270] sm:$0xff]  ;;  %v1084_v35 = vld [vmem:[%s3293_s5 + $0x2e8] sm:$0xff] }
  0x42   : > { %2166 = vmatprep.subr.mxu0 %v1046_v37  ;;  %2137 = vmatprep.subr.mxu1 %v1011_v38  ;;  %v1101_v34 = vld [vmem:[%s3293_s5 + $0x370] sm:$0xff]  ;;  %v1116_v36 = vld [vmem:[%s3293_s5 + $0x3e8] sm:$0xff]  ;;  %v957_v37 = vsub.s32 5, %v2808_v2 }
  0x43   : > { %2167 = vmatpush3.msra.mxu0 %v1030_v39  ;;  %2138 = vmatpush3.msra.mxu1 %v995_v40  ;;  %v1068_v38 = vld [vmem:[%s3293_s5 + $0x268] sm:$0xff]  ;;  %v1083_v40 = vld [vmem:[%s3293_s5 + $0x2e0] sm:$0xff] }
  0x44   : > { %2168 = vmatprep.subr.mxu0 %v1045_v41  ;;  %2139 = vmatprep.subr.mxu1 %v1010_v42  ;;  %v1100_v39 = vld [vmem:[%s3293_s5 + $0x368] sm:$0xff]  ;;  %v1115_v41 = vld [vmem:[%s3293_s5 + $0x3e0] sm:$0xff] }
  0x45   : > { %2169 = vmatpush3.msra.mxu0 %v1029_v43  ;;  %2140 = vmatpush3.msra.mxu1 %v994_v49  ;;  %v1067_v42 = vld [vmem:[%s3293_s5 + $0x260] sm:$0xff]  ;;  %v1098_v49 = vld [vmem:[%s3293_s5 + $0x358] sm:$0xff] }
  0x46   : > { %2170 = vmatprep.subr.mxu0 %v1044_v44  ;;  %2141 = vmatprep.subr.mxu1 %v1009_v51  ;;  %v1099_v43 = vld [vmem:[%s3293_s5 + $0x360] sm:$0xff]  ;;  %v1082_v44 = vld [vmem:[%s3293_s5 + $0x2d8] sm:$0xff]  ;;  %v1113_v51 = vld [vmem:[%s3293_s5 + $0x3d0] sm:$0xff] }
  0x47   : > { %2171 = vmatpush3.msra.mxu0 %v1028_v45  ;;  %2142 = vmatpush3.msra.mxu1 %v993_v53  ;;  %v1114_v45 = vld [vmem:[%s3293_s5 + $0x3d8] sm:$0xff]  ;;  %v1065_v53 = vld [vmem:[%s3293_s5 + $0x250] sm:$0xff] }
  0x48   : > { %2172 = vmatprep.subr.mxu0 %v1043_v46  ;;  %2143 = vmatprep.subr.mxu1 %v1008_v55 }
  0x49   : > { %2173 = vmatpush3.msra.mxu0 %v1027_v47  ;;  %2144 = vmatpush3.msra.mxu1 %v992_v57  ;;  %v958_v47 = vrot.slane %v2815_v5, %v957_v37  ;;  %v1112_v57 = vld [vmem:[%s3293_s5 + $0x3c8] sm:$0xff]  ;;  %v1074_v37 = vld [vmem:[%s3293_s5 + $0x298] sm:$0xff] }
  0x4a   : > { %2174 = vmatprep.subr.mxu0 %v1042_v48  ;;  %2145 = vmatprep.subr.mxu1 %v1007_v59  ;;  %v1066_v48 = vld [vmem:[%s3293_s5 + $0x258] sm:$0xff]  ;;  %v1064_v59 = vld [vmem:[%s3293_s5 + $0x248] sm:$0xff] }
  0x4b   : > { %2175 = vmatpush3.msra.mxu0 %v1026_v50  ;;  %2146 = vmatpush3.msra.mxu1 %v991_v61  ;;  %v1081_v50 = vld [vmem:[%s3293_s5 + $0x2d0] sm:$0xff]  ;;  %v1079_v61 = vld [vmem:[%s3293_s5 + $0x2c0] sm:$0xff] }
  0x4c   : > { %2176 = vmatprep.subr.mxu0 %v1041_v52  ;;  %2185 = vmatprep.subr.mxu1 %v1086_v63  ;;  %v1063_v63 = vld [vmem:[%s3293_s5 + $0x240] sm:$0xff] }
  0x4d   : > { %2177 = vmatpush3.msra.mxu0 %v1025_v54  ;;  %v1097_v54 = vld [vmem:[%s3293_s5 + $0x350] sm:$0xff] }
  0x4e   : > { %2178 = vmatprep.subr.mxu0 %v1040_v56  ;;  %v1080_v56 = vld [vmem:[%s3293_s5 + $0x2c8] sm:$0xff] }
  0x4f   : > { %2179 = vmatpush3.msra.mxu0 %v1024_v58  ;;  %v2939_v58 = vld [vmem:[%s2829_s27 + $0x28] sm:$0xff] }
  0x50   : > { %2180 = vmatprep.subr.mxu0 %v1039_v60  ;;  %v1096_v60 = vld [vmem:[%s3293_s5 + $0x348] sm:$0xff] }
  0x51   : > { %2181 = vmatpush3.msra.mxu0 %v1023_v62  ;;  %v1111_v62 = vld [vmem:[%s3293_s5 + $0x3c0] sm:$0xff] }
  0x52   : > { %2220 = vmatprep.subr.mxu0 %v1118_v0  ;;  %v1095_v0 = vld [vmem:[%s3293_s5 + $0x340] sm:$0xff] }
  0xd9   : > { %v2831_v12 = vpop.f32.mrf.mxu0  ;;  %v2833_v13 = vpop.f32.mrf.mxu1 }
  0xda   : > { %v977_v15 = vmul.f32 %v946_v8, %v2833_v13  ;;  %v975_v18 = vmul.f32 %v938_v9, %v2831_v12  ;;  %v1077_v8 = vld [vmem:[%s3293_s5 + $0x2b0] sm:$0xff]  ;;  %v2092_v9 = vld [vmem:[%s3291_s3] ss:$0 sm:$0xff] }
  0xdb   : > { %v2846_v19 = vpop.f32.mrf.mxu0  ;;  %v2848_v20 = vpop.f32.mrf.mxu1 }
  0xdc   : > { %v976_v22 = vmul.f32 %v942_v10, %v2846_v19  ;;  %v978_v23 = vmul.f32 %v950_v11, %v2848_v20  ;;  %v985_v24 = vmul.f32 %v977_v15, %v2836_v14  ;;  %v983_v28 = vmul.f32 %v975_v18, %v2851_v21  ;;  %v1109_v10 = vld [vmem:[%s3293_s5 + $0x3b0] sm:$0xff] }
  0xdd   : > { %v1061_v11 = vld [vmem:[%s3293_s5 + $0x230] sm:$0xff]  ;;  %v965_v15 = vsub.s32 7, %v2808_v2 }
  0xde   : > { %v984_v26 = vmul.f32 %v976_v22, %v2840_v16  ;;  %v986_v27 = vmul.f32 %v978_v23, %v2843_v17  ;;  %v1093_v18 = vld [vmem:[%s3293_s5 + $0x330] sm:$0xff]  ;;  %v1076_v22 = vld [vmem:[%s3293_s5 + $0x2a8] sm:$0xff] }
  0xe0   : > { %1183 = vmatprep.mubr.f32.mxu1 %v984_v26  ;;  %1253 = vmatprep.mubr.f32.mxu0 %v986_v27  ;;  %v961_v26 = vsub.s32 6, %v2808_v2  ;;  %v1108_v27 = vld [vmem:[%s3293_s5 + $0x3a8] sm:$0xff] }
  0xe1   : > { %1184 = vmatmul.mubr.f32.vlgmr.msra.gmra.mxu1 %v983_v28  ;;  %1254 = vmatmul.mubr.f32.vlgmr.msra.gmra.mxu0 %v985_v24 }
  0xe2   : > { %2186 = vmatpush3.msra.mxu1 %v1070_v29  ;;  %2221 = vmatpush3.msra.mxu0 %v1102_v30  ;;  %v1060_v29 = vld [vmem:[%s3293_s5 + $0x228] sm:$0xff]  ;;  %v953_v30 = vsub.s32 4, %v2808_v2  ;;  %v1059_v2 = vld [vmem:[%s3293_s5 + $0x220] sm:$0xff] }
  0xe3   : > { %2187 = vmatprep.subr.mxu1 %v1085_v31  ;;  %2222 = vmatprep.subr.mxu0 %v1117_v32  ;;  %v1092_v31 = vld [vmem:[%s3293_s5 + $0x328] sm:$0xff]  ;;  %v1075_v32 = vld [vmem:[%s3293_s5 + $0x2a0] sm:$0xff] }
  0xe4   : > { %2188 = vmatpush3.msra.mxu1 %v1069_v33  ;;  %2223 = vmatpush3.msra.mxu0 %v1101_v34  ;;  %v1107_v33 = vld [vmem:[%s3293_s5 + $0x3a0] sm:$0xff]  ;;  %v966_v34 = vrot.slane %v2815_v5, %v965_v15  ;;  %v1489_v15 = vld [vmem:[%s3297_s9 + $0x8] sm:$0xff] }
  0xe5   : > { %2189 = vmatprep.subr.mxu1 %v1084_v35  ;;  %2224 = vmatprep.subr.mxu0 %v1116_v36  ;;  %v1091_v35 = vld [vmem:[%s3293_s5 + $0x320] sm:$0xff]  ;;  %v962_v36 = vrot.slane %v2815_v5, %v961_v26 }
  0xe6   : > { %2190 = vmatpush3.msra.mxu1 %v1068_v38  ;;  %2225 = vmatpush3.msra.mxu0 %v1100_v39  ;;  %v2908_v46 = vpop.f32.mrf.mxu0  ;;  %v1106_v39 = vld [vmem:[%s3293_s5 + $0x398] sm:$0xff]  ;;  %v1643_v26 = vld [vmem:[%s3294_s6 + $0xc0] sm:$0xff] }
  0xe7   : > { %2191 = vmatprep.subr.mxu1 %v1083_v40  ;;  %2226 = vmatprep.subr.mxu0 %v1115_v41  ;;  %v1058_v40 = vld [vmem:[%s3293_s5 + $0x218] sm:$0xff]  ;;  %v954_v41 = vrot.slane %v2815_v5, %v953_v30  ;;  %v1057_v5 = vld [vmem:[%s3293_s5 + $0x210] sm:$0xff] }
  0xe8   : > { %2192 = vmatpush3.msra.mxu1 %v1067_v42  ;;  %2227 = vmatpush3.msra.mxu0 %v1099_v43  ;;  %v2923_v52 = vpop.f32.mrf.mxu0  ;;  %v1090_v42 = vld [vmem:[%s3293_s5 + $0x318] sm:$0xff]  ;;  %v1073_v43 = vld [vmem:[%s3293_s5 + $0x290] sm:$0xff] }
  0xe9   : > { %2193 = vmatprep.subr.mxu1 %v1082_v44  ;;  %2228 = vmatprep.subr.mxu0 %v1114_v45  ;;  %v980_v55 = vmul.f32 %v958_v47, %v2923_v52  ;;  %v1105_v45 = vld [vmem:[%s3293_s5 + $0x390] sm:$0xff]  ;;  %v3044_v47 = vld [vmem:[%s2829_s27 + $0x38] sm:$0xff] }
  0xea   : > { %2194 = vmatpush3.msra.mxu1 %v1066_v48  ;;  %2229 = vmatpush3.msra.mxu0 %v1098_v49  ;;  %v2991_v24 = vpop.f32.mrf.mxu1  ;;  %v1089_v49 = vld [vmem:[%s3293_s5 + $0x310] sm:$0xff] }
  0xeb   : > { %2195 = vmatprep.subr.mxu1 %v1081_v50  ;;  %2230 = vmatprep.subr.mxu0 %v1113_v51  ;;  %v988_v1 = vmul.f32 %v980_v55, %v2939_v58  ;;  %v981_v48 = vmul.f32 %v962_v36, %v2991_v24  ;;  %v1072_v50 = vld [vmem:[%s3293_s5 + $0x288] sm:$0xff]  ;;  %v3054_v51 = vld [vmem:[%s2829_s27 + $0x30] sm:$0xff]  ;;  %v979_v55 = vmul.f32 %v954_v41, %v2908_v46 }
  0xec   : > { %2196 = vmatpush3.msra.mxu1 %v1065_v53  ;;  %2231 = vmatpush3.msra.mxu0 %v1097_v54  ;;  %v3021_v38 = vpop.f32.mrf.mxu1  ;;  %v1104_v53 = vld [vmem:[%s3293_s5 + $0x388] sm:$0xff] }
  0xed   : > { %2197 = vmatprep.subr.mxu1 %v1080_v56  ;;  %2232 = vmatprep.subr.mxu0 %v1112_v57  ;;  %v982_v44 = vmul.f32 %v966_v34, %v3021_v38  ;;  %v1056_v54 = vld [vmem:[%s3293_s5 + $0x208] sm:$0xff]  ;;  %v1071_v57 = vld [vmem:[%s3293_s5 + $0x280] sm:$0xff] }
  0xee   : > { %2198 = vmatpush3.msra.mxu1 %v1064_v59  ;;  %2233 = vmatpush3.msra.mxu0 %v1096_v60  ;;  %v1088_v56 = vld [vmem:[%s3293_s5 + $0x308] sm:$0xff]  ;;  %v3070_v59 = vld [vmem:[%s2829_s27 + $0x20] sm:$0xff] }
  0xef   : > { %2199 = vmatprep.subr.mxu1 %v1079_v61  ;;  %2234 = vmatprep.subr.mxu0 %v1111_v62  ;;  %v990_v60 = vmul.f32 %v982_v44, %v3044_v47  ;;  %v1103_v61 = vld [vmem:[%s3293_s5 + $0x380] sm:$0xff] }
  0xf0   : > { %2200 = vmatpush3.msra.mxu1 %v1063_v63  ;;  %2235 = vmatpush3.msra.mxu0 %v1095_v0  ;;  %v1055_v62 = vld [vmem:[%s3293_s5 + $0x200] sm:$0xff]  ;;  %v989_v63 = vmul.f32 %v981_v48, %v3054_v51 }
  0xf1   : > { %2201 = vmatprep.subr.mxu1 %v1078_v3  ;;  %2236 = vmatprep.subr.mxu0 %v1110_v4  ;;  %v1087_v0 = vld [vmem:[%s3293_s5 + $0x300] sm:$0xff]  ;;  %v1403_v3 = vld [vmem:[%s3295_s7 + $0x18] sm:$0xff] }
  0xf2   : > { %2202 = vmatpush3.msra.mxu1 %v1062_v6  ;;  %1323 = vmatprep.mubr.f32.mxu1 %v988_v1  ;;  %v919_v23 = vpop.f32.mrf.mxu0  ;;  %v987_v1 = vmul.f32 %v979_v55, %v3070_v59  ;;  %v1402_v6 = vld [vmem:[%s3295_s7 + $0x10] sm:$0xff]  ;;  %v2093_v44 = vld [vmem:[%s3296_s8] ss:$0 sm:$0xff] }
  0xf3   : > { %2237 = vmatpush3.msra.mxu0 %v1094_v7  ;;  %2203 = vmatprep.subr.mxu1 %v1077_v8  ;;  %v931_v28 = vadd.f32 %v2092_v9, %v919_v23  ;;  %v1401_v7 = vld [vmem:[%s3295_s7 + $0x8] sm:$0xff]  ;;  %v1400_v8 = vld [vmem:[%s3295_s7] sm:$0xff]  ;;  %v1491_v9 = vld [vmem:[%s3297_s9 + $0x18] sm:$0xff] }
  0xf4   : > { %2238 = vmatprep.subr.mxu0 %v1109_v10  ;;  %2204 = vmatpush3.msra.mxu1 %v1061_v11  ;;  %v1490_v10 = vld [vmem:[%s3297_s9 + $0x10] sm:$0xff]  ;;  %v2320_v11 = vmov 32   ;;  %v1646_v23 = vld [vmem:[%s3294_s6 + $0xd8] sm:$0xff]  ;;  %v1627_v55 = vld [vmem:[%s3294_s6 + $0x40] sm:$0xff] }
  0xf5   : > { %2239 = vmatpush3.msra.mxu0 %v1093_v18  ;;  %2205 = vmatprep.subr.mxu1 %v1076_v22  ;;  %2300 = vtanh.f32 %v931_v28  ;;  %v1488_v18 = vld [vmem:[%s3297_s9] sm:$0xff]  ;;  %v1644_v22 = vld [vmem:[%s3294_s6 + $0xc8] sm:$0xff]  ;;  %v921_v28 = vpop.f32.mrf.mxu0 }
  0xf6   : > { %2240 = vmatprep.subr.mxu0 %v1108_v27  ;;  %2206 = vmatpush3.msra.mxu1 %v1060_v29  ;;  %v1636_v27 = vld [vmem:[%s3294_s6 + $0x88] sm:$0xff] }
  0xf7   : > { %2241 = vmatpush3.msra.mxu0 %v1092_v31  ;;  %2207 = vmatprep.subr.mxu1 %v1075_v32 }
  0xf8   : > { %2242 = vmatprep.subr.mxu0 %v1107_v33  ;;  %2208 = vmatpush3.msra.mxu1 %v1059_v2 }
  0xf9   : > { %2243 = vmatpush3.msra.mxu0 %v1091_v35  ;;  %2209 = vmatprep.subr.mxu1 %v1074_v37 }
  0xfa   : > { %2244 = vmatprep.subr.mxu0 %v1106_v39  ;;  %2210 = vmatpush3.msra.mxu1 %v1058_v40 }
  0xfb   : > { %2245 = vmatpush3.msra.mxu0 %v1090_v42  ;;  %2211 = vmatprep.subr.mxu1 %v1073_v43 }
  0xfc   : > { %2246 = vmatprep.subr.mxu0 %v1105_v45  ;;  %2212 = vmatpush3.msra.mxu1 %v1057_v5 }
  0xfd   : > { %2247 = vmatpush3.msra.mxu0 %v1089_v49  ;;  %2213 = vmatprep.subr.mxu1 %v1072_v50 }
  0xfe   : > { %2248 = vmatprep.subr.mxu0 %v1104_v53  ;;  %2214 = vmatpush3.msra.mxu1 %v1056_v54  ;;  %v1635_v53 = vld [vmem:[%s3294_s6 + $0x80] sm:$0xff]  ;;  %v1628_v54 = vld [vmem:[%s3294_s6 + $0x48] sm:$0xff] }
  0xff   : > { %2249 = vmatpush3.msra.mxu0 %v1088_v56  ;;  %2215 = vmatprep.subr.mxu1 %v1071_v57  ;;  %v1620_v56 = vld [vmem:[%s3294_s6 + $0x8] sm:$0xff] }
 0x100   : > { %2250 = vmatprep.subr.mxu0 %v1103_v61  ;;  %2216 = vmatpush3.msra.mxu1 %v1055_v62  ;;  %v1645_v61 = vld [vmem:[%s3294_s6 + $0xd0] sm:$0xff]  ;;  %v1648_v62 = vld [vmem:[%s3294_s6 + $0xe8] sm:$0xff] }
 0x101   : > { %2251 = vmatpush3.msra.mxu0 %v1087_v0  ;;  %1393 = vmatprep.mubr.f32.mxu0 %v990_v60  ;;  %v1619_v60 = vld [vmem:[%s3294_s6] sm:$0xff]  ;;  %v1638_v0 = vld [vmem:[%s3294_s6 + $0x98] sm:$0xff] }
 0x102   : > { %v3094_v4 = vpop.eup %2300  ;;  %1324 = vmatmul.mubr.f32.vlgmr.msra.gmra.mxu1 %v987_v1  ;;  %1394 = vmatmul.mubr.f32.vlgmr.msra.gmra.mxu0 %v989_v63  ;;  %v1637_v1 = vld [vmem:[%s3294_s6 + $0x90] sm:$0xff] }
 0x103   : > { %2265 = vmatprep.subr.mxu1 %v2318_v25  ;;  %2273 = vmatprep.mubr.msk.f32.mxu1 %vm2319_vm2, %v2318_v25  ;;  %1584 = vst.msk [vmem:[%s3089_s21] sm:$0xff] %vm1411_vm1, %v3094_v4 }
 0x104   : > { %2266 = vmatpush3.msra.mxu1 %v1403_v3  ;;  %1718 = vmatprep.mubr.f32.mxu0 %v2318_v25  ;;  %v1630_v3 = vld [vmem:[%s3294_s6 + $0x58] sm:$0xff] }
 0x105   : > { %2267 = vmatprep.subr.mxu1 %v2318_v25  ;;  %2299 = vset.pattern.permute.xlu0 %v2320_v11  ;;  %v2098_v11 = vld [vmem:[%s3300_s12] ss:$0 sm:$0xff] }
 0x106   : > { %2268 = vmatpush3.msra.mxu1 %v1402_v6  ;;  %1678 = vmatprep.subr.mxu0 %v1644_v22  ;;  %v1629_v6 = vld [vmem:[%s3294_s6 + $0x50] sm:$0xff] }
 0x107   : > { %2269 = vmatprep.subr.mxu1 %v2318_v25  ;;  %1679 = vmatpush1.msra.mxu0 %v1643_v26  ;;  %v1647_v26 = vld [vmem:[%s3294_s6 + $0xe0] sm:$0xff] }
 0x108   : > { %2270 = vmatpush3.msra.mxu1 %v1401_v7  ;;  %1680 = vmatprep.subr.mxu0 %v1636_v27  ;;  %v1622_v7 = vld [vmem:[%s3294_s6 + $0x18] sm:$0xff]  ;;  %v1649_v27 = vld [vmem:[%s3294_s6 + $0xf0] sm:$0xff] }
 0x109   : > { %2271 = vmatprep.subr.mxu1 %v2318_v25  ;;  %1681 = vmatpush1.msra.mxu0 %v1635_v53 }
 0x10a   : > { %2272 = vmatpush3.msra.mxu1 %v1400_v8  ;;  %1682 = vmatprep.subr.mxu0 %v1628_v54  ;;  %v1621_v8 = vld [vmem:[%s3294_s6 + $0x10] sm:$0xff] }
 0x10b   : > { %2274 = vmatmul.mubr.msk.f32.vlgmr.msra.gmra.mxu1 %vm1411_vm1, %v3094_v4  ;;  %2276 = vmatprep.subr.mxu1 %v2318_v25 }
 0x10c   : > { %2284 = vmatprep.mubr.msk.f32.mxu1 %vm2319_vm2, %v2318_v25  ;;  %2277 = vmatpush3.msra.mxu1 %v1491_v9  ;;  %v1650_v9 = vld [vmem:[%s3294_s6 + $0xf8] sm:$0xff] }
 0x10d   : > { %2278 = vmatprep.subr.mxu1 %v2318_v25  ;;  %1683 = vmatpush1.msra.mxu0 %v1627_v55 }
 0x10e   : > { %2279 = vmatpush3.msra.mxu1 %v1490_v10  ;;  %1684 = vmatprep.subr.mxu0 %v1620_v56  ;;  %v2097_v10 = vld [vmem:[%s3299_s11] ss:$0 sm:$0xff] }
 0x10f   : > { %2280 = vmatprep.subr.mxu1 %v2318_v25  ;;  %1685 = vmatpush1.msra.mxu0 %v1619_v60 }
 0x110   : > { %2281 = vmatpush3.msra.mxu1 %v1489_v15  ;;  %1820 = vmatprep.subr.mxu0 %v1648_v62 }
 0x111   : > { %2282 = vmatprep.subr.mxu1 %v2318_v25 }
 0x112   : > { %2283 = vmatpush3.msra.mxu1 %v1488_v18 }
 0x113   : > { %1749 = vmatprep.subr.mxu1 %v1646_v23 }
 0x1a1   : > { %v2147_v29 = vpop.f32.mrf.mxu1  ;;  %v2182_v30 = vpop.f32.mrf.mxu0 }
 0x1a3   : > { %v2148_v31 = vpop.f32.mrf.mxu1  ;;  %v2183_v32 = vpop.f32.mrf.mxu0 }
 0x1a4   : > { %v2149_v33 = vadd.f32 %v2148_v31, %v2147_v29  ;;  %v2184_v2 = vadd.f32 %v2183_v32, %v2182_v30  ;;  %v1642_v29 = vld [vmem:[%s3294_s6 + $0xb8] sm:$0xff]  ;;  %v1641_v30 = vld [vmem:[%s3294_s6 + $0xb0] sm:$0xff]  ;;  %v1632_v31 = vld [vmem:[%s3294_s6 + $0x68] sm:$0xff] }
 0x1a5   : > { %v1634_v32 = vld [vmem:[%s3294_s6 + $0x78] sm:$0xff] }
 0x1a6   : > { %v1256_v39 = vadd.f32 %v2184_v2, %v2149_v33  ;;  %v1631_v33 = vld [vmem:[%s3294_s6 + $0x60] sm:$0xff]  ;;  %v1633_v2 = vld [vmem:[%s3294_s6 + $0x70] sm:$0xff] }
 0x1c2   : > { %v2217_v34 = vpop.f32.mrf.mxu1  ;;  %v2252_v35 = vpop.f32.mrf.mxu0 }
 0x1c4   : > { %v2218_v36 = vpop.f32.mrf.mxu1  ;;  %v2253_v37 = vpop.f32.mrf.mxu0 }
 0x1c5   : > { %v2219_v40 = vadd.f32 %v2218_v36, %v2217_v34  ;;  %v2254_v42 = vadd.f32 %v2253_v37, %v2252_v35  ;;  %v1624_v34 = vld [vmem:[%s3294_s6 + $0x28] sm:$0xff]  ;;  %v1626_v35 = vld [vmem:[%s3294_s6 + $0x38] sm:$0xff]  ;;  %v1623_v36 = vld [vmem:[%s3294_s6 + $0x20] sm:$0xff] }
 0x1c6   : > { %v1625_v37 = vld [vmem:[%s3294_s6 + $0x30] sm:$0xff] }
 0x1c7   : > { %v1326_v41 = vadd.f32 %v2219_v40, %v1256_v39  ;;  %v2095_v39 = vld [vmem:[%s3298_s10] ss:$0 sm:$0xff] }
 0x1c9   : > { %v1396_v43 = vadd.f32 %v2254_v42, %v1326_v41 }
 0x1cb   : > { %v1399_v45 = vadd.f32 %v1396_v43, %v921_v28  ;;  %v1481_v5 = vpop.f32.mrf.mxu1  ;;  %v1640_v28 = vld [vmem:[%s3294_s6 + $0xa8] sm:$0xff] }
 0x1cc   : > { %v1482_v48 = vadd.f32 %v2093_v44, %v1481_v5 }
 0x1cd   : > { %v2275_v49 = vpop.f32.mrf.mxu1 }
 0x1ce   : > { %v1485_v50 = vadd.f32 %v1482_v48, %v1399_v45  ;;  %2302 = vtanh.f32 %v1482_v48 }
 0x1d0   : > { %2304 = vtanh.f32 %v1485_v50 }
 0x1db   : > { %v2303_v57 = vpop.eup %2302 }
 0x1dc   : > { %1600 = vperm.xlu0 %2299, %v2303_v57  }
 0x1dd   : > { %v2305_v63 = vpop.eup %2304 }
 0x1de   : > { %2285 = vmatmul.mubr.msk.f32.vlgmr.msra.gmra.mxu1 %vm1411_vm1, %v2305_v63 }
 0x1df   : > { %1750 = vmatpush1.msra.mxu1 %v1645_v61  ;;  %1789 = vmatprep.mubr.f32.mxu1 %v2318_v25 }
 0x1e0   : > { %1751 = vmatprep.subr.mxu1 %v1638_v0 }
 0x1e1   : > { %1752 = vmatpush1.msra.mxu1 %v1637_v1 }
 0x1e2   : > { %1753 = vmatprep.subr.mxu1 %v1630_v3 }
 0x1e3   : > { %1754 = vmatpush1.msra.mxu1 %v1629_v6 }
 0x1e4   : > { %1755 = vmatprep.subr.mxu1 %v1622_v7 }
 0x1e5   : > { %1756 = vmatpush1.msra.mxu1 %v1621_v8 }
 0x1e6   : > { %1891 = vmatprep.subr.mxu1 %v1650_v9 }
 0x257   : > { %v1601_v15 = vpop.permute.xlu0 %1600 }
 0x258   : > { %v1609_v18 = vmul.f32 %v2097_v10, %v1601_v15 }
 0x25a   : > { %v1617_v22 = vadd.f32 %v2098_v11, %v1609_v18 }
 0x25c   : > { %v1618_v23 = vmul.f32 %v3094_v4, %v1617_v22  ;;  %v1639_v4 = vld [vmem:[%s3294_s6 + $0xa0] sm:$0xff] }
 0x25e   : > { %2099 = vmatmul.mubr.msk.f32.vlgmr.msra.gmra.mxu0 %vm1411_vm1, %v1618_v23  ;;  %2100 = vmatmul.mubr.msk.f32.vlgmr.msra.gmra.mxu1 %vm1411_vm1, %v1618_v23 }
 0x25f   : > { %1821 = vmatpush1.msra.mxu0 %v1647_v26  ;;  %1892 = vmatpush1.msra.mxu1 %v1649_v27 }
 0x260   : > { %1822 = vmatprep.subr.mxu0 %v1640_v28  ;;  %1893 = vmatprep.subr.mxu1 %v1642_v29 }
 0x261   : > { %1823 = vmatpush1.msra.mxu0 %v1639_v4  ;;  %1894 = vmatpush1.msra.mxu1 %v1641_v30 }
 0x262   : > { %1824 = vmatprep.subr.mxu0 %v1632_v31  ;;  %1895 = vmatprep.subr.mxu1 %v1634_v32 }
 0x263   : > { %1825 = vmatpush1.msra.mxu0 %v1631_v33  ;;  %1896 = vmatpush1.msra.mxu1 %v1633_v2 }
 0x264   : > { %1826 = vmatprep.subr.mxu0 %v1624_v34  ;;  %1897 = vmatprep.subr.mxu1 %v1626_v35 }
 0x265   : > { %1827 = vmatpush1.msra.mxu0 %v1623_v36  ;;  %1860 = vmatprep.mubr.f32.mxu0 %v2318_v25 }
 0x266   : > { %1898 = vmatpush1.msra.mxu1 %v1625_v37  ;;  %1931 = vmatprep.mubr.f32.mxu1 %v2318_v25 }
 0x267   : > { %2101 = vmatmul.mubr.msk.f32.vlgmr.msra.gmra.mxu0 %vm1411_vm1, %v1618_v23  ;;  %2102 = vmatmul.mubr.msk.f32.vlgmr.msra.gmra.mxu1 %vm1411_vm1, %v1618_v23 }
 0x29e   : > { %v1568_v40 = vpop.f32.mrf.mxu1 }
 0x29f   : > { %v1569_v41 = vadd.f32 %v2095_v39, %v1568_v40 }
 0x2a0   : > { %v2286_v42 = vpop.f32.mrf.mxu1 }
 0x2a1   : > { %v1573_v43 = vsel %vm1572_vm3, %v1569_v41, -inf }
 0x2a2   : > { %1574 = vmax.xlane.f32.xlu0 %v1573_v43 }
 0x31e   : > { %v1720_v44 = vpop.f32.mrf.mxu0  ;;  %v1791_v45 = vpop.f32.mrf.mxu1 }
 0x31f   : > { %v1938_v25 = vmul.f32 %v1720_v44, %v2831_v12  ;;  %v1940_v5 = vmul.f32 %v1791_v45, %v2833_v13 }
 0x320   : > { %v1722_v48 = vpop.f32.mrf.mxu0  ;;  %v1793_v49 = vpop.f32.mrf.mxu1 }
 0x321   : > { %v1946_v50 = vadd.f32 %v1938_v25, %v2851_v21  ;;  %v1948_v53 = vadd.f32 %v1940_v5, %v2836_v14  ;;  %v1939_v54 = vmul.f32 %v1722_v48, %v2846_v19  ;;  %v1941_v55 = vmul.f32 %v1793_v49, %v2848_v20 }
 0x323   : > { %v2103_v12 = vclamps-f32 %v1946_v50, 2.0  ;;  %v2105_v13 = vclamps-f32 %v1948_v53, 2.0  ;;  %v1947_v21 = vadd.f32 %v1939_v54, %v2840_v16  ;;  %v1949_v14 = vadd.f32 %v1941_v55, %v2843_v17 }
 0x325   : > { %1970 = vst [vmem:[%s3262_s15] sm:$0xff] %v2103_v12  ;;  %1972 = vst [vmem:[%s3262_s15 + $0x10] sm:$0xff] %v2105_v13  ;;  %v2104_v19 = vclamps-f32 %v1947_v21, 2.0  ;;  %v2106_v20 = vclamps-f32 %v1949_v14, 2.0 }
 0x327   : > { %1971 = vst [vmem:[%s3262_s15 + $0x8] sm:$0xff] %v2104_v19  ;;  %1973 = vst [vmem:[%s3262_s15 + $0x18] sm:$0xff] %v2106_v20  ;;  %v1862_v56 = vpop.f32.mrf.mxu0  ;;  %v1933_v57 = vpop.f32.mrf.mxu1 }
 0x328   : > { %v1942_v60 = vmul.f32 %v1862_v56, %v2908_v46  ;;  %v1944_v61 = vmul.f32 %v1933_v57, %v2991_v24 }
 0x329   : > { %v1864_v62 = vpop.f32.mrf.mxu0  ;;  %v1935_v63 = vpop.f32.mrf.mxu1 }
 0x32a   : > { %v1950_v16 = vadd.f32 %v1942_v60, %v3070_v59  ;;  %v1952_v17 = vadd.f32 %v1944_v61, %v3054_v51  ;;  %v1943_v0 = vmul.f32 %v1864_v62, %v2923_v52  ;;  %v1945_v1 = vmul.f32 %v1935_v63, %v3021_v38 }
 0x32b   : > { %v1575_v3 = vpop.xlane.xlu0 %1574 }
 0x32c   : > { %v2107_v6 = vclamps-f32 %v1950_v16, 2.0  ;;  %v2109_v7 = vclamps-f32 %v1952_v17, 2.0  ;;  %v1951_v8 = vadd.f32 %v1943_v0, %v2939_v58  ;;  %v1953_v46 = vadd.f32 %v1945_v1, %v3044_v47 }
 0x32d   : > { %v1576_v24 = vsub.f32 %v1569_v41, %v1575_v3 }
 0x32e   : > { %1974 = vst [vmem:[%s3262_s15 + $0x20] sm:$0xff] %v2107_v6  ;;  %1976 = vst [vmem:[%s3262_s15 + $0x30] sm:$0xff] %v2109_v7  ;;  %v2108_v9 = vclamps-f32 %v1951_v8, 2.0  ;;  %v2110_v10 = vclamps-f32 %v1953_v46, 2.0 }
 0x32f   : > { %v1577_v59 = vmul.f32 1.442695, %v1576_v24 }
 0x330   : > { %1975 = vst [vmem:[%s3262_s15 + $0x28] sm:$0xff] %v2108_v9  ;;  %1977 = vst [vmem:[%s3262_s15 + $0x38] sm:$0xff] %v2110_v10 }
 0x331   : > { %2306 = vpow2.f32 %v1577_v59 }
 0x33e   : > { %v2307_v52 = vpop.eup %2306 }
 0x33f   : > { %v1579_v38 = vsel %vm1572_vm3, %v2307_v52, 0.0 }
 0x340   : > { %1580 = vadd.xlane.f32.xlu1 %v1579_v38 }
 0x3c9   : > { %v1581_v51 = vpop.xlane.xlu1 %1580 }
 0x3ca   : > { %2308 = vrcp.f32 %v1581_v51 }
 0x3d7   : > { %v2309_v58 = vpop.eup %2308 }
 0x3d8   : > { %v1583_v11 = vmul.f32 %v2309_v58, %v2307_v52 }
 0x3da   : > { %1586 = vrot.lane.b32.xlu1 %v1583_v11, %s2321_s30 }
 0x3de   : > { %1592 = vrot.lane.b32.xlu1 %v1569_v41, %s2321_s30 }
 0x44c   : > { %v1587_v47 = vpop.permute.xlu1 %1586 }
 0x44d   : > { %1590 = vst.msk [vmem:[%s3089_s21] sm:$0xff] %vm1589_vm4, %v1587_v47 }
 0x450   : > { %v1593_v15 = vpop.permute.xlu1 %1592 }
 0x451   : > { %1596 = vst.msk [vmem:[%s3089_s21] sm:$0xff] %vm1595_vm5, %v1593_v15 }
 0x452 PF: > { %s25_s29 = sadd.s32 1, %s2316_s29  }
 0x453   : > { %p22_p4 = scmp.ge.s32.totalorder %s25_s29, 4  }
 0x455   :  { %24 = sbr.rel (!%p22_p4) target bundleno = 1 (0x1), region = 117 }

</bundles_post_ra>
